<compile_context>
chip_gen: v6e
topology: v6e:2x2x1
jax: 0.10.0
libtpu: 0.0.40
codegen_flags: <defaults>
</compile_context>

<pallas_src>
import functools
import math

import jax
import jax.numpy as jnp
from jax import lax
from jax.experimental import pallas as pl
from jax.experimental.pallas import tpu as pltpu

_INV_SQRT2 = 1.0 / math.sqrt(2.0)


def _gelu(x, approximate=False):
    """GELU. Exact erf form (torch default) or tanh approximation (EUP-friendly)."""
    if approximate:
        return jax.nn.gelu(x, approximate=True)
    return 0.5 * x * (1.0 + lax.erf(x * jnp.float32(_INV_SQRT2)))


def _round_up(n, m):
    return (n + m - 1) // m * m


# --------------------------------------------------------------------------- #
#  Kernel
# --------------------------------------------------------------------------- #
def _mlp_dwbn_kernel(x_ref, w1_ref, b1_ref, kdw_ref, bdw_ref, w2_ref, b2_ref,
                     o_ref, *, H, W, approximate_gelu):
    HW = H * W
    kidx = pl.program_id(1)                      # hidden-tile index ("arbitrary")
    act = functools.partial(_gelu, approximate=approximate_gelu)

    # ---- fc1 (1x1 conv) with folded BN1, then GELU  (bf16 MXU, f32 accum) ----
    x = x_ref[0]                                                   # (HW, Cp) bf16
    h = jnp.dot(x, w1_ref[...], preferred_element_type=jnp.float32)
    h = act(h + b1_ref[...])                                       # (HW, TH) f32
    th = h.shape[-1]

    # ---- depthwise 3x3 conv (padding=1) + folded BN2 + GELU, halo-free -------
    # Row/column validity masks from an in-kernel sublane iota.
    n_idx = lax.broadcasted_iota(jnp.int32, (HW, th), 0)           # flat token id
    if (W & (W - 1)) == 0:                  # power-of-two width: cheap bitwise AND
        col = n_idx & (W - 1)
    else:
        col = n_idx % W

    kdw = kdw_ref[...]                                             # (9, TH) f32

    # Vertical neighbours via sublane rotation (pltpu.roll == jnp.roll; positive
    # shifts only), zeroed outside the image.
    h_up = jnp.where(n_idx >= W, pltpu.roll(h, W, axis=0), 0.0)            # h[n-W]
    h_dn = jnp.where(n_idx < HW - W, pltpu.roll(h, HW - W, axis=0), 0.0)   # h[n+W]

    # centre column (dw = 0): taps 1, 4, 7
    conv = h_up * kdw[1:2, :] + h * kdw[4:5, :] + h_dn * kdw[7:8, :]

    # left column (dw = -1): taps 0, 3, 6 -- sum first, mask once
    left = (pltpu.roll(h_up, 1, axis=0) * kdw[0:1, :]
            + pltpu.roll(h, 1, axis=0) * kdw[3:4, :]
            + pltpu.roll(h_dn, 1, axis=0) * kdw[6:7, :])
    conv = conv + jnp.where(col > 0, left, 0.0)

    # right column (dw = +1): taps 2, 5, 8 -- shift by -1 == HW - 1 (circular)
    right = (pltpu.roll(h_up, HW - 1, axis=0) * kdw[2:3, :]
             + pltpu.roll(h, HW - 1, axis=0) * kdw[5:6, :]
             + pltpu.roll(h_dn, HW - 1, axis=0) * kdw[8:9, :])
    conv = conv + jnp.where(col < W - 1, right, 0.0)

    h2 = act(conv + bdw_ref[...])                                  # (HW, TH) f32

    # ---- partial fc2 (1x1 conv), accumulated into the resident output block ----
    y_part = jnp.dot(h2.astype(jnp.bfloat16), w2_ref[...],
                     preferred_element_type=jnp.float32)           # (HW, Op) f32

    @pl.when(kidx == 0)
    def _first():
        o_ref[0] = y_part

    @pl.when(kidx > 0)
    def _accumulate():
        o_ref[0] += y_part

    # ---- finalize: folded BN3 bias + GELU in place, lane-dense output --------
    @pl.when(kidx == pl.num_programs(1) - 1)
    def _finalize():
        o_ref[0] = act(o_ref[0] + b2_ref[...]).astype(o_ref.dtype)


# --------------------------------------------------------------------------- #
#  BatchNorm folding (eval mode), VMEM sizing, wrapper
# --------------------------------------------------------------------------- #
def _fold_batchnorms(params, C_in, eps):
    hidden = params["fc1_w"].shape[0]
    C_out = params["fc2_w"].shape[0]

    s1 = params["bn1_gamma"] / jnp.sqrt(params["bn1_var"] + eps)
    w1f = params["fc1_w"].reshape(hidden, C_in).T * s1[None, :]           # (C_in, hid)
    b1f = (params["fc1_b"] - params["bn1_mean"]) * s1 + params["bn1_beta"]

    s2 = params["bn2_gamma"] / jnp.sqrt(params["bn2_var"] + eps)
    kdwf = params["dw_w"].reshape(hidden, 9) * s2[:, None]                # (hid, 9)
    bdwf = (params["dw_b"] - params["bn2_mean"]) * s2 + params["bn2_beta"]

    s3 = params["bn3_gamma"] / jnp.sqrt(params["bn3_var"] + eps)
    w2f = params["fc2_w"].reshape(C_out, hidden).T * s3[None, :]          # (hid, C_out)
    b2f = (params["fc2_b"] - params["bn3_mean"]) * s3 + params["bn3_beta"]
    return w1f, b1f, kdwf, bdwf, w2f, b2f


def _pick_vmem_limit(needed_bytes):
    """VMEM limit from actual need, capped at 3/4 of this chip's physical VMEM."""
    try:
        phys = pltpu.get_tpu_info().vmem_capacity_bytes
    except Exception:
        phys = 64 * 1024 * 1024            # conservative: v7x per-TensorCore size
    cap = phys * 3 // 4                    # leave headroom for Mosaic scratch / DMA
    want = max(32 * 1024 * 1024, 2 * needed_bytes)
    return int(min(cap, want))


def mlp_dwbn_forward(x, params, H, W, *, eps=1e-5, hidden_tile=None,
                     approximate_gelu=False):
    """Inference forward of MlpDWBN.

    x : (B, N, C_in) with N == H*W (or H*W + 1; leading cls token passes through)
        or (B, C_in, H, W).  Returns the same layout with C_out channels.
    """
    if x.ndim == 4:                         # NCHW path of the PyTorch module
        B4, C4, H4, W4 = x.shape
        tok = x.reshape(B4, C4, H4 * W4).transpose(0, 2, 1)
        y = mlp_dwbn_forward(tok, params, H4, W4, eps=eps, hidden_tile=hidden_tile,
                             approximate_gelu=approximate_gelu)
        C_out4 = params["fc2_w"].shape[0]
        return y.transpose(0, 2, 1).reshape(B4, C_out4, H4, W4)

    B, N, C_in = x.shape
    cls_tok = None
    if N == H * W + 1:
        cls_tok, x = x[:, :1, :], x[:, 1:, :]
    elif N != H * W:
        raise ValueError("N must be H*W or H*W + 1")
    HW = H * W

    hidden = params["fc1_w"].shape[0]
    C_out = params["fc2_w"].shape[0]
    w1f, b1f, kdwf, bdwf, w2f, b2f = _fold_batchnorms(params, C_in, eps)

    # ---- pad every channel axis to a multiple of 128 (lane-dense tiles) ----
    Cp = _round_up(C_in, 128)
    Hp = _round_up(hidden, 128)
    Op = _round_up(C_out, 128)

    x_p = jnp.zeros((B, HW, Cp), jnp.bfloat16).at[:, :, :C_in].set(
        x.astype(jnp.bfloat16))
    w1_p = jnp.zeros((Cp, Hp), jnp.bfloat16).at[:C_in, :hidden].set(
        w1f.astype(jnp.bfloat16))
    b1_p = jnp.zeros((1, Hp), jnp.float32).at[0, :hidden].set(b1f)
    kdw_p = jnp.zeros((9, Hp), jnp.float32).at[:, :hidden].set(kdwf.T)
    bdw_p = jnp.zeros((1, Hp), jnp.float32).at[0, :hidden].set(bdwf)
    w2_p = jnp.zeros((Hp, Op), jnp.bfloat16).at[:hidden, :C_out].set(
        w2f.astype(jnp.bfloat16))
    b2_p = jnp.zeros((1, Op), jnp.float32).at[0, :C_out].set(b2f)

    # ---- hidden-dim streaming: weight residency O(hidden_tile) ----
    # Note: on 128-MiB parts (v5e/v6e) a larger hidden_tile (512) halves grid
    # overhead when Hp allows; keep <=256 on v7x (64 MiB VMEM).  Tunable here.
    if hidden_tile is None:
        hidden_tile = 256 if Hp % 256 == 0 else 128
    assert Hp % hidden_tile == 0
    n_htiles = Hp // hidden_tile

    flops = 2 * B * HW * (Cp * Hp + 9 * Hp + Hp * Op)
    transcendentals = B * HW * (2 * Hp + Op)
    bytes_accessed = (x_p.size * 2 + B * (w1_p.size * 2 + w2_p.size * 2)
                      + (b1_p.size + kdw_p.size + bdw_p.size + b2_p.size) * 4
                      + B * HW * Op * 4)

    # Actual per-step block footprint (double-buffered inputs + resident output).
    needed_vmem = 2 * (HW * Cp * 2                 # x block (bf16)
                       + Cp * hidden_tile * 2      # w1 tile (bf16)
                       + hidden_tile * Op * 2      # w2 tile (bf16)
                       + HW * Op * 4               # resident output block (f32)
                       + 12 * hidden_tile * 4 + Op * 4)   # taps + biases

    out = pl.pallas_call(
        functools.partial(_mlp_dwbn_kernel, H=H, W=W,
                          approximate_gelu=approximate_gelu),
        out_shape=jax.ShapeDtypeStruct((B, HW, Op), jnp.float32),
        grid_spec=pltpu.PrefetchScalarGridSpec(
            num_scalar_prefetch=0,
            grid=(B, n_htiles),                    # hidden (reduction) axis last
            in_specs=[
                # whole (padded) token image; constant across hidden tiles
                pl.BlockSpec((1, HW, Cp), lambda b, k: (b, 0, 0)),
                # hidden-tiled weights / biases / dw taps
                pl.BlockSpec((Cp, hidden_tile), lambda b, k: (0, k)),
                pl.BlockSpec((1, hidden_tile), lambda b, k: (0, k)),
                pl.BlockSpec((9, hidden_tile), lambda b, k: (0, k)),
                pl.BlockSpec((1, hidden_tile), lambda b, k: (0, k)),
                pl.BlockSpec((hidden_tile, Op), lambda b, k: (k, 0)),
                pl.BlockSpec((1, Op), lambda b, k: (0, 0)),
            ],
            out_specs=pl.BlockSpec((1, HW, Op), lambda b, k: (b, 0, 0)),
        ),
        compiler_params=pltpu.CompilerParams(
            dimension_semantics=("parallel", "arbitrary"),   # batch megacore-parallel
            vmem_limit_bytes=_pick_vmem_limit(needed_vmem),
        ),
        cost_estimate=pl.CostEstimate(flops=flops,
                                      transcendentals=transcendentals,
                                      bytes_accessed=bytes_accessed),
    )(x_p, w1_p, b1_p, kdw_p, bdw_p, w2_p, b2_p)

    y = out[:, :, :C_out]
    if cls_tok is not None:
        y = jnp.concatenate([cls_tok, y], axis=1)
    return y


# --------------------------------------------------------------------------- #
#  Pure-JAX references and demo
# --------------------------------------------------------------------------- #
def _reference_f32(x, params, H, W, eps=1e-5):
    """Unfolded eval-mode reference, full f32 (validates the BN folding)."""
    B, N, C_in = x.shape
    hidden = params["fc1_w"].shape[0]
    C_out = params["fc2_w"].shape[0]
    HW = H * W

    def bn(v, i):
        s = params[f"bn{i}_gamma"] / jnp.sqrt(params[f"bn{i}_var"] + eps)
        return (v - params[f"bn{i}_mean"]) * s + params[f"bn{i}_beta"]

    h = x @ params["fc1_w"].reshape(hidden, C_in).T + params["fc1_b"]
    h = _gelu(bn(h, 1))
    himg = h.reshape(B, H, W, hidden)
    hp = jnp.pad(himg, ((0, 0), (1, 1), (1, 1), (0, 0)))
    k33 = params["dw_w"].reshape(hidden, 3, 3)
    conv = sum(hp[:, kh:kh + H, kw:kw + W, :] * k33[:, kh, kw]
               for kh in range(3) for kw in range(3)) + params["dw_b"]
    h2 = _gelu(bn(conv, 2)).reshape(B, HW, hidden)
    y = h2 @ params["fc2_w"].reshape(C_out, hidden).T + params["fc2_b"]
    return _gelu(bn(y, 3))


def _reference_bf16(x, params, H, W, eps=1e-5):
    """Same numerics as the kernel: folded BN, bf16 matmul operands, f32 accum."""
    B, N, C_in = x.shape
    hidden = params["fc1_w"].shape[0]
    HW = H * W
    w1f, b1f, kdwf, bdwf, w2f, b2f = _fold_batchnorms(params, C_in, eps)

    h = jnp.einsum("bnc,ch->bnh", x.astype(jnp.bfloat16), w1f.astype(jnp.bfloat16),
                   preferred_element_type=jnp.float32) + b1f
    h = _gelu(h)
    himg = h.reshape(B, H, W, hidden)
    hp = jnp.pad(himg, ((0, 0), (1, 1), (1, 1), (0, 0)))
    k33 = kdwf.reshape(hidden, 3, 3)
    conv = sum(hp[:, kh:kh + H, kw:kw + W, :] * k33[:, kh, kw]
               for kh in range(3) for kw in range(3)) + bdwf
    h2 = _gelu(conv).reshape(B, HW, hidden)
    y = jnp.einsum("bnh,ho->bno", h2.astype(jnp.bfloat16), w2f.astype(jnp.bfloat16),
                   preferred_element_type=jnp.float32) + b2f
    return _gelu(y)


def _init_params(key, in_features, hidden_features, out_features):
    ks = jax.random.split(key, 9)

    def conv_init(k, shape, fan_in):
        bound = 1.0 / math.sqrt(fan_in)
        return jax.random.uniform(k, shape, jnp.float32, -bound, bound)

    p = {
        "fc1_w": conv_init(ks[0], (hidden_features, in_features, 1, 1), in_features),
        "fc1_b": conv_init(ks[1], (hidden_features,), in_features),
        "dw_w": conv_init(ks[2], (hidden_features, 1, 3, 3), 9),
        "dw_b": conv_init(ks[3], (hidden_features,), 9),
        "fc2_w": conv_init(ks[4], (out_features, hidden_features, 1, 1), hidden_features),
        "fc2_b": conv_init(ks[5], (out_features,), hidden_features),
    }
    for i, (kf, feat) in enumerate(
            zip(ks[6:9], (hidden_features, hidden_features, out_features)), start=1):
        kg, kb, km, kv = jax.random.split(kf, 4)
        p[f"bn{i}_gamma"] = jax.random.uniform(kg, (feat,), jnp.float32, 0.5, 1.5)
        p[f"bn{i}_beta"] = jax.random.uniform(kb, (feat,), jnp.float32, -0.2, 0.2)
        p[f"bn{i}_mean"] = jax.random.uniform(km, (feat,), jnp.float32, -0.5, 0.5)
        p[f"bn{i}_var"] = jax.random.uniform(kv, (feat,), jnp.float32, 0.5, 1.5)
    return p


if __name__ == "__main__":
    B, H, W = 2, 16, 16                      # 256 tokens per image
    C_in, hidden, C_out = 32, 64, 32

    key = jax.random.PRNGKey(0)
    kx, kp = jax.random.split(key)
    x = jax.random.normal(kx, (B, H * W, C_in), dtype=jnp.float32)
    params = _init_params(kp, C_in, hidden, C_out)

    y = mlp_dwbn_forward(x, params, H, W)
    y = jax.block_until_ready(y)
    assert y.shape == (B, H * W, C_out)

    # Check 1: matched-precision reference (validates the kernel mechanics,
    # incl. the roll-based depthwise conv and boundary masks).
    y_bf16 = _reference_bf16(x, params, H, W)
    assert jnp.allclose(y, y_bf16, atol=1e-2, rtol=1e-2), \
        "kernel mismatch vs matched-precision reference"

    # Check 2: full-f32 unfolded reference (validates the BN folding); loose
    # tolerance absorbs the bf16 MXU operands.
    y_f32 = _reference_f32(x, params, H, W)
    assert jnp.allclose(y, y_f32, atol=0.1, rtol=0.1), \
        "kernel mismatch vs f32 reference"

    print("KERNEL_OK")
</pallas_src>

<mosaic_0001>
module attributes {stable_mosaic.version = 11 : i64} {
  func.func @_mlp_dwbn_kernel(%arg0: i32, %arg1: i32, %arg2: memref<1x256x128xbf16, #tpu.memory_space<vmem>>, %arg3: memref<128x128xbf16, #tpu.memory_space<vmem>>, %arg4: memref<1x128xf32, #tpu.memory_space<vmem>>, %arg5: memref<9x128xf32, #tpu.memory_space<vmem>>, %arg6: memref<1x128xf32, #tpu.memory_space<vmem>>, %arg7: memref<128x128xbf16, #tpu.memory_space<vmem>>, %arg8: memref<1x128xf32, #tpu.memory_space<vmem>>, %arg9: memref<1x256x128xf32, #tpu.memory_space<vmem>>) attributes {dimension_semantics = [#tpu.dimension_semantics<parallel>, #tpu.dimension_semantics<arbitrary>], iteration_bounds = array<i64: 2, 1>, scalar_prefetch = 0 : i64, scratch_operands = 0 : i64, tpu.core_type = #tpu.core_type<tc>, window_params = [{transform_indices = @transform_0, window_bounds = array<i64: 1, 256, 128>}, {transform_indices = @transform_1, window_bounds = array<i64: 128, 128>}, {transform_indices = @transform_2, window_bounds = array<i64: 1, 128>}, {transform_indices = @transform_3, window_bounds = array<i64: 9, 128>}, {transform_indices = @transform_4, window_bounds = array<i64: 1, 128>}, {transform_indices = @transform_5, window_bounds = array<i64: 128, 128>}, {pipeline_mode = #tpu.pipeline_mode<synchronous>, transform_indices = @transform_6, window_bounds = array<i64: 1, 128>}, {transform_indices = @transform_7, window_bounds = array<i64: 1, 256, 128>}]} {
    %c0 = arith.constant 0 : index
    %c0_0 = arith.constant 0 : index
    %c0_1 = arith.constant 0 : index
    %0 = vector.load %arg2[%c0, %c0_0, %c0_1] : memref<1x256x128xbf16, #tpu.memory_space<vmem>>, vector<1x256x128xbf16>
    %1 = vector.shape_cast %0 : vector<1x256x128xbf16> to vector<256x128xbf16>
    %c0_2 = arith.constant 0 : index
    %c0_3 = arith.constant 0 : index
    %2 = vector.load %arg3[%c0_2, %c0_3] : memref<128x128xbf16, #tpu.memory_space<vmem>>, vector<128x128xbf16>
    %cst = arith.constant dense<0.000000e+00> : vector<256x128xf32>
    %3 = tpu.matmul %1, %2, %cst {dimension_numbers = #tpu.dot_dimension_numbers<[1], [0], [0], [1], [0, 0, 1, 1], [], []>} : vector<256x128xbf16>, vector<128x128xbf16>, vector<256x128xf32> -> vector<256x128xf32>
    %c0_4 = arith.constant 0 : index
    %c0_5 = arith.constant 0 : index
    %4 = vector.load %arg4[%c0_4, %c0_5] : memref<1x128xf32, #tpu.memory_space<vmem>>, vector<1x128xf32>
    %5 = vector.broadcast %4 : vector<1x128xf32> to vector<256x128xf32>
    %6 = arith.addf %3, %5 : vector<256x128xf32>
    %cst_6 = arith.constant 5.000000e-01 : f32
    %7 = vector.broadcast %cst_6 : f32 to vector<256x128xf32>
    %8 = arith.mulf %7, %6 : vector<256x128xf32>
    %cst_7 = arith.constant 0.707106769 : f32
    %9 = vector.broadcast %cst_7 : f32 to vector<256x128xf32>
    %10 = arith.mulf %6, %9 : vector<256x128xf32>
    %11 = math.erf %10 : vector<256x128xf32>
    %cst_8 = arith.constant 1.000000e+00 : f32
    %12 = vector.broadcast %cst_8 : f32 to vector<256x128xf32>
    %13 = arith.addf %12, %11 : vector<256x128xf32>
    %14 = arith.mulf %8, %13 : vector<256x128xf32>
    %15 = tpu.iota {dimensions = array<i32: 0>} : vector<256x128xi32>
    %c15_i32 = arith.constant 15 : i32
    %16 = vector.broadcast %c15_i32 : i32 to vector<256x128xi32>
    %17 = arith.andi %15, %16 : vector<256x128xi32>
    %c0_9 = arith.constant 0 : index
    %c0_10 = arith.constant 0 : index
    %18 = vector.load %arg5[%c0_9, %c0_10] : memref<9x128xf32, #tpu.memory_space<vmem>>, vector<9x128xf32>
    %c16_i32 = arith.constant 16 : i32
    %19 = vector.broadcast %c16_i32 : i32 to vector<256x128xi32>
    %20 = arith.cmpi sge, %15, %19 : vector<256x128xi32>
    %c16_i32_11 = arith.constant 16 : i32
    %21 = tpu.dynamic_rotate %14 by %c16_i32_11 dim 0 : vector<256x128xf32>, i32 -> vector<256x128xf32>
    %cst_12 = arith.constant 0.000000e+00 : f32
    %22 = vector.broadcast %cst_12 : f32 to vector<256x128xf32>
    %23 = arith.select %20, %21, %22 : vector<256x128xi1>, vector<256x128xf32>
    %c240_i32 = arith.constant 240 : i32
    %24 = vector.broadcast %c240_i32 : i32 to vector<256x128xi32>
    %25 = arith.cmpi slt, %15, %24 : vector<256x128xi32>
    %c240_i32_13 = arith.constant 240 : i32
    %26 = tpu.dynamic_rotate %14 by %c240_i32_13 dim 0 : vector<256x128xf32>, i32 -> vector<256x128xf32>
    %cst_14 = arith.constant 0.000000e+00 : f32
    %27 = vector.broadcast %cst_14 : f32 to vector<256x128xf32>
    %28 = arith.select %25, %26, %27 : vector<256x128xi1>, vector<256x128xf32>
    %29 = vector.extract_strided_slice %18 {offsets = [1, 0], sizes = [1, 128], strides = [1, 1]} : vector<9x128xf32> to vector<1x128xf32>
    %30 = vector.broadcast %29 : vector<1x128xf32> to vector<256x128xf32>
    %31 = arith.mulf %23, %30 : vector<256x128xf32>
    %32 = vector.extract_strided_slice %18 {offsets = [4, 0], sizes = [1, 128], strides = [1, 1]} : vector<9x128xf32> to vector<1x128xf32>
    %33 = vector.broadcast %32 : vector<1x128xf32> to vector<256x128xf32>
    %34 = arith.mulf %14, %33 : vector<256x128xf32>
    %35 = arith.addf %31, %34 : vector<256x128xf32>
    %36 = vector.extract_strided_slice %18 {offsets = [7, 0], sizes = [1, 128], strides = [1, 1]} : vector<9x128xf32> to vector<1x128xf32>
    %37 = vector.broadcast %36 : vector<1x128xf32> to vector<256x128xf32>
    %38 = arith.mulf %28, %37 : vector<256x128xf32>
    %39 = arith.addf %35, %38 : vector<256x128xf32>
    %c1_i32 = arith.constant 1 : i32
    %40 = tpu.dynamic_rotate %23 by %c1_i32 dim 0 : vector<256x128xf32>, i32 -> vector<256x128xf32>
    %41 = vector.extract_strided_slice %18 {offsets = [0, 0], sizes = [1, 128], strides = [1, 1]} : vector<9x128xf32> to vector<1x128xf32>
    %42 = vector.broadcast %41 : vector<1x128xf32> to vector<256x128xf32>
    %43 = arith.mulf %40, %42 : vector<256x128xf32>
    %c1_i32_15 = arith.constant 1 : i32
    %44 = tpu.dynamic_rotate %14 by %c1_i32_15 dim 0 : vector<256x128xf32>, i32 -> vector<256x128xf32>
    %45 = vector.extract_strided_slice %18 {offsets = [3, 0], sizes = [1, 128], strides = [1, 1]} : vector<9x128xf32> to vector<1x128xf32>
    %46 = vector.broadcast %45 : vector<1x128xf32> to vector<256x128xf32>
    %47 = arith.mulf %44, %46 : vector<256x128xf32>
    %48 = arith.addf %43, %47 : vector<256x128xf32>
    %c1_i32_16 = arith.constant 1 : i32
    %49 = tpu.dynamic_rotate %28 by %c1_i32_16 dim 0 : vector<256x128xf32>, i32 -> vector<256x128xf32>
    %50 = vector.extract_strided_slice %18 {offsets = [6, 0], sizes = [1, 128], strides = [1, 1]} : vector<9x128xf32> to vector<1x128xf32>
    %51 = vector.broadcast %50 : vector<1x128xf32> to vector<256x128xf32>
    %52 = arith.mulf %49, %51 : vector<256x128xf32>
    %53 = arith.addf %48, %52 : vector<256x128xf32>
    %c0_i32 = arith.constant 0 : i32
    %54 = vector.broadcast %c0_i32 : i32 to vector<256x128xi32>
    %55 = arith.cmpi sgt, %17, %54 : vector<256x128xi32>
    %cst_17 = arith.constant 0.000000e+00 : f32
    %56 = vector.broadcast %cst_17 : f32 to vector<256x128xf32>
    %57 = arith.select %55, %53, %56 : vector<256x128xi1>, vector<256x128xf32>
    %58 = arith.addf %39, %57 : vector<256x128xf32>
    %c255_i32 = arith.constant 255 : i32
    %59 = tpu.dynamic_rotate %23 by %c255_i32 dim 0 : vector<256x128xf32>, i32 -> vector<256x128xf32>
    %60 = vector.extract_strided_slice %18 {offsets = [2, 0], sizes = [1, 128], strides = [1, 1]} : vector<9x128xf32> to vector<1x128xf32>
    %61 = vector.broadcast %60 : vector<1x128xf32> to vector<256x128xf32>
    %62 = arith.mulf %59, %61 : vector<256x128xf32>
    %c255_i32_18 = arith.constant 255 : i32
    %63 = tpu.dynamic_rotate %14 by %c255_i32_18 dim 0 : vector<256x128xf32>, i32 -> vector<256x128xf32>
    %64 = vector.extract_strided_slice %18 {offsets = [5, 0], sizes = [1, 128], strides = [1, 1]} : vector<9x128xf32> to vector<1x128xf32>
    %65 = vector.broadcast %64 : vector<1x128xf32> to vector<256x128xf32>
    %66 = arith.mulf %63, %65 : vector<256x128xf32>
    %67 = arith.addf %62, %66 : vector<256x128xf32>
    %c255_i32_19 = arith.constant 255 : i32
    %68 = tpu.dynamic_rotate %28 by %c255_i32_19 dim 0 : vector<256x128xf32>, i32 -> vector<256x128xf32>
    %69 = vector.extract_strided_slice %18 {offsets = [8, 0], sizes = [1, 128], strides = [1, 1]} : vector<9x128xf32> to vector<1x128xf32>
    %70 = vector.broadcast %69 : vector<1x128xf32> to vector<256x128xf32>
    %71 = arith.mulf %68, %70 : vector<256x128xf32>
    %72 = arith.addf %67, %71 : vector<256x128xf32>
    %c15_i32_20 = arith.constant 15 : i32
    %73 = vector.broadcast %c15_i32_20 : i32 to vector<256x128xi32>
    %74 = arith.cmpi slt, %17, %73 : vector<256x128xi32>
    %cst_21 = arith.constant 0.000000e+00 : f32
    %75 = vector.broadcast %cst_21 : f32 to vector<256x128xf32>
    %76 = arith.select %74, %72, %75 : vector<256x128xi1>, vector<256x128xf32>
    %77 = arith.addf %58, %76 : vector<256x128xf32>
    %c0_22 = arith.constant 0 : index
    %c0_23 = arith.constant 0 : index
    %78 = vector.load %arg6[%c0_22, %c0_23] : memref<1x128xf32, #tpu.memory_space<vmem>>, vector<1x128xf32>
    %79 = vector.broadcast %78 : vector<1x128xf32> to vector<256x128xf32>
    %80 = arith.addf %77, %79 : vector<256x128xf32>
    %cst_24 = arith.constant 5.000000e-01 : f32
    %81 = vector.broadcast %cst_24 : f32 to vector<256x128xf32>
    %82 = arith.mulf %81, %80 : vector<256x128xf32>
    %cst_25 = arith.constant 0.707106769 : f32
    %83 = vector.broadcast %cst_25 : f32 to vector<256x128xf32>
    %84 = arith.mulf %80, %83 : vector<256x128xf32>
    %85 = math.erf %84 : vector<256x128xf32>
    %cst_26 = arith.constant 1.000000e+00 : f32
    %86 = vector.broadcast %cst_26 : f32 to vector<256x128xf32>
    %87 = arith.addf %86, %85 : vector<256x128xf32>
    %88 = arith.mulf %82, %87 : vector<256x128xf32>
    %89 = arith.truncf %88 : vector<256x128xf32> to vector<256x128xbf16>
    %c0_27 = arith.constant 0 : index
    %c0_28 = arith.constant 0 : index
    %90 = vector.load %arg7[%c0_27, %c0_28] : memref<128x128xbf16, #tpu.memory_space<vmem>>, vector<128x128xbf16>
    %cst_29 = arith.constant dense<0.000000e+00> : vector<256x128xf32>
    %91 = tpu.matmul %89, %90, %cst_29 {dimension_numbers = #tpu.dot_dimension_numbers<[1], [0], [0], [1], [0, 0, 1, 1], [], []>} : vector<256x128xbf16>, vector<128x128xbf16>, vector<256x128xf32> -> vector<256x128xf32>
    %c0_i32_30 = arith.constant 0 : i32
    %92 = arith.cmpi eq, %arg1, %c0_i32_30 : i32
    %93 = arith.extui %92 : i1 to i32
    %c0_i32_31 = arith.constant 0 : i32
    %94 = arith.cmpi ne, %93, %c0_i32_31 : i32
    scf.if %94 {
      %c0_36 = arith.constant 0 : index
      %c0_37 = arith.constant 0 : index
      %c0_38 = arith.constant 0 : index
      %101 = vector.load %arg9[%c0_36, %c0_37, %c0_38] : memref<1x256x128xf32, #tpu.memory_space<vmem>>, vector<1x256x128xf32>
      %102 = vector.shape_cast %101 : vector<1x256x128xf32> to vector<256x128xf32>
      %103 = vector.shape_cast %91 : vector<256x128xf32> to vector<1x256x128xf32>
      tpu.vector_store %arg9[%c0_36, %c0_37, %c0_38], %103 {strides = array<i32>} : memref<1x256x128xf32, #tpu.memory_space<vmem>>, vector<1x256x128xf32>,
    } else {
    }
    %c0_i32_32 = arith.constant 0 : i32
    %95 = arith.cmpi sgt, %arg1, %c0_i32_32 : i32
    %96 = arith.extui %95 : i1 to i32
    %c0_i32_33 = arith.constant 0 : i32
    %97 = arith.cmpi ne, %96, %c0_i32_33 : i32
    scf.if %97 {
      %c0_36 = arith.constant 0 : index
      %c0_37 = arith.constant 0 : index
      %c0_38 = arith.constant 0 : index
      %101 = vector.load %arg9[%c0_36, %c0_37, %c0_38] : memref<1x256x128xf32, #tpu.memory_space<vmem>>, vector<1x256x128xf32>
      %102 = vector.shape_cast %101 : vector<1x256x128xf32> to vector<256x128xf32>
      %103 = arith.addf %102, %91 : vector<256x128xf32>
      %c0_39 = arith.constant 0 : index
      %c0_40 = arith.constant 0 : index
      %c0_41 = arith.constant 0 : index
      %104 = vector.load %arg9[%c0_39, %c0_40, %c0_41] : memref<1x256x128xf32, #tpu.memory_space<vmem>>, vector<1x256x128xf32>
      %105 = vector.shape_cast %104 : vector<1x256x128xf32> to vector<256x128xf32>
      %106 = vector.shape_cast %103 : vector<256x128xf32> to vector<1x256x128xf32>
      tpu.vector_store %arg9[%c0_39, %c0_40, %c0_41], %106 {strides = array<i32>} : memref<1x256x128xf32, #tpu.memory_space<vmem>>, vector<1x256x128xf32>,
    } else {
    }
    %c0_i32_34 = arith.constant 0 : i32
    %98 = arith.cmpi eq, %arg1, %c0_i32_34 : i32
    %99 = arith.extui %98 : i1 to i32
    %c0_i32_35 = arith.constant 0 : i32
    %100 = arith.cmpi ne, %99, %c0_i32_35 : i32
    scf.if %100 {
      %c0_36 = arith.constant 0 : index
      %c0_37 = arith.constant 0 : index
      %c0_38 = arith.constant 0 : index
      %101 = vector.load %arg9[%c0_36, %c0_37, %c0_38] : memref<1x256x128xf32, #tpu.memory_space<vmem>>, vector<1x256x128xf32>
      %102 = vector.shape_cast %101 : vector<1x256x128xf32> to vector<256x128xf32>
      %c0_39 = arith.constant 0 : index
      %c0_40 = arith.constant 0 : index
      %103 = vector.load %arg8[%c0_39, %c0_40] : memref<1x128xf32, #tpu.memory_space<vmem>>, vector<1x128xf32>
      %104 = vector.broadcast %103 : vector<1x128xf32> to vector<256x128xf32>
      %105 = arith.addf %102, %104 : vector<256x128xf32>
      %cst_41 = arith.constant 5.000000e-01 : f32
      %106 = vector.broadcast %cst_41 : f32 to vector<256x128xf32>
      %107 = arith.mulf %106, %105 : vector<256x128xf32>
      %cst_42 = arith.constant 0.707106769 : f32
      %108 = vector.broadcast %cst_42 : f32 to vector<256x128xf32>
      %109 = arith.mulf %105, %108 : vector<256x128xf32>
      %110 = math.erf %109 : vector<256x128xf32>
      %cst_43 = arith.constant 1.000000e+00 : f32
      %111 = vector.broadcast %cst_43 : f32 to vector<256x128xf32>
      %112 = arith.addf %111, %110 : vector<256x128xf32>
      %113 = arith.mulf %107, %112 : vector<256x128xf32>
      %c0_44 = arith.constant 0 : index
      %c0_45 = arith.constant 0 : index
      %c0_46 = arith.constant 0 : index
      %114 = vector.load %arg9[%c0_44, %c0_45, %c0_46] : memref<1x256x128xf32, #tpu.memory_space<vmem>>, vector<1x256x128xf32>
      %115 = vector.shape_cast %114 : vector<1x256x128xf32> to vector<256x128xf32>
      %116 = vector.shape_cast %113 : vector<256x128xf32> to vector<1x256x128xf32>
      tpu.vector_store %arg9[%c0_44, %c0_45, %c0_46], %116 {strides = array<i32>} : memref<1x256x128xf32, #tpu.memory_space<vmem>>, vector<1x256x128xf32>,
    } else {
    }
    return
  }
  func.func @transform_0(%arg0: i32, %arg1: i32) -> (i32, i32, i32) {
    %c0_i32 = arith.constant 0 : i32
    %c0_i32_0 = arith.constant 0 : i32
    %c0_i32_1 = arith.constant 0 : i32
    return %arg0, %c0_i32, %c0_i32_0 : i32, i32, i32
  }
  func.func @transform_1(%arg0: i32, %arg1: i32) -> (i32, i32) {
    %c0_i32 = arith.constant 0 : i32
    %c0_i32_0 = arith.constant 0 : i32
    return %c0_i32, %arg1 : i32, i32
  }
  func.func @transform_2(%arg0: i32, %arg1: i32) -> (i32, i32) {
    %c0_i32 = arith.constant 0 : i32
    %c0_i32_0 = arith.constant 0 : i32
    return %c0_i32, %arg1 : i32, i32
  }
  func.func @transform_3(%arg0: i32, %arg1: i32) -> (i32, i32) {
    %c0_i32 = arith.constant 0 : i32
    %c0_i32_0 = arith.constant 0 : i32
    return %c0_i32, %arg1 : i32, i32
  }
  func.func @transform_4(%arg0: i32, %arg1: i32) -> (i32, i32) {
    %c0_i32 = arith.constant 0 : i32
    %c0_i32_0 = arith.constant 0 : i32
    return %c0_i32, %arg1 : i32, i32
  }
  func.func @transform_5(%arg0: i32, %arg1: i32) -> (i32, i32) {
    %c0_i32 = arith.constant 0 : i32
    %c0_i32_0 = arith.constant 0 : i32
    return %arg1, %c0_i32 : i32, i32
  }
  func.func @transform_6(%arg0: i32, %arg1: i32) -> (i32, i32) {
    %c0_i32 = arith.constant 0 : i32
    %c0_i32_0 = arith.constant 0 : i32
    %c0_i32_1 = arith.constant 0 : i32
    return %c0_i32, %c0_i32_0 : i32, i32
  }
  func.func @transform_7(%arg0: i32, %arg1: i32) -> (i32, i32, i32) {
    %c0_i32 = arith.constant 0 : i32
    %c0_i32_0 = arith.constant 0 : i32
    %c0_i32_1 = arith.constant 0 : i32
    return %arg0, %c0_i32, %c0_i32_0 : i32, i32, i32
  }
}

</mosaic_0001>

<bundles_post_ra>
// kernel: tpu_custom_call.1
= control target key start
LH: loop header
LB: loop body
LE: loop exit
PB: predicated region body
PF: predicated region fallthrough
CT: control target
= control target key end

     0   :  { %s6259_s0 = inlined_call_operand.hbm [shape: bf16[2,256,128], index: 0, kind: input, shape index: {}]   ;;  %s6260_s1 = inlined_call_operand.hbm [shape: bf16[128,128], index: 1, kind: input, shape index: {}]   ;;  %s6261_s2 = inlined_call_operand.vmem [shape: f32[1,128], index: 2, kind: input, shape index: {}]   ;;  %s6262_s3 = inlined_call_operand.hbm [shape: f32[9,128], index: 3, kind: input, shape index: {}]   ;;  %s6263_s4 = inlined_call_operand.vmem [shape: f32[1,128], index: 4, kind: input, shape index: {}]   ;;  %s6264_s5 = inlined_call_operand.hbm [shape: bf16[128,128], index: 5, kind: input, shape index: {}]   ;;  %s6265_s6 = inlined_call_operand.vmem [shape: f32[1,128], index: 6, kind: input, shape index: {}]   ;;  %s6266_s7 = inlined_call_operand.hbm [shape: f32[2,256,128], index: 7, kind: output, shape index: {}]  }
   0x1   :  { %6322 = sst [smem:[#allocation126_spill]] %s6260_s1 }
   0x2   :  { %6323 = sst [smem:[#allocation127_spill]] %s6262_s3 }
   0x3   :  { %6324 = sst [smem:[#allocation128_spill]] %s6264_s5 }
   0x4   :  { %12 = vsyncpa [#allocation3], 0 }
   0x5   :  { %14 = vsyncpa [#allocation3 + $0x1], 0 }
   0x6   :  { %15 = vsyncpa [#allocation6], 0 }
   0x7   :  { %16 = vsyncpa [#allocation9], 0 }
   0x8   :  { %17 = vsyncpa [#allocation4], 0 }
   0x9   :  { %19 = vsyncpa [#allocation4 + $0x1], 0  ;;  %s3989_s24 = smov 0   ;;  %s3991_s25 = smov 0  }
   0xa   :  { %s3993_s26 = smov 0   ;;  %s3995_s27 = smov 0  }
   0xb   :  { %s3997_s28 = smov 0   ;;  %s3999_s29 = smov 0  }
   0xc LB: > { %s3210_s30 = sadd.s32 4294967295, %s3935_s29   ;;  %s3211_s8 = sadd.s32 4294967294, %s3935_s29   ;;  %s3935_s29 = sphi %s3999_s29, %s25_s29   ;;  %s3931_s28 = sphi %s3997_s28, %s6749_s28   ;;  %s3927_s27 = sphi %s3995_s27, %s6748_s27   ;;  %s3923_s26 = sphi %s3993_s26, %s6747_s26   ;;  %s3919_s25 = sphi %s3991_s25, %s6746_s25   ;;  %s3915_s24 = sphi %s3989_s24, %s6745_s24  }
   0xd   : > { %p57_p0 = scmp.ne.s32.totalorder %s3919_s25, %s3915_s24  ;;  %p4023_p1 = scmp.eq.s32.totalorder %s3210_s30, 0 }
   0xe   : > { %p4027_p2 = scmp.eq.s32.totalorder %s3210_s30, 1  ;;  %p238_p3 = scmp.eq.s32.totalorder %s3211_s8, 1 }
   0xf   : > { %p4033_p4 = por %p4023_p1, %p57_p0  ;;  %p3212_p5 = scmp.ge.s32.totalorder %s3935_s29, 1 }
  0x10   : > { %p4038_p6 = por %p238_p3, %p57_p0  ;;  %p245_p7 = scmp.lt.s32.totalorder %s3935_s29, 3 }
  0x11   : > { %s3937_s14 = smov [#allocation5]   ;;  %s3938_s17 = smov [#allocation7]  }
  0x12   : > { %s6328_s12 = scalar_select %p4038_p6, 1, 0 }
  0x13   : > { %p4043_p8 = pnand %p3212_p5, %p245_p7  ;;  %s259_s15 = sshll.u32 %s3937_s14, 4  ;;  %s260_s15 = int_to_ptr.vmem [resolvable:$true] %s259_s15 }
  0x14   : > { %s280_s18 = sshll.u32 %s3938_s17, 4  ;;  %s3752_s19 = scalar_lea.vmem %s260_s15, 1024  ;;  %s281_s18 = int_to_ptr.vmem [resolvable:$true] %s280_s18 }
  0x15   : > { %p3431_p9 = pneg %p4043_p8  ;;  %p3753_p13 = scmp.ne.s32.totalorder %s260_s15, %s3752_s19 }
  0x16   : > { %p3760_p5 = scmp.lt.s32.totalorder %s260_s15, %s260_s15  ;;  %p3761_p7 = scmp.lt.s32.totalorder %s3752_s19, %s3752_s19 }
  0x17   : > { %p4052_p11 = pnand %p3431_p9, %p4023_p1 }
  0x18   : > { %p3762_p10 = por %p3761_p7, %p3760_p5 }
  0x19   : > { %p3743_p12 = pneg %p4052_p11 }
  0x1b   : > { %p3755_p0 = pnand %p3753_p13, %p3743_p12 }
  0x1d   : > { %p3756_p3 = pneg %p3755_p0 }
  0x1f   : > { %p3763_p9 = pnand %p3762_p10, %p3756_p3 }
  0x21   : > { %3766 = shalt.err (!%p3763_p9)
}
  0x22   : > { %s6267_s20 = smov 64   ;;  %s6268_s21 = smov 4  }
  0x23   : > { %s6331_s1 = sld [smem:[#allocation126_spill]]  ;;  %s3778_s30 = scalar_lea.vmem %s281_s18, 256 }
  0x24   : > { %p3779_p13 = scmp.ne.s32.totalorder %s281_s18, %s3778_s30  ;;  %p3786_p10 = scmp.lt.s32.totalorder %s281_s18, %s281_s18 }
  0x25   : > { %p3787_p3 = scmp.lt.s32.totalorder %s3778_s30, %s3778_s30 }
  0x26   : > { %p3781_p0 = pnand %p3779_p13, %p3743_p12 }
  0x27   : > { %p3788_p7 = por %p3787_p3, %p3786_p10 }
  0x28   : > { %p3782_p5 = pneg %p3781_p0 }
  0x29   : > { %3434 = dma.hbm_to_vmem [thread:$0]  (!%p4052_p11), %s6331_s1, 1024, %s260_s15, [#allocation6], %s6267_s20, %s6267_s20, %s6268_s21  }
  0x2a   : > { %p3789_p9 = pnand %p3788_p7, %p3782_p5 }
  0x2c   : > { %3792 = shalt.err (!%p3789_p9)
}
  0x2d   : > { %s3941_s8 = smov 128   ;;  %s3942_s14 = smov 8  }
  0x2e   : > { %s6332_s3 = sld [smem:[#allocation127_spill]]  ;;  %s3943_s15 = smov [#allocation8]  }
  0x2f   : > { %s302_s22 = sshll.u32 %s3943_s15, 4  ;;  %s303_s22 = int_to_ptr.vmem [resolvable:$true] %s302_s22 }
  0x30   : > { %s3804_s23 = scalar_lea.vmem %s303_s22, 1024  ;;  %p3812_p5 = scmp.lt.s32.totalorder %s303_s22, %s303_s22 }
  0x31   : > { %p3805_p13 = scmp.ne.s32.totalorder %s303_s22, %s3804_s23  ;;  %p3813_p3 = scmp.lt.s32.totalorder %s3804_s23, %s3804_s23 }
  0x33   : > { %p3807_p0 = pnand %p3805_p13, %p3743_p12  ;;  %p3814_p7 = por %p3813_p3, %p3812_p5 }
  0x34   : > { %3437 = dma.hbm_to_vmem [thread:$0]  (!%p4052_p11), %s6332_s3, 256, %s281_s18, [#allocation6], %s3941_s8, %s3941_s8, %s3942_s14  }
  0x35   : > { %p3808_p10 = pneg %p3807_p0 }
  0x37   : > { %p3815_p9 = pnand %p3814_p7, %p3808_p10 }
  0x39   : > { %3818 = shalt.err (!%p3815_p9)
}
  0x3a   : > { %s6333_s5 = sld [smem:[#allocation128_spill]]  ;;  %s37_s8 = sadd.s32 1, %s3931_s28 }
  0x3b   : > { %p39_p12 = scmp.ge.s32.totalorder %s37_s8, 2  ;;  %s44_s16 = sadd.s32 1, %s3923_s26 }
  0x3c   : > { %p51_p13 = scmp.ne.s32.totalorder %s3923_s26, %s3919_s25  ;;  %p52_p0 = scmp.eq.s32.totalorder %s3935_s29, 0 }
  0x3d   : > { %s6751_s8 = smov (%p39_p12, %s37_s8), 0  ;;  %s319_s15 = sand.u32 1, %s3923_s26  }
  0x3e   : > { %6334 = sst [smem:[#allocation15_spill]] %s6751_s8  ;;  %p4095_p10 = por %p52_p0, %p51_p13 }
  0x3f   : > { %p4101_p5 = por %p4027_p2, %p51_p13  ;;  %s41_s19 = ssub.s32 %s3931_s28, %s6751_s8 }
  0x40   : > { %3440 = dma.hbm_to_vmem [thread:$0]  (!%p4052_p11), %s6333_s5, 1024, %s303_s22, [#allocation9], %s6267_s20, %s6267_s20, %s6268_s21  }
  0x41   : > { %s6336_s17 = scalar_select %p4101_p5, 1, 0 }
  0x42   : > { %p3452_p11 = scmp.lt.s32.totalorder %s3935_s29, 2  ;;  %p42_p3 = scmp.eq.s32.totalorder %s41_s19, 0 }
  0x43   : > { %s3219_s22 = sshll.u32 %s319_s15, 7  ;;  %s3269_s18 = sshll.u32 %s3931_s28, 11 }
  0x44   : > { %s4110_s23 = scalar_select %p42_p3, %s3923_s26, %s44_s16  }
  0x45   : > { %s329_s21 = scalar_lea.hbm %s6259_s0, %s3269_s18  ;;  %s323_s1 = scalar_lea.vmem [#allocation2], %s3219_s22 }
  0x46   : > { %s330_s3 = sshll.u32 %s323_s1, 4  ;;  %p4118_p2 = pnand %p3452_p11, %p4095_p10  ;;  %s331_s3 = int_to_ptr.vmem [resolvable:$true] %s330_s3 }
  0x47   : > { %s320_s5 = scalar_lea.sflag [#allocation3], %s319_s15  ;;  %s3832_s19 = scalar_lea.vmem %s331_s3, 2048 }
  0x48   : > { %p3821_p7 = pneg %p4118_p2  ;;  %p3833_p9 = scmp.ne.s32.totalorder %s331_s3, %s3832_s19 }
  0x49   : > { %s3944_s16 = smov [#allocation2]  }
  0x4a   : > { %p3835_p12 = pnand %p3833_p9, %p3821_p7  ;;  %s3837_s8 = sshll.u32 %s3944_s16, 4  ;;  %s3838_s8 = int_to_ptr.vmem [resolvable:$false] %s3837_s8 }
  0x4b   : > { %s3839_s20 = scalar_lea.vmem %s3838_s8, 4096  ;;  %p3840_p0 = scmp.lt.s32.totalorder %s331_s3, %s3838_s8 }
  0x4c   : > { %p3836_p13 = pneg %p3835_p12  ;;  %p3841_p3 = scmp.lt.s32.totalorder %s3839_s20, %s3832_s19 }
  0x4e   : > { %p3842_p6 = por %p3841_p3, %p3840_p0 }
  0x50   : > { %p3843_p5 = pnand %p3842_p6, %p3836_p13 }
  0x52   : > { %3846 = shalt.err (!%p3843_p5)
}
  0x53   : > { %s6338_s1 = smov 4   ;;  %s6339_s14 = smov 64  }
  0x54   : > { %3444 = dma.hbm_to_vmem [thread:$0]  (!%p4118_p2), %s329_s21, 2048, %s331_s3, %s320_s5, %s6339_s14, %s6339_s14, %s6338_s1  }
  0x55   : > { %342 = sbr.rel (%p4043_p8) target bundleno = 910 (0x38e), region = 48 }
  0x5a   : > { %s4132_s15 = sand.u32 1, %s3919_s25  }
  0x5b   : > { %s3223_s8 = sshll.u32 %s4132_s15, 7  ;;  %s345_s22 = scalar_lea.sflag [#allocation3], %s4132_s15 }
  0x5c   : > { %s4136_s18 = scalar_lea.vmem [#allocation2], %s3223_s8 }
  0x5d   : > { %3898 = dma.done.wait (%p4033_p4), %s345_s22, 2048  }
  0x5e   : > { %3900 = vsyncadd (%p4033_p4), %s345_s22, 4294965248 }
  0x5f   : > { %3902 = dma.done.wait (%p4023_p1), [#allocation6], 1280  }
  0x60   : > { %3904 = vsyncadd (%p4023_p1), [#allocation6], 4294966016 }
  0x61   : > { %3906 = dma.done.wait (%p4023_p1), [#allocation9], 1024  }
  0x62   : > { %3908 = vsyncadd (%p4023_p1), [#allocation9], 4294966272  ;;  %v3515_v0 = vld [vmem:[#allocation5 + $0x38] sm:$0xff]   ;;  %v3516_v1 = vld [vmem:[#allocation5 + $0x30] sm:$0xff]   ;;  %v925_v27 = vlaneseq  ;;  %v3945_v53 = vmov 0.0   ;;  %s3227_s19 = sshll.u32 %s4132_s15, 8 }
  0x63   : > { %3319 = vmatprep.subr.bf16.mxu0 %v3515_v0  ;;  %v3517_v2 = vld [vmem:[#allocation5 + $0x28] sm:$0xff]   ;;  %v3518_v3 = vld [vmem:[#allocation5 + $0x20] sm:$0xff]   ;;  %v3519_v5 = vld [vmem:[#allocation5 + $0x18] sm:$0xff]   ;;  %v4198_v54 = vrot.slane %v3945_v53, 7  ;;  %s6144_s16 = scalar_lea.vmem [#allocation10], %s3227_s19  ;;  %s3270_s20 = sshll.u32 %s3927_s27, 12 }
  0x64   : > { %3320 = vmatpush3.bf16.msra.mxu0 %v3515_v0  ;;  %v3523_v4 = vld [vmem:[%s4136_s18] sm:$0xff]   ;;  %v3520_v6 = vld [vmem:[#allocation5 + $0x10] sm:$0xff]   ;;  %v3521_v7 = vld [vmem:[#allocation5 + $0x8] sm:$0xff]   ;;  %v4171_v30 = vshrl.u32 %v925_v27, 7  ;;  %s3070_s1 = sshll.u32 %s6144_s16, 4  ;;  %s6207_s22 = scalar_lea.hbm %s6266_s7, %s3270_s20  ;;  %s6209_s1 = int_to_ptr.vmem [resolvable:$true] %s3070_s1 }
  0x65   : > { %3321 = vmatprep.subr.bf16.mxu0 %v3516_v1  ;;  %3335 = vmatprep.mubr.bf16.mxu0 %v3523_v4  ;;  %v3522_v8 = vld [vmem:[#allocation5] sm:$0xff]   ;;  %v3524_v9 = vld [vmem:[%s4136_s18 + $0x8] sm:$0xff]   ;;  %v3525_v10 = vld [vmem:[%s4136_s18 + $0x10] sm:$0xff]   ;;  %6340 = vst [vmem:[#allocation16_spill] sm:$0xff] %v4198_v54  ;;  %s3057_s27 = scalar_lea.sflag [#allocation4], %s4132_s15  ;;  %p6741_p4 = scmp.ne.s32.totalorder %s6336_s17, 0 }
  0x66   : > { %v3526_v11 = vld [vmem:[%s4136_s18 + $0x18] sm:$0xff]   ;;  %v3527_v12 = vld [vmem:[%s4136_s18 + $0x20] sm:$0xff]   ;;  %v3528_v13 = vld [vmem:[%s4136_s18 + $0x28] sm:$0xff]   ;;  %v1122_v34 = vsub.s32 1, %v4171_v30  ;;  %v1158_v39 = vsub.s32 4, %v4171_v30  ;;  %v1359_v40 = vsub.s32 0, %v4171_v30 }
  0x67   : > { %v3529_v14 = vld [vmem:[%s4136_s18 + $0x30] sm:$0xff]   ;;  %v3530_v15 = vld [vmem:[%s4136_s18 + $0x38] sm:$0xff]   ;;  %v3531_v16 = vld [vmem:[%s4136_s18 + $0x40] sm:$0xff]   ;;  %v1226_v42 = vsub.s32 7, %v4171_v30  ;;  %v1459_v46 = vsub.s32 3, %v4171_v30  ;;  %v1591_v49 = vsub.s32 6, %v4171_v30 }
  0x68   : > { %3322 = vmatpush3.bf16.msra.mxu0 %v3516_v1  ;;  %v3532_v17 = vld [vmem:[%s4136_s18 + $0x48] sm:$0xff]   ;;  %v3533_v18 = vld [vmem:[%s4136_s18 + $0x50] sm:$0xff]   ;;  %v3534_v19 = vld [vmem:[%s4136_s18 + $0x58] sm:$0xff]   ;;  %v1820_v59 = vsub.s32 2, %v4171_v30  ;;  %v4211_v1 = vrot.slane %v3945_v53, 1  ;;  %vm1324_vm0 = vcmp.lt.s32.totalorder %v4171_v30, 1 }
  0x69   : > { %3323 = vmatprep.subr.bf16.mxu0 %v3517_v2  ;;  %v3535_v20 = vld [vmem:[%s4136_s18 + $0x60] sm:$0xff]   ;;  %v3536_v21 = vld [vmem:[%s4136_s18 + $0x68] sm:$0xff]   ;;  %v3537_v22 = vld [vmem:[%s4136_s18 + $0x70] sm:$0xff]   ;;  %vm1785_vm1 = vcmp.lt.s32.totalorder %v4171_v30, 7  ;;  %s3946_s3 = smov [#allocation10]  }
  0x6a   : > { %v3538_v23 = vld [vmem:[%s4136_s18 + $0x78] sm:$0xff]   ;;  %v3539_v24 = vld [vmem:[#allocation8 + $0x38] sm:$0xff]   ;;  %v3540_v25 = vld [vmem:[#allocation8 + $0x30] sm:$0xff]   ;;  %6342 = vst [vmem:[#allocation18_spill] sm:$0xff] %v4211_v1  ;;  %s3847_s18 = scalar_lea.vmem %s6209_s1, 4096  ;;  %s3851_s5 = sshll.u32 %s3946_s3, 4  ;;  %s3852_s5 = int_to_ptr.vmem [resolvable:$false] %s3851_s5 }
  0x6b   : > { %3367 = vmatprep.subr.bf16.mxu1 %v3539_v24  ;;  %v3541_v26 = vld [vmem:[#allocation8 + $0x28] sm:$0xff]   ;;  %v3542_v28 = vld [vmem:[#allocation8 + $0x20] sm:$0xff]   ;;  %v4169_v29 = vld [vmem:[%s6261_s2] ss:$0 sm:$0xff]  ;;  %p3848_p1 = scmp.ne.s32.totalorder %s6209_s1, %s3847_s18  ;;  %s3853_s9 = scalar_lea.vmem %s3852_s5, 8192 }
  0x6c   : > { %3324 = vmatpush3.bf16.msra.mxu0 %v3517_v2  ;;  %3368 = vmatpush3.bf16.msra.mxu1 %v3539_v24  ;;  %v3543_v32 = vld [vmem:[#allocation8 + $0x18] sm:$0xff]   ;;  %v990_v37 = vld [vmem:[#allocation7] sm:$0xff]  ;;  %v3545_v58 = vld [vmem:[#allocation8 + $0x8] sm:$0xff]   ;;  %v1920_v2 = vsub.s32 5, %v4171_v30  ;;  %p3854_p10 = scmp.lt.s32.totalorder %s6209_s1, %s3852_s5  ;;  %p3855_p5 = scmp.lt.s32.totalorder %s3853_s9, %s3847_s18 }
  0x6d   : > { %3325 = vmatprep.subr.bf16.mxu0 %v3518_v3  ;;  %3369 = vmatprep.subr.bf16.mxu1 %v3540_v25  ;;  %v3544_v43 = vld [vmem:[#allocation8 + $0x10] sm:$0xff]   ;;  %v4189_v47 = vrot.slane %v990_v37, %v1122_v34  ;;  %v4192_v50 = vrot.slane %v990_v37, %v1158_v39  ;;  %v4200_v55 = vrot.slane %v990_v37, %v1359_v40  ;;  %p3849_p6 = pnand %p3848_p1, %p6741_p4 }
  0x6e   : > { %v4202_v57 = vrot.slane %v990_v37, %v1226_v42  ;;  %v4206_v61 = vrot.slane %v990_v37, %v1459_v46  ;;  %v4209_v0 = vrot.slane %v990_v37, %v1591_v49  ;;  %p3856_p11 = por %p3855_p5, %p3854_p10 }
  0x6f   : > { %p3850_p8 = pneg %p3849_p6 }
  0x70   : > { %3326 = vmatpush3.bf16.msra.mxu0 %v3518_v3  ;;  %3370 = vmatpush3.bf16.msra.mxu1 %v3540_v25  ;;  %6341 = vst [vmem:[#allocation17_spill] sm:$0xff] %v4202_v57  ;;  %v4215_v3 = vadd.s32 8, %v4171_v30 }
  0x71   : > { %3327 = vmatprep.subr.bf16.mxu0 %v3519_v5  ;;  %3371 = vmatprep.subr.bf16.mxu1 %v3541_v26  ;;  %p3857_p2 = pnand %p3856_p11, %p3850_p8 }
  0x74   : > { %3328 = vmatpush3.bf16.msra.mxu0 %v3519_v5  ;;  %3372 = vmatpush3.bf16.msra.mxu1 %v3541_v26 }
  0x75   : > { %3329 = vmatprep.subr.bf16.mxu0 %v3520_v6  ;;  %3373 = vmatprep.subr.bf16.mxu1 %v3542_v28 }
  0x78   : > { %3330 = vmatpush3.bf16.msra.mxu0 %v3520_v6  ;;  %3374 = vmatpush3.bf16.msra.mxu1 %v3542_v28  ;;  %v4219_v6 = vmul.f32 0.0, %v4189_v47 }
  0x79   : > { %3331 = vmatprep.subr.bf16.mxu0 %v3521_v7  ;;  %3375 = vmatprep.subr.bf16.mxu1 %v3543_v32 }
  0x7c   : > { %3332 = vmatpush3.bf16.msra.mxu0 %v3521_v7  ;;  %3376 = vmatpush3.bf16.msra.mxu1 %v3543_v32 }
  0x7d   : > { %3333 = vmatprep.subr.bf16.mxu0 %v3522_v8  ;;  %3377 = vmatprep.subr.bf16.mxu1 %v3544_v43 }
  0x80   : > { %3334 = vmatpush3.bf16.msra.mxu0 %v3522_v8  ;;  %3378 = vmatpush3.bf16.msra.mxu1 %v3544_v43  ;;  %v3546_v8 = vld [vmem:[#allocation8] sm:$0xff]  }
  0x81   : > { %3379 = vmatprep.subr.bf16.mxu1 %v3545_v58 }
  0x83   : > { %3336 = vmatmul.mubr.bf16.vlgmr.msra.gmra.mxu0 %v3524_v9  ;;  %v4221_v9 = vrot.slane %v990_v37, %v1820_v59 }
  0x84   : > { %3339 = vmatprep.mubr.bf16.mxu0 %v3525_v10  ;;  %v4224_v10 = vadd.s32 16, %v4171_v30  ;;  %3380 = vmatpush3.bf16.msra.mxu1 %v3545_v58 }
  0x85   : > { %3381 = vmatprep.subr.bf16.mxu1 %v3546_v8 }
  0x86   : > { %6343 = vst [vmem:[#allocation19_spill] sm:$0xff] %v4224_v10 }
  0x88   : > { %3382 = vmatpush3.bf16.msra.mxu1 %v3546_v8 }
  0x8b   : > { %3340 = vmatmul.mubr.bf16.gmra.mxu0 %v3526_v11  ;;  %v4227_v11 = vadd.s32 24, %v4171_v30 }
  0x8c   : > { %3343 = vmatprep.mubr.bf16.mxu0 %v3527_v12  ;;  %v4230_v12 = vadd.s32 32, %v4171_v30 }
  0x8d   : > { %6344 = vst [vmem:[#allocation20_spill] sm:$0xff] %v4227_v11 }
  0x8e   : > { %6345 = vst [vmem:[#allocation21_spill] sm:$0xff] %v4230_v12 }
  0x93   : > { %3344 = vmatmul.mubr.bf16.gmra.mxu0 %v3528_v13 }
  0x94   : > { %3347 = vmatprep.mubr.bf16.mxu0 %v3529_v14 }
  0x9b   : > { %3348 = vmatmul.mubr.bf16.gmra.mxu0 %v3530_v15  ;;  %v4234_v15 = vadd.s32 40, %v4171_v30 }
  0x9c   : > { %3351 = vmatprep.mubr.bf16.mxu0 %v3531_v16 }
  0x9d   : > { %6346 = vst [vmem:[#allocation22_spill] sm:$0xff] %v4234_v15 }
  0xa3   : > { %3352 = vmatmul.mubr.bf16.gmra.mxu0 %v3532_v17  ;;  %v4236_v17 = vrot.slane %v990_v37, %v1920_v2 }
  0xa4   : > { %3355 = vmatprep.mubr.bf16.mxu0 %v3533_v18 }
  0xab   : > { %3356 = vmatmul.mubr.bf16.gmra.mxu0 %v3534_v19  ;;  %v4241_v19 = vmul.f32 %v4200_v55, %v4198_v54 }
  0xac   : > { %3359 = vmatprep.mubr.bf16.mxu0 %v3535_v20  ;;  %v4245_v20 = vmul.f32 %v4221_v9, %v4211_v1 }
  0xb3   : > { %3360 = vmatmul.mubr.bf16.gmra.mxu0 %v3536_v21 }
  0xb4   : > { %3363 = vmatprep.mubr.bf16.mxu0 %v3537_v22 }
  0xbb   : > { %3364 = vmatmul.mubr.bf16.gmra.mxu0 %v3538_v23  ;;  %v4249_v23 = vadd.s32 48, %v4171_v30 }
  0xbd   : > { %6347 = vst [vmem:[#allocation23_spill] sm:$0xff] %v4249_v23 }
 0x143   : > { %v3337_v31 = vpop.f32.mrf.mxu0 }
 0x144   : > { %v4174_v33 = vadd.f32 %v3337_v31, %v4169_v29 }
 0x145   : > { %v638_v35 = vpop.f32.mrf.mxu0 }
 0x146   : > { %v799_v36 = vmul.f32 0.70710677, %v4174_v33  ;;  %v4179_v38 = vadd.f32 %v4169_v29, %v638_v35  ;;  %v4258_v35 = vadd.s32 56, %v4171_v30  ;;  %v767_v37 = vmul.f32 0.5, %v4174_v33 }
 0x147   : > { %v3338_v41 = vpop.f32.mrf.mxu0 }
 0x148   : > { %3547 = verf.f32 %v799_v36  ;;  %v797_v44 = vmul.f32 0.70710677, %v4179_v38  ;;  %v4186_v45 = vadd.f32 %v3338_v41, %v4169_v29  ;;  %6348 = vst [vmem:[#allocation24_spill] sm:$0xff] %v4258_v35  ;;  %v765_v39 = vmul.f32 0.5, %v4179_v38 }
 0x149   : > { %v641_v48 = vpop.f32.mrf.mxu0  ;;  %v4268_v38 = vadd.s32 64, %v4171_v30 }
 0x14a   : > { %3549 = verf.f32 %v797_v44  ;;  %v800_v51 = vmul.f32 0.70710677, %v4186_v45  ;;  %v4196_v52 = vadd.f32 %v4169_v29, %v641_v48  ;;  %v768_v40 = vmul.f32 0.5, %v4186_v45 }
 0x14b   : > { %v3341_v56 = vpop.f32.mrf.mxu0  ;;  %6349 = vst [vmem:[#allocation25_spill] sm:$0xff] %v4268_v38 }
 0x14c   : > { %3551 = verf.f32 %v800_v51  ;;  %v798_v60 = vmul.f32 0.70710677, %v4196_v52  ;;  %v663_v62 = vadd.f32 %v3341_v56, %v4169_v29  ;;  %v766_v48 = vmul.f32 0.5, %v4196_v52 }
 0x14d   : > { %v654_v63 = vpop.f32.mrf.mxu0 }
 0x14e   : > { %3553 = verf.f32 %v798_v60  ;;  %v803_v4 = vmul.f32 0.70710677, %v663_v62  ;;  %v655_v5 = vadd.f32 %v4169_v29, %v654_v63  ;;  %v771_v49 = vmul.f32 0.5, %v663_v62 }
 0x14f   : > { %v3342_v7 = vpop.f32.mrf.mxu0 }
 0x150   : > { %3555 = verf.f32 %v803_v4  ;;  %v801_v13 = vmul.f32 0.70710677, %v655_v5  ;;  %v666_v14 = vadd.f32 %v3342_v7, %v4169_v29  ;;  %v769_v59 = vmul.f32 0.5, %v655_v5 }
 0x151   : > { %v657_v16 = vpop.f32.mrf.mxu0 }
 0x152   : > { %3557 = verf.f32 %v801_v13  ;;  %v804_v21 = vmul.f32 0.70710677, %v666_v14  ;;  %v658_v22 = vadd.f32 %v4169_v29, %v657_v16  ;;  %v4273_v60 = vmul.f32 0.5, %v666_v14 }
 0x153   : > { %v3345_v24 = vpop.f32.mrf.mxu0 }
 0x154   : > { %v802_v31 = vmul.f32 0.70710677, %v658_v22  ;;  %v679_v32 = vadd.f32 %v3345_v24, %v4169_v29  ;;  %3559 = verf.f32 %v804_v21  ;;  %v4276_v4 = vmul.f32 0.5, %v658_v22 }
 0x155   : > { %v3548_v36 = vpop.eup %3547  ;;  %v670_v41 = vpop.f32.mrf.mxu0 }
 0x156   : > { %v863_v42 = vadd.f32 1.0, %v3548_v36  ;;  %3561 = verf.f32 %v802_v31  ;;  %v807_v43 = vmul.f32 0.70710677, %v679_v32  ;;  %v671_v33 = vadd.f32 %v4169_v29, %v670_v41 }
 0x157   : > { %v3550_v46 = vpop.eup %3549  ;;  %v3346_v51 = vpop.f32.mrf.mxu0  ;;  %v4278_v7 = vmul.f32 0.5, %v679_v32 }
 0x158   : > { %v4270_v53 = vmul.f32 %v863_v42, %v767_v37  ;;  %v861_v45 = vadd.f32 1.0, %v3550_v46  ;;  %3563 = verf.f32 %v807_v43  ;;  %v805_v63 = vmul.f32 0.70710677, %v671_v33 }
 0x159   : > { %v3552_v58 = vpop.eup %3551  ;;  %v682_v52 = vadd.f32 %v3346_v51, %v4169_v29  ;;  %v673_v62 = vpop.f32.mrf.mxu0  ;;  %v4280_v8 = vmul.f32 0.5, %v671_v33 }
 0x15a   : > { %v893_v2 = vmul.f32 %v861_v45, %v765_v39  ;;  %v4284_v16 = vmul.f32 %v4189_v47, %v4270_v53  ;;  %v864_v21 = vadd.f32 1.0, %v3552_v58  ;;  %3565 = verf.f32 %v805_v63 }
 0x15b   : > { %v3554_v13 = vpop.eup %3553  ;;  %v3349_v5 = vpop.f32.mrf.mxu0  ;;  %v4288_v24 = vrot.slane %v4270_v53, 7  ;;  %v4291_v22 = vrot.slane %v4270_v53, 1  ;;  %v1162_v37 = vmul.f32 %v4192_v50, %v4270_v53  ;;  %v808_v42 = vmul.f32 0.70710677, %v682_v52 }
 0x15c   : > { %6350 = vst [vmem:[#allocation26_spill] sm:$0xff] %v4284_v16  ;;  %v1126_v31 = vmul.f32 %v4189_v47, %v893_v2  ;;  %v4294_v32 = vrot.slane %v893_v2, 7  ;;  %v4298_v39 = vmul.f32 %v864_v21, %v768_v40  ;;  %v862_v41 = vadd.f32 1.0, %v3554_v13 }
 0x15d   : > { %6351 = vst [vmem:[#allocation27_spill] sm:$0xff] %v4291_v22  ;;  %v3556_v36 = vpop.eup %3555  ;;  %v686_v43 = vpop.f32.mrf.mxu0  ;;  %v4304_v51 = vmul.f32 0.5, %v682_v52  ;;  %v674_v45 = vadd.f32 %v4169_v29, %v673_v62  ;;  %v4308_v63 = vmul.f32 %v4192_v50, %v893_v2  ;;  %v4312_v40 = vrot.slane %v893_v2, 1 }
 0x15e   : > { %v1354_v46 = vsel %vm1324_vm0, %v4198_v54, %v4294_v32  ;;  %v867_v33 = vadd.f32 1.0, %v3556_v36  ;;  %v4310_v14 = vadd.f32 %v1162_v37, %v1126_v31  ;;  %v695_v13 = vadd.f32 %v3349_v5, %v4169_v29 }
 0x15f   : > { %v3558_v58 = vpop.eup %3557  ;;  %v3350_v21 = vpop.f32.mrf.mxu0  ;;  %v4316_v56 = vmul.f32 %v4200_v55, %v1354_v46  ;;  %v4318_v44 = vmul.f32 %v862_v41, %v766_v48  ;;  %v4324_v62 = vmul.f32 %v4189_v47, %v4298_v39  ;;  %3567 = verf.f32 %v808_v42 }
 0x160   : > { %v4320_v52 = vmul.f32 %v867_v33, %v771_v49  ;;  %v865_v36 = vadd.f32 1.0, %v3558_v58  ;;  %v1163_v48 = vmul.f32 %v4192_v50, %v4298_v39  ;;  %v4335_v41 = vmul.f32 0.5, %v674_v45 }
 0x161   : > { %6353 = vst [vmem:[#allocation29_spill] sm:$0xff] %v4324_v62  ;;  %v4328_v37 = vpop.f32.mrf.mxu0  ;;  %v3560_v5 = vpop.eup %3559  ;;  %v1127_v46 = vmul.f32 %v4189_v47, %v4318_v44  ;;  %v6273_v49 = vrot.slane %v4318_v44, 7  ;;  %v4339_v58 = vmul.f32 %v4192_v50, %v4318_v44  ;;  %v806_v34 = vmul.f32 0.70710677, %v674_v45 }
 0x162   : > { %6352 = vst [vmem:[#allocation28_spill] sm:$0xff] %v4320_v52  ;;  %v4342_v28 = vmul.f32 0.5, %v695_v13  ;;  %v4351_v26 = vmul.f32 %v4189_v47, %v4320_v52  ;;  %v4355_v2 = vmul.f32 %v4192_v50, %v4320_v52  ;;  %v4357_v18 = vmul.f32 %v865_v36, %v769_v59 }
 0x163   : > { %v3562_v33 = vpop.eup %3561  ;;  %v3353_v25 = vpop.f32.mrf.mxu0  ;;  %v1352_v27 = vsel %vm1324_vm0, %v6273_v49, %v4288_v24  ;;  %v4361_v42 = vmul.f32 %v4202_v57, %v4320_v52  ;;  %v868_v38 = vadd.f32 1.0, %v3560_v5  ;;  %v4364_v23 = vadd.f32 %v1163_v48, %v1127_v46 }
 0x164   : > { %6354 = vst [vmem:[#allocation30_spill] sm:$0xff] %v4351_v26  ;;  %6355 = vst [vmem:[#allocation31_spill] sm:$0xff] %v4355_v2  ;;  %v866_v35 = vadd.f32 1.0, %v3562_v33  ;;  %v4367_v26 = vmul.f32 %v4200_v55, %v1352_v27  ;;  %v4370_v15 = vmul.f32 %v4206_v61, %v1352_v27  ;;  %v4375_v36 = vmul.f32 %v4189_v47, %v4357_v18 }
 0x165   : > { %v3564_v45 = vpop.eup %3563  ;;  %6356 = vst [vmem:[#allocation32_spill] sm:$0xff] %v4361_v42  ;;  %v702_v49 = vpop.f32.mrf.mxu0  ;;  %v4378_v2 = vmul.f32 %v868_v38, %v4273_v60  ;;  %v4385_v31 = vmul.f32 %v4192_v50, %v4357_v18  ;;  %3569 = verf.f32 %v806_v34  ;;  %v811_v27 = vmul.f32 0.70710677, %v695_v13 }
 0x166   : > { %6357 = vst [vmem:[#allocation33_spill] sm:$0xff] %v4367_v26  ;;  %6358 = vst [vmem:[#allocation34_spill] sm:$0xff] %v4375_v36  ;;  %v4381_v5 = vmul.f32 %v866_v35, %v4276_v4  ;;  %v871_v46 = vadd.f32 1.0, %v3564_v45  ;;  %v687_v59 = vadd.f32 %v4169_v29, %v686_v43  ;;  %v4390_v36 = vmul.f32 %v4202_v57, %v4357_v18 }
 0x167   : > { %6359 = vst [vmem:[#allocation35_spill] sm:$0xff] %v4378_v2  ;;  %v3354_v48 = vpop.f32.mrf.mxu0  ;;  %v3566_v33 = vpop.eup %3565  ;;  %6360 = vst [vmem:[#allocation36_spill] sm:$0xff] %v4385_v31  ;;  %v698_v60 = vadd.f32 %v3350_v21, %v4169_v29  ;;  %v4397_v45 = vmul.f32 %v4189_v47, %v4378_v2  ;;  %v4401_v34 = vmul.f32 %v4192_v50, %v4378_v2  ;;  %3571 = verf.f32 %v811_v27 }
 0x168   : > { %v4405_v43 = vmul.f32 %v4202_v57, %v4378_v2  ;;  %v4411_v21 = vmul.f32 %v4189_v47, %v4381_v5  ;;  %v4414_v35 = vmul.f32 %v871_v46, %v4278_v7  ;;  %v809_v13 = vmul.f32 0.70710677, %v687_v59 }
 0x169   : > { %v705_v4 = vpop.f32.mrf.mxu0  ;;  %6361 = vst [vmem:[#allocation37_spill] sm:$0xff] %v4397_v45  ;;  %6362 = vst [vmem:[#allocation38_spill] sm:$0xff] %v4401_v34  ;;  %v869_v45 = vadd.f32 1.0, %v3566_v33  ;;  %v4418_v34 = vmul.f32 %v4192_v50, %v4381_v5  ;;  %v4428_v7 = vmul.f32 0.5, %v698_v60  ;;  %v812_v27 = vmul.f32 0.70710677, %v698_v60 }
 0x16a   : > { %6363 = vst [vmem:[#allocation39_spill] sm:$0xff] %v4405_v43  ;;  %6364 = vst [vmem:[#allocation40_spill] sm:$0xff] %v4411_v21  ;;  %v4422_v43 = vmul.f32 %v4202_v57, %v4381_v5  ;;  %v4426_v21 = vmul.f32 0.5, %v687_v59  ;;  %v4432_v2 = vmul.f32 %v4189_v47, %v4414_v35  ;;  %3573 = verf.f32 %v809_v13 }
 0x16b   : > { %6365 = vst [vmem:[#allocation41_spill] sm:$0xff] %v4414_v35  ;;  %v3357_v26 = vpop.f32.mrf.mxu0  ;;  %6366 = vst [vmem:[#allocation42_spill] sm:$0xff] %v4418_v34  ;;  %v4435_v34 = vmul.f32 %v869_v45, %v4280_v8  ;;  %v690_v38 = vadd.f32 %v4169_v29, %v4328_v37  ;;  %v711_v59 = vadd.f32 %v3353_v25, %v4169_v29  ;;  %3575 = verf.f32 %v812_v27 }
 0x16c   : > { %v3568_v33 = vpop.eup %3567  ;;  %6367 = vst [vmem:[#allocation43_spill] sm:$0xff] %v4432_v2  ;;  %v703_v42 = vadd.f32 %v4169_v29, %v702_v49  ;;  %v4443_v16 = vmul.f32 %v4192_v50, %v4414_v35  ;;  %v4447_v2 = vmul.f32 %v4202_v57, %v4414_v35  ;;  %v714_v27 = vadd.f32 %v3354_v48, %v4169_v29 }
 0x16d   : > { %v718_v46 = vpop.f32.mrf.mxu0  ;;  %6368 = vst [vmem:[#allocation44_spill] sm:$0xff] %v4435_v34  ;;  %v872_v62 = vadd.f32 1.0, %v3568_v33  ;;  %v4453_v37 = vmul.f32 %v4189_v47, %v4435_v34  ;;  %v4457_v25 = vmul.f32 %v4192_v50, %v4435_v34  ;;  %v4464_v13 = vmul.f32 %v4202_v57, %v4435_v34 }
 0x16e   : > { %6369 = vst [vmem:[#allocation45_spill] sm:$0xff] %v4443_v16  ;;  %6370 = vst [vmem:[#allocation46_spill] sm:$0xff] %v4447_v2  ;;  %v810_v8 = vmul.f32 0.70710677, %v690_v38  ;;  %v815_v60 = vmul.f32 0.70710677, %v711_v59 }
 0x16f   : > { %v3358_v31 = vpop.f32.mrf.mxu0  ;;  %6371 = vst [vmem:[#allocation47_spill] sm:$0xff] %v4453_v37  ;;  %6372 = vst [vmem:[#allocation48_spill] sm:$0xff] %v4457_v25  ;;  %v4460_v49 = vmul.f32 %v872_v62, %v4304_v51  ;;  %v4468_v37 = vmul.f32 0.5, %v690_v38  ;;  %v4470_v2 = vmul.f32 0.5, %v711_v59  ;;  %v4472_v25 = vmul.f32 0.5, %v703_v42 }
 0x170   : > { %6374 = vst [vmem:[#allocation50_spill] sm:$0xff] %v4464_v13  ;;  %3577 = verf.f32 %v810_v8  ;;  %v813_v62 = vmul.f32 0.70710677, %v703_v42  ;;  %v706_v13 = vadd.f32 %v4169_v29, %v705_v4  ;;  %v727_v38 = vadd.f32 %v3357_v26, %v4169_v29 }
 0x171   : > { %6373 = vst [vmem:[#allocation49_spill] sm:$0xff] %v4460_v49  ;;  %v721_v45 = vpop.f32.mrf.mxu0  ;;  %v4476_v51 = vmul.f32 %v4189_v47, %v4460_v49  ;;  %3579 = verf.f32 %v815_v60  ;;  %v719_v59 = vadd.f32 %v4169_v29, %v718_v46  ;;  %v4484_v16 = vmul.f32 %v4192_v50, %v4460_v49 }
 0x172   : > { %v3570_v33 = vpop.eup %3569  ;;  %3581 = verf.f32 %v813_v62  ;;  %v4488_v42 = vmul.f32 %v4202_v57, %v4460_v49  ;;  %v814_v8 = vmul.f32 0.70710677, %v706_v13  ;;  %v819_v60 = vmul.f32 0.70710677, %v727_v38 }
 0x173   : > { %6375 = vst [vmem:[#allocation51_spill] sm:$0xff] %v4476_v51  ;;  %v3361_v35 = vpop.f32.mrf.mxu0  ;;  %6376 = vst [vmem:[#allocation52_spill] sm:$0xff] %v4484_v16  ;;  %v870_v34 = vadd.f32 1.0, %v3570_v33  ;;  %v816_v51 = vmul.f32 0.70710677, %v714_v27  ;;  %v4495_v33 = vmul.f32 0.5, %v714_v27  ;;  %v730_v62 = vadd.f32 %v3358_v31, %v4169_v29 }
 0x174   : > { %6377 = vst [vmem:[#allocation53_spill] sm:$0xff] %v4488_v42  ;;  %v817_v46 = vmul.f32 0.70710677, %v719_v59  ;;  %v3572_v16 = vpop.eup %3571  ;;  %v722_v42 = vadd.f32 %v4169_v29, %v721_v45  ;;  %v4499_v11 = vmul.f32 0.5, %v706_v13  ;;  %v4501_v48 = vmul.f32 0.5, %v727_v38 }
 0x175   : > { %v4493_v26 = vmul.f32 %v870_v34, %v4335_v41  ;;  %3583 = verf.f32 %v816_v51  ;;  %v734_v12 = vpop.f32.mrf.mxu0  ;;  %v4503_v52 = vmul.f32 0.5, %v719_v59  ;;  %v743_v41 = vadd.f32 %v3361_v35, %v4169_v29 }
 0x176   : > { %3585 = verf.f32 %v814_v8  ;;  %v875_v31 = vadd.f32 1.0, %v3572_v16  ;;  %v820_v38 = vmul.f32 0.70710677, %v730_v62 }
 0x177   : > { %6378 = vst [vmem:[#allocation54_spill] sm:$0xff] %v4493_v26  ;;  %v3574_v34 = vpop.eup %3573  ;;  %v4508_v51 = vmul.f32 %v4189_v47, %v4493_v26  ;;  %v4512_v27 = vmul.f32 %v4192_v50, %v4493_v26  ;;  %3587 = verf.f32 %v819_v60  ;;  %v4516_v45 = vmul.f32 %v4202_v57, %v4493_v26  ;;  %v3362_v59 = vpop.f32.mrf.mxu0 }
 0x178   : > { %v873_v13 = vadd.f32 1.0, %v3574_v34  ;;  %3589 = verf.f32 %v817_v46  ;;  %v4521_v4 = vmul.f32 %v875_v31, %v4342_v28  ;;  %v3576_v49 = vpop.eup %3575  ;;  %v823_v60 = vmul.f32 0.70710677, %v743_v41 }
 0x179   : > { %6379 = vst [vmem:[#allocation55_spill] sm:$0xff] %v4508_v51  ;;  %6380 = vst [vmem:[#allocation56_spill] sm:$0xff] %v4512_v27  ;;  %v818_v51 = vmul.f32 0.70710677, %v722_v42  ;;  %3591 = verf.f32 %v820_v38  ;;  %v735_v27 = vadd.f32 %v4169_v29, %v734_v12  ;;  %v4527_v34 = vmul.f32 0.5, %v730_v62 }
 0x17a   : > { %6381 = vst [vmem:[#allocation57_spill] sm:$0xff] %v4516_v45  ;;  %6382 = vst [vmem:[#allocation58_spill] sm:$0xff] %v4521_v4  ;;  %v4524_v16 = vmul.f32 %v873_v13, %v4426_v21  ;;  %v4529_v46 = vmul.f32 0.5, %v722_v42  ;;  %v4531_v45 = vmul.f32 0.5, %v743_v41  ;;  %v746_v8 = vadd.f32 %v3362_v59, %v4169_v29 }
 0x17b   : > { %v4536_v28 = vmul.f32 %v4189_v47, %v4521_v4  ;;  %v4540_v21 = vmul.f32 %v4192_v50, %v4521_v4  ;;  %v4544_v31 = vmul.f32 %v4202_v57, %v4521_v4  ;;  %v876_v13 = vadd.f32 1.0, %v3576_v49 }
 0x17c   : > { %v4550_v41 = vmul.f32 %v4189_v47, %v4524_v16  ;;  %3593 = verf.f32 %v818_v51  ;;  %v4554_v59 = vmul.f32 %v4192_v50, %v4524_v16  ;;  %v4558_v12 = vmul.f32 %v4202_v57, %v4524_v16 }
 0x17d   : > { %6383 = vst [vmem:[#allocation59_spill] sm:$0xff] %v4536_v28  ;;  %6384 = vst [vmem:[#allocation60_spill] sm:$0xff] %v4540_v21  ;;  %v3578_v42 = vpop.eup %3577  ;;  %3595 = verf.f32 %v823_v60  ;;  %v821_v28 = vmul.f32 0.70710677, %v735_v27  ;;  %v737_v21 = vpop.f32.mrf.mxu0  ;;  %v824_v60 = vmul.f32 0.70710677, %v746_v8 }
 0x17e   : > { %6385 = vst [vmem:[#allocation61_spill] sm:$0xff] %v4544_v31  ;;  %6386 = vst [vmem:[#allocation62_spill] sm:$0xff] %v4550_v41  ;;  %v3580_v38 = vpop.eup %3579  ;;  %v874_v35 = vadd.f32 1.0, %v3578_v42  ;;  %v4562_v41 = vmul.f32 %v876_v13, %v4428_v7  ;;  %v4568_v26 = vmul.f32 0.5, %v735_v27  ;;  %v4570_v10 = vmul.f32 0.5, %v746_v8 }
 0x17f   : > { %6387 = vst [vmem:[#allocation63_spill] sm:$0xff] %v4554_v59  ;;  %v3582_v31 = vpop.eup %3581  ;;  %6388 = vst [vmem:[#allocation64_spill] sm:$0xff] %v4558_v12  ;;  %v879_v49 = vadd.f32 1.0, %v3580_v38  ;;  %3597 = verf.f32 %v821_v28  ;;  %v738_v12 = vadd.f32 %v4169_v29, %v737_v21 }
 0x180   : > { %6389 = vst [vmem:[#allocation65_spill] sm:$0xff] %v4562_v41  ;;  %v4566_v4 = vmul.f32 %v874_v35, %v4468_v37  ;;  %v877_v42 = vadd.f32 1.0, %v3582_v31  ;;  %v4575_v7 = vmul.f32 %v4189_v47, %v4562_v41  ;;  %v4579_v13 = vmul.f32 %v4192_v50, %v4562_v41 }
 0x181   : > { %v4583_v37 = vmul.f32 %v4202_v57, %v4562_v41  ;;  %v4592_v28 = vmul.f32 %v879_v49, %v4470_v2  ;;  %3599 = verf.f32 %v824_v60  ;;  %v4607_v49 = vmul.f32 0.5, %v738_v12 }
 0x182   : > { %v3584_v59 = vpop.eup %3583  ;;  %6390 = vst [vmem:[#allocation66_spill] sm:$0xff] %v4575_v7  ;;  %6391 = vst [vmem:[#allocation67_spill] sm:$0xff] %v4579_v13  ;;  %v4589_v8 = vmul.f32 %v4189_v47, %v4566_v4  ;;  %v4595_v21 = vmul.f32 %v877_v42, %v4472_v25  ;;  %v4599_v38 = vmul.f32 %v4192_v50, %v4566_v4 }
 0x183   : > { %v3586_v62 = vpop.eup %3585  ;;  %6392 = vst [vmem:[#allocation68_spill] sm:$0xff] %v4583_v37  ;;  %6394 = vst [vmem:[#allocation70_spill] sm:$0xff] %v4592_v28  ;;  %v880_v51 = vadd.f32 1.0, %v3584_v59  ;;  %v4603_v35 = vmul.f32 %v4202_v57, %v4566_v4  ;;  %v4611_v25 = vmul.f32 %v4189_v47, %v4592_v28  ;;  %v4615_v59 = vmul.f32 %v4192_v50, %v4592_v28 }
 0x184   : > { %6393 = vst [vmem:[#allocation69_spill] sm:$0xff] %v4589_v8  ;;  %v3588_v31 = vpop.eup %3587  ;;  %6395 = vst [vmem:[#allocation71_spill] sm:$0xff] %v4599_v38  ;;  %v878_v7 = vadd.f32 1.0, %v3586_v62  ;;  %v4619_v62 = vmul.f32 %v4202_v57, %v4592_v28  ;;  %v4625_v2 = vmul.f32 %v4189_v47, %v4595_v21  ;;  %v822_v38 = vmul.f32 0.70710677, %v738_v12 }
 0x185   : > { %v3590_v27 = vpop.eup %3589  ;;  %6396 = vst [vmem:[#allocation72_spill] sm:$0xff] %v4611_v25  ;;  %6397 = vst [vmem:[#allocation73_spill] sm:$0xff] %v4615_v59  ;;  %v4628_v8 = vmul.f32 %v880_v51, %v4495_v33  ;;  %v883_v59 = vadd.f32 1.0, %v3588_v31  ;;  %v4635_v42 = vmul.f32 %v4192_v50, %v4595_v21  ;;  %v4639_v13 = vmul.f32 %v4202_v57, %v4595_v21  ;;  %v3365_v51 = vpop.f32.mrf.mxu0 }
 0x186   : > { %6398 = vst [vmem:[#allocation74_spill] sm:$0xff] %v4619_v62  ;;  %v3592_v60 = vpop.eup %3591  ;;  %6399 = vst [vmem:[#allocation75_spill] sm:$0xff] %v4625_v2  ;;  %v4631_v25 = vmul.f32 %v878_v7, %v4499_v11  ;;  %v881_v37 = vadd.f32 1.0, %v3590_v27  ;;  %3601 = verf.f32 %v822_v38 }
 0x187   : > { %6400 = vst [vmem:[#allocation76_spill] sm:$0xff] %v4628_v8  ;;  %v884_v41 = vadd.f32 1.0, %v3592_v60  ;;  %6401 = vst [vmem:[#allocation77_spill] sm:$0xff] %v4635_v42  ;;  %v4645_v11 = vmul.f32 %v4189_v47, %v4628_v8  ;;  %v4649_v12 = vmul.f32 %v4192_v50, %v4628_v8  ;;  %v4653_v7 = vmul.f32 %v4202_v57, %v4628_v8 }
 0x188   : > { %v4659_v2 = vmul.f32 %v4189_v47, %v4631_v25  ;;  %v4662_v33 = vmul.f32 %v883_v59, %v4501_v48  ;;  %v4676_v60 = vmul.f32 %v4202_v57, %v4631_v25 }
 0x189   : > { %v3594_v62 = vpop.eup %3593  ;;  %6402 = vst [vmem:[#allocation78_spill] sm:$0xff] %v4645_v11  ;;  %6403 = vst [vmem:[#allocation79_spill] sm:$0xff] %v4649_v12  ;;  %v4665_v11 = vmul.f32 %v881_v37, %v4503_v52  ;;  %v4669_v12 = vmul.f32 %v4192_v50, %v4631_v25  ;;  %v750_v52 = vpop.f32.mrf.mxu0 }
 0x18a   : > { %6404 = vst [vmem:[#allocation80_spill] sm:$0xff] %v4653_v7  ;;  %v3596_v31 = vpop.eup %3595  ;;  %6405 = vst [vmem:[#allocation81_spill] sm:$0xff] %v4659_v2  ;;  %v4672_v7 = vmul.f32 %v884_v41, %v4527_v34  ;;  %v882_v27 = vadd.f32 1.0, %v3594_v62  ;;  %v4682_v8 = vmul.f32 %v4189_v47, %v4662_v33  ;;  %v4686_v34 = vmul.f32 %v4192_v50, %v4662_v33 }
 0x18b   : > { %6406 = vst [vmem:[#allocation82_spill] sm:$0xff] %v4662_v33  ;;  %6407 = vst [vmem:[#allocation83_spill] sm:$0xff] %v4665_v11  ;;  %v887_v59 = vadd.f32 1.0, %v3596_v31  ;;  %v4690_v41 = vmul.f32 %v4202_v57, %v4662_v33  ;;  %v4696_v31 = vmul.f32 %v4189_v47, %v4665_v11  ;;  %v4700_v48 = vmul.f32 %v4192_v50, %v4665_v11 }
 0x18c   : > { %6408 = vst [vmem:[#allocation84_spill] sm:$0xff] %v4669_v12  ;;  %6409 = vst [vmem:[#allocation85_spill] sm:$0xff] %v4672_v7  ;;  %v3598_v37 = vpop.eup %3597  ;;  %v4704_v2 = vmul.f32 %v4202_v57, %v4665_v11  ;;  %v4710_v38 = vmul.f32 %v4189_v47, %v4672_v7  ;;  %v4713_v62 = vmul.f32 %v882_v27, %v4529_v46  ;;  %v3366_v12 = vpop.f32.mrf.mxu0 }
 0x18d   : > { %6410 = vst [vmem:[#allocation86_spill] sm:$0xff] %v4676_v60  ;;  %6411 = vst [vmem:[#allocation87_spill] sm:$0xff] %v4682_v8  ;;  %v759_v33 = vadd.f32 %v3365_v51, %v4169_v29  ;;  %v4722_v8 = vmul.f32 %v4192_v50, %v4672_v7 }
 0x18e   : > { %6412 = vst [vmem:[#allocation88_spill] sm:$0xff] %v4686_v34  ;;  %6413 = vst [vmem:[#allocation89_spill] sm:$0xff] %v4690_v41  ;;  %v4716_v41 = vmul.f32 %v887_v59, %v4531_v45  ;;  %v4726_v34 = vmul.f32 %v4202_v57, %v4672_v7  ;;  %v4732_v45 = vmul.f32 %v4189_v47, %v4713_v62  ;;  %v753_v7 = vpop.f32.mrf.mxu0 }
 0x18f   : > { %6414 = vst [vmem:[#allocation90_spill] sm:$0xff] %v4696_v31  ;;  %6415 = vst [vmem:[#allocation91_spill] sm:$0xff] %v4700_v48  ;;  %v3600_v31 = vpop.eup %3599  ;;  %v885_v48 = vadd.f32 1.0, %v3598_v37  ;;  %v4736_v51 = vmul.f32 %v4192_v50, %v4713_v62  ;;  %v4740_v59 = vmul.f32 %v4202_v57, %v4713_v62 }
 0x190   : > { %6416 = vst [vmem:[#allocation92_spill] sm:$0xff] %v4704_v2  ;;  %6417 = vst [vmem:[#allocation93_spill] sm:$0xff] %v4710_v38  ;;  %v751_v2 = vadd.f32 %v4169_v29, %v750_v52  ;;  %v4746_v46 = vmul.f32 %v4189_v47, %v4716_v41  ;;  %v888_v38 = vadd.f32 1.0, %v3600_v31 }
 0x191   : > { %6418 = vst [vmem:[#allocation94_spill] sm:$0xff] %v4713_v62  ;;  %6419 = vst [vmem:[#allocation95_spill] sm:$0xff] %v4716_v41  ;;  %v4749_v27 = vmul.f32 %v885_v48, %v4568_v26 }
 0x192   : > { %6420 = vst [vmem:[#allocation96_spill] sm:$0xff] %v4722_v8  ;;  %6421 = vst [vmem:[#allocation97_spill] sm:$0xff] %v4726_v34  ;;  %v4753_v8 = vmul.f32 %v4192_v50, %v4716_v41  ;;  %v827_v34 = vmul.f32 0.70710677, %v759_v33  ;;  %v825_v52 = vmul.f32 0.70710677, %v751_v2  ;;  %v4770_v31 = vmul.f32 %v888_v38, %v4570_v10 }
 0x193   : > { %6422 = vst [vmem:[#allocation98_spill] sm:$0xff] %v4732_v45  ;;  %6423 = vst [vmem:[#allocation99_spill] sm:$0xff] %v4736_v51  ;;  %v4757_v45 = vmul.f32 %v4202_v57, %v4716_v41  ;;  %v4763_v26 = vmul.f32 0.5, %v751_v2  ;;  %v4767_v48 = vmul.f32 %v4189_v47, %v4749_v27  ;;  %v754_v2 = vadd.f32 %v4169_v29, %v753_v7  ;;  %v3602_v37 = vpop.eup %3601 }
 0x194   : > { %6424 = vst [vmem:[#allocation100_spill] sm:$0xff] %v4740_v59  ;;  %6425 = vst [vmem:[#allocation101_spill] sm:$0xff] %v4746_v46  ;;  %v4761_v46 = vmul.f32 0.5, %v759_v33  ;;  %3603 = verf.f32 %v827_v34  ;;  %v4779_v33 = vmul.f32 %v4202_v57, %v4749_v27  ;;  %v1193_v38 = vadd.f32 %v4339_v58, %v4219_v6 }
 0x195   : > { %6426 = vst [vmem:[#allocation102_spill] sm:$0xff] %v4749_v27  ;;  %6427 = vst [vmem:[#allocation103_spill] sm:$0xff] %v4753_v8  ;;  %v762_v8 = vadd.f32 %v3366_v12, %v4169_v29  ;;  %3605 = verf.f32 %v825_v52  ;;  %v1192_v12 = vadd.f32 %v4308_v63, %v4219_v6  ;;  %v4791_v51 = vmul.f32 %v4189_v47, %v4770_v31 }
 0x196   : > { %6428 = vst [vmem:[#allocation104_spill] sm:$0xff] %v4757_v45  ;;  %6429 = vst [vmem:[#allocation105_spill] sm:$0xff] %v4767_v48  ;;  %v4775_v45 = vmul.f32 %v4192_v50, %v4749_v27  ;;  %v4795_v52 = vmul.f32 %v4192_v50, %v4770_v31  ;;  %v886_v29 = vadd.f32 1.0, %v3602_v37  ;;  %v4799_v10 = vmul.f32 %v4202_v57, %v4770_v31 }
 0x197   : > { %6430 = vst [vmem:[#allocation106_spill] sm:$0xff] %v4770_v31  ;;  %6432 = vst [vmem:[#allocation108_spill] sm:$0xff] %v4779_v33  ;;  %v828_v7 = vmul.f32 0.70710677, %v762_v8  ;;  %v826_v63 = vmul.f32 0.70710677, %v754_v2  ;;  %v1228_v6 = vmul.f32 %v4202_v57, %v4270_v53 }
 0x198   : > { %6431 = vst [vmem:[#allocation107_spill] sm:$0xff] %v4775_v45  ;;  %6433 = vst [vmem:[#allocation109_spill] sm:$0xff] %v4791_v51  ;;  %v4805_v58 = vmul.f32 %v886_v29, %v4607_v49  ;;  %v1229_v51 = vmul.f32 %v4202_v57, %v4298_v39  ;;  %v6437_v37 = vrot.slane %v4318_v44, 7  ;;  %v4815_v34 = vmul.f32 0.5, %v762_v8 }
 0x199   : > { %6434 = vst [vmem:[#allocation110_spill] sm:$0xff] %v4795_v52  ;;  %6435 = vst [vmem:[#allocation111_spill] sm:$0xff] %v4799_v10  ;;  %3607 = verf.f32 %v828_v7  ;;  %v6438_v53 = vrot.slane %v4298_v39, 7  ;;  %v4822_v29 = vmul.f32 0.5, %v754_v2  ;;  %v4824_v7 = vadd.f32 %v1228_v6, %v1192_v12 }
 0x19a   : > { %6436 = vst [vmem:[#allocation112_spill] sm:$0xff] %v4805_v58  ;;  %v1353_v52 = vsel %vm1324_vm0, %v4294_v32, %v6437_v37  ;;  %3609 = verf.f32 %v826_v63  ;;  %v1261_v10 = vadd.f32 %v1229_v51, %v1193_v38  ;;  %v4829_v37 = vmul.f32 %v4189_v47, %v4805_v58 }
 0x19b   : > { %v1351_v49 = vsel %vm1324_vm0, %v4288_v24, %v6438_v53  ;;  %v1364_v45 = vmul.f32 %v4200_v55, %v1353_v52  ;;  %v4833_v8 = vmul.f32 %v4192_v50, %v4805_v58  ;;  %v4837_v63 = vmul.f32 %v4202_v57, %v4805_v58 }
 0x19c   : > { %6439 = vst [vmem:[#allocation113_spill] sm:$0xff] %v4829_v37  ;;  %v1462_v2 = vmul.f32 %v4206_v61, %v1353_v52  ;;  %v1588_v38 = vsel %vm1324_vm0, %v4198_v54, %v4288_v24  ;;  %v1594_v6 = vmul.f32 %v4209_v0, %v1351_v49  ;;  %v6442_v53 = vand.u32 15, %v4215_v3 }
 0x19d   : > { %6440 = vst [vmem:[#allocation114_spill] sm:$0xff] %v4833_v8  ;;  %6441 = vst [vmem:[#allocation115_spill] sm:$0xff] %v4837_v63  ;;  %v6445_v52 = vrot.slane %v4298_v39, 1  ;;  %v6446_v12 = vrot.slane %v4318_v44, 1  ;;  %v6448_v31 = vrot.slane %v4357_v18, 1  ;;  %v1815_v44 = vsel %vm1785_vm1, %v4211_v1, %v4312_v40 }
 0x19e   : > { %vm4849_vm2 = vcmp.lt.s32.totalorder %v6442_v53, 15  ;;  %v1494_v37 = vadd.f32 %v1462_v2, %v4241_v19  ;;  %v4870_v19 = vmul.f32 %v4200_v55, %v1351_v49  ;;  %v1464_v2 = vmul.f32 %v4206_v61, %v1351_v49  ;;  %v4888_v63 = vld [vmem:[#allocation7 + $0x8] ss:$0 sm:$0xff] }
 0x19f   : > { %v1812_v51 = vsel %vm1785_vm1, %v4291_v22, %v6445_v52  ;;  %v1813_v24 = vsel %vm1785_vm1, %v6446_v12, %v4291_v22  ;;  %v6447_v3 = vmov %v6446_v12  ;;  %v1811_v8 = vsel %vm1785_vm1, %v6445_v52, %v6448_v31 }
 0x1a0   : > { %v1814_v53 = vsel %vm1785_vm1, %v4312_v40, %v6447_v3  ;;  %v4884_v12 = vmul.f32 %v4209_v0, %v1588_v38  ;;  %v1626_v3 = vadd.f32 %v1594_v6, %v1494_v37  ;;  %v1823_v33 = vmul.f32 %v4221_v9, %v1815_v44 }
 0x1a1   : > { %v1824_v22 = vmul.f32 %v4221_v9, %v1814_v53  ;;  %v1922_v49 = vmul.f32 %v4236_v17, %v1814_v53  ;;  %v3604_v41 = vpop.eup %3603  ;;  %v1825_v31 = vmul.f32 %v4221_v9, %v1813_v24  ;;  %v4893_v52 = vmul.f32 %v4221_v9, %v1812_v51 }
 0x1a2   : > { %v1923_v58 = vmul.f32 %v4236_v17, %v1813_v24  ;;  %v3606_v27 = vpop.eup %3605  ;;  %v891_v38 = vadd.f32 1.0, %v3604_v41  ;;  %v4897_v37 = vmul.f32 %v4221_v9, %v1811_v8  ;;  %v2055_v53 = vmul.f32 %v4888_v63, %v1811_v8 }
 0x1a3   : > { %v1954_v6 = vadd.f32 %v1922_v49, %v4245_v20  ;;  %v889_v59 = vadd.f32 1.0, %v3606_v27  ;;  %v1924_v62 = vmul.f32 %v4236_v17, %v1812_v51  ;;  %v2054_v11 = vmul.f32 %v4888_v63, %v1812_v51  ;;  %v6489_v51 = vld [vmem:[#allocation29_spill] sm:$0xff] }
 0x1a4   : > { %v1955_v44 = vadd.f32 %v1923_v58, %v1823_v33  ;;  %v4904_v42 = vmul.f32 %v891_v38, %v4761_v46  ;;  %v1722_v28 = vadd.f32 %v1626_v3, %v1261_v10  ;;  %v1925_v24 = vmul.f32 %v4236_v17, %v1811_v8 }
 0x1a5   : > { %v1262_v41 = vadd.f32 %v4390_v36, %v4310_v14  ;;  %v4910_v60 = vmul.f32 %v889_v59, %v4763_v26  ;;  %v4912_v20 = vadd.f32 %v2054_v11, %v1954_v6  ;;  %v4916_v33 = vadd.f32 %v4422_v43, %v4364_v23  ;;  %v6453_v59 = vld [vmem:[#allocation19_spill] sm:$0xff] }
 0x1a6   : > { %v2087_v27 = vadd.f32 %v2055_v53, %v1955_v44  ;;  %v3608_v58 = vpop.eup %3607  ;;  %v6449_v46 = vrot.slane %v4381_v5, 7  ;;  %v6450_v10 = vrot.slane %v4357_v18, 7  ;;  %v6452_v36 = vrot.slane %v4298_v39, 7 }
 0x1a7   : > { %v1495_v23 = vadd.f32 %v4370_v15, %v4316_v56  ;;  %v1496_v43 = vadd.f32 %v1464_v2, %v1364_v45  ;;  %v6454_v26 = vand.u32 15, %v6453_v59  ;;  %v3610_v3 = vpop.eup %3609  ;;  %v4944_v49 = vmul.f32 %v4192_v50, %v4904_v42  ;;  %v6460_v59 = vld [vmem:[#allocation28_spill] sm:$0xff] }
 0x1a8   : > { %v4924_v8 = vsel %vm1324_vm0, %v6450_v10, %v6449_v46  ;;  %v6451_v14 = vmov %v6450_v10  ;;  %v4948_v39 = vmul.f32 %v4202_v57, %v4904_v42  ;;  %v4954_v56 = vmul.f32 %v4189_v47, %v4910_v60  ;;  %v4965_v46 = vld [vmem:[%s6263_s4] ss:$0 sm:$0xff] }
 0x1a9   : > { %v4932_v11 = vsel %vm1324_vm0, %v6452_v36, %v6451_v14  ;;  %vm4938_vm3 = vcmp.gt.s32.totalorder %v6454_v26, 0  ;;  %6457 = vst [vmem:[#allocation19_spill] sm:$0xff] %v4944_v49  ;;  %v892_v45 = vadd.f32 1.0, %v3608_v58  ;;  %v890_v2 = vadd.f32 1.0, %v3610_v3 }
 0x1aa   : > { %6458 = vst [vmem:[#allocation116_spill] sm:$0xff] %v4948_v39  ;;  %6459 = vst [vmem:[#allocation117_spill] sm:$0xff] %v4954_v56  ;;  %v2151_v6 = vsel %vm4849_vm2, %v2087_v27, 0.0  ;;  %v4960_v53 = vmul.f32 %v4192_v50, %v4910_v60  ;;  %v1595_v10 = vmul.f32 %v4209_v0, %v4932_v11  ;;  %v1596_v58 = vmul.f32 %v4209_v0, %v4924_v8 }
 0x1ab   : > { %v2183_v44 = vadd.f32 %v2151_v6, %v1722_v28  ;;  %v4973_v48 = vmul.f32 %v4202_v57, %v4910_v60  ;;  %v924_v14 = vmul.f32 %v892_v45, %v4815_v34  ;;  %v922_v28 = vmul.f32 %v890_v2, %v4822_v29  ;;  %v6465_v29 = vld [vmem:[#allocation20_spill] sm:$0xff] }
 0x1ac   : > { %v6461_v26 = vrot.slane %v6460_v59, 1  ;;  %v6462_v3 = vrot.slane %v4381_v5, 1  ;;  %v6464_v38 = vrot.slane %v4357_v18, 1  ;;  %v1956_v34 = vadd.f32 %v1924_v62, %v1824_v22 }
 0x1ad   : > { %v6466_v45 = vand.u32 15, %v6465_v29  ;;  %v1424_v36 = vrot.slane %v924_v14, 7  ;;  %v5001_v49 = vrot.slane %v924_v14, 1  ;;  %v2222_v18 = vadd.f32 %v4965_v46, %v2183_v44 }
 0x1ae   : > { %v4985_v6 = vsel %vm1785_vm1, %v6462_v3, %v6461_v26  ;;  %v6463_v15 = vmov %v6462_v3  ;;  %v6470_v26 = vand.u32 15, %v4171_v30  ;;  %v5011_v22 = vmul.f32 %v4192_v50, %v924_v14 }
 0x1af   : > { %v4993_v27 = vsel %vm1785_vm1, %v6464_v38, %v6463_v15  ;;  %vm4997_vm4 = vcmp.lt.s32.totalorder %v6466_v45, 15  ;;  %6469 = vst [vmem:[#allocation28_spill] sm:$0xff] %v5001_v49  ;;  %v1627_v38 = vadd.f32 %v1595_v10, %v1495_v23  ;;  %v5013_v62 = vrot.slane %v922_v28, 7 }
 0x1b0   : > { %vm5005_vm5 = vcmp.gt.s32.totalorder %v6470_v26, 0  ;;  %6473 = vst [vmem:[#allocation20_spill] sm:$0xff] %v5011_v22  ;;  %v1628_v15 = vadd.f32 %v1596_v58, %v1496_v43  ;;  %v1957_v29 = vadd.f32 %v1925_v24, %v1825_v31  ;;  %v5016_v45 = vmul.f32 %v4202_v57, %v924_v14  ;;  %v6532_v14 = vld [vmem:[#allocation30_spill] sm:$0xff] }
 0x1b1   : > { %v6475_v56 = vrot.slane %v4904_v42, 7  ;;  %v1456_v23 = vsel %vm1324_vm0, %v1424_v36, %v4294_v32  ;;  %v5031_v44 = vsel %vm1785_vm1, %v5001_v49, %v4312_v40  ;;  %v5036_v31 = vsel %vm1324_vm0, %v1424_v36, %v4198_v54 }
 0x1b2   : > { %6474 = vst [vmem:[#allocation118_spill] sm:$0xff] %v5016_v45  ;;  %6477 = vst [vmem:[#allocation120_spill] sm:$0xff] %v5031_v44  ;;  %v5039_v24 = vmul.f32 %v4189_v47, %v922_v28  ;;  %v5042_v43 = vmul.f32 %v4192_v50, %v922_v28  ;;  %v5055_v40 = vsel %vm1785_vm1, %v5001_v49, %v4211_v1  ;;  %v5057_v10 = vrot.slane %v922_v28, 1  ;;  %v6483_v50 = vld [vmem:[#allocation21_spill] sm:$0xff] }
 0x1b3   : > { %v5022_v26 = vsel %vm1324_vm0, %v6475_v56, %v1424_v36  ;;  %6478 = vst [vmem:[#allocation121_spill] sm:$0xff] %v5036_v31  ;;  %v5045_v56 = vmul.f32 %v4202_v57, %v922_v28  ;;  %6482 = vst [vmem:[#allocation125_spill] sm:$0xff] %v5055_v40  ;;  %v1356_v47 = vsel %vm1324_vm0, %v5013_v62, %v4198_v54  ;;  %v6484_v58 = vand.u32 15, %v6483_v50  ;;  %v6487_v50 = vld [vmem:[#allocation26_spill] sm:$0xff] }
 0x1b4   : > { %6476 = vst [vmem:[#allocation119_spill] sm:$0xff] %v5022_v26  ;;  %6479 = vst [vmem:[#allocation122_spill] sm:$0xff] %v5039_v24  ;;  %v5049_v32 = vmul.f32 %v4206_v61, %v5022_v26  ;;  %v1361_v36 = vmul.f32 %v4200_v55, %v1356_v47  ;;  %v2286_v57 = vmul.f32 0.70710677, %v2222_v18  ;;  %v1691_v28 = vsel %vm4938_vm3, %v1627_v38, 0.0  ;;  %v6490_v38 = vld [vmem:[#allocation42_spill] sm:$0xff] }
 0x1b5   : > { %6480 = vst [vmem:[#allocation123_spill] sm:$0xff] %v5042_v43  ;;  %vm5065_vm6 = vcmp.gt.s32.totalorder %v6484_v58, 0  ;;  %v1723_v1 = vadd.f32 %v1691_v28, %v1262_v41  ;;  %v2056_v44 = vmul.f32 %v4888_v63, %v4993_v27  ;;  %v2057_v54 = vmul.f32 %v4888_v63, %v4985_v6  ;;  %v6488_v58 = vld [vmem:[#allocation36_spill] sm:$0xff] }
 0x1b6   : > { %6481 = vst [vmem:[#allocation124_spill] sm:$0xff] %v5049_v32  ;;  %v1461_v32 = vmul.f32 %v4206_v61, %v1456_v23  ;;  %v1196_v31 = vadd.f32 %v6488_v58, %v6487_v50  ;;  %v5079_v24 = vmul.f32 0.5, %v2222_v18  ;;  %3611 = verf.f32 %v2286_v57  ;;  %v6493_v18 = vld [vmem:[#allocation35_spill] sm:$0xff]  ;;  %v6522_v50 = vld [vmem:[#allocation57_spill] sm:$0xff] }
 0x1b7   : > { %v1724_v23 = vadd.f32 %v1628_v15, %v4916_v33  ;;  %v2088_v47 = vadd.f32 %v2056_v44, %v1956_v34  ;;  %v2089_v40 = vadd.f32 %v2057_v54, %v1957_v29  ;;  %v1197_v41 = vadd.f32 %v6490_v38, %v6489_v51  ;;  %v6496_v15 = vld [vmem:[#allocation32_spill] sm:$0xff]  ;;  %v6497_v29 = vld [vmem:[#allocation22_spill] sm:$0xff]  ;;  %v6501_v38 = vld [vmem:[#allocation33_spill] sm:$0xff] }
 0x1b8   : > { %v1493_v22 = vadd.f32 %v1461_v32, %v1361_v36  ;;  %v6491_v28 = vrot.slane %v6460_v59, 7  ;;  %v6492_v49 = vrot.slane %v4381_v5, 7  ;;  %v6494_v36 = vrot.slane %v6493_v18, 7 }
 0x1b9   : > { %v1465_v33 = vmul.f32 %v4206_v61, %v4932_v11  ;;  %v1466_v5 = vmul.f32 %v4206_v61, %v4924_v8  ;;  %v2184_v34 = vadd.f32 %v2088_v47, %v1723_v1  ;;  %v6498_v44 = vand.u32 15, %v6497_v29  ;;  %v6502_v47 = vld [vmem:[#allocation44_spill] sm:$0xff] }
 0x1ba   : > { %v5090_v26 = vsel %vm1324_vm0, %v6492_v49, %v6491_v28  ;;  %v1625_v32 = vadd.f32 %v4884_v12, %v1493_v22  ;;  %v6495_v57 = vmov %v6491_v28  ;;  %v2153_v49 = vsel %vm4997_vm4, %v2089_v40, 0.0 }
 0x1bb   : > { %v5099_v54 = vsel %vm1324_vm0, %v6495_v57, %v6494_v36  ;;  %v1264_v12 = vadd.f32 %v6496_v15, %v1196_v31  ;;  %v1597_v22 = vmul.f32 %v4209_v0, %v5090_v26  ;;  %vm5112_vm7 = vcmp.lt.s32.totalorder %v6498_v44, 15 }
 0x1bc   : > { %v1689_v58 = vsel %vm5005_vm5, %v1625_v32, 0.0  ;;  %v2185_v51 = vadd.f32 %v2153_v49, %v1724_v23  ;;  %v1497_v28 = vadd.f32 %v1465_v33, %v6501_v38  ;;  %v1498_v2 = vadd.f32 %v1466_v5, %v4870_v19 }
 0x1bd   : > { %v1721_v1 = vadd.f32 %v1689_v58, %v4824_v7  ;;  %v2223_v31 = vadd.f32 %v4965_v46, %v2184_v34  ;;  %v1598_v40 = vmul.f32 %v4209_v0, %v5099_v54  ;;  %v6503_v36 = vrot.slane %v6502_v47, 1  ;;  %v6507_v58 = vld [vmem:[#allocation39_spill] sm:$0xff] }
 0x1be   : > { %v6504_v57 = vrot.slane %v6493_v18, 1  ;;  %v2224_v23 = vadd.f32 %v4965_v46, %v2185_v51  ;;  %v1629_v32 = vadd.f32 %v1597_v22, %v1497_v28  ;;  %v6506_v7 = vrot.slane %v6460_v59, 1 }
 0x1bf   : > { %v1926_v5 = vmul.f32 %v4236_v17, %v4993_v27  ;;  %v2182_v49 = vadd.f32 %v4912_v20, %v1721_v1  ;;  %v2287_v34 = vmul.f32 0.70710677, %v2223_v31  ;;  %v1630_v15 = vadd.f32 %v1598_v40, %v1498_v2 }
 0x1c0   : > { %v5130_v3 = vsel %vm1785_vm1, %v6504_v57, %v6503_v36  ;;  %v6505_v19 = vmov %v6504_v57  ;;  %v1927_v29 = vmul.f32 %v4236_v17, %v4985_v6  ;;  %v5146_v44 = vmul.f32 0.5, %v2223_v31  ;;  %v6508_v31 = vld [vmem:[#allocation23_spill] sm:$0xff] }
 0x1c1   : > { %v5139_v33 = vsel %vm1785_vm1, %v6506_v7, %v6505_v19  ;;  %v2288_v22 = vmul.f32 0.70710677, %v2224_v23  ;;  %v1265_v51 = vadd.f32 %v6507_v58, %v1197_v41  ;;  %v1693_v59 = vsel %vm5065_vm6, %v1629_v32, 0.0  ;;  %v6512_v19 = vld [vmem:[#allocation34_spill] sm:$0xff]  ;;  %v6513_v7 = vld [vmem:[#allocation31_spill] sm:$0xff]  ;;  %v6516_v58 = vld [vmem:[#allocation40_spill] sm:$0xff] }
 0x1c2   : > { %v2221_v38 = vadd.f32 %v4965_v46, %v2182_v49  ;;  %3613 = verf.f32 %v2287_v34  ;;  %v1725_v28 = vadd.f32 %v1693_v59, %v1264_v12  ;;  %v1958_v36 = vadd.f32 %v1926_v5, %v4893_v52  ;;  %v6517_v59 = vld [vmem:[#allocation38_spill] sm:$0xff] }
 0x1c3   : > { %3615 = verf.f32 %v2288_v22  ;;  %v1959_v20 = vadd.f32 %v1927_v29, %v4897_v37  ;;  %v2058_v2 = vmul.f32 %v4888_v63, %v5139_v33  ;;  %v2059_v1 = vmul.f32 %v4888_v63, %v5130_v3  ;;  %v3612_v22 = vpop.eup %3611 }
 0x1c4   : > { %v6509_v41 = vand.u32 15, %v6508_v31  ;;  %v5164_v40 = vmul.f32 0.5, %v2221_v38  ;;  %v2285_v12 = vmul.f32 0.70710677, %v2221_v38  ;;  %v5166_v57 = vmul.f32 0.5, %v2224_v23  ;;  %v6518_v38 = vld [vmem:[#allocation54_spill] sm:$0xff] }
 0x1c5   : > { %v1726_v52 = vadd.f32 %v1630_v15, %v1265_v51  ;;  %v2090_v32 = vadd.f32 %v2058_v2, %v1958_v36  ;;  %v2091_v37 = vadd.f32 %v2059_v1, %v1959_v20  ;;  %v1198_v5 = vadd.f32 %v6513_v7, %v6512_v19 }
 0x1c6   : > { %vm5160_vm8 = vcmp.gt.s32.totalorder %v6509_v41, 0  ;;  %v6514_v49 = vrot.slane %v6502_v47, 7  ;;  %v6515_v34 = vrot.slane %v6493_v18, 7  ;;  %3617 = verf.f32 %v2285_v12 }
 0x1c7   : > { %v1199_v23 = vadd.f32 %v6517_v59, %v6516_v58  ;;  %v6519_v15 = vrot.slane %v6518_v38, 7  ;;  %v1367_v18 = vmul.f32 %v4200_v55, %v4932_v11  ;;  %v2350_v20 = vadd.f32 1.0, %v3612_v22 }
 0x1c8   : > { %v5176_v29 = vsel %vm1324_vm0, %v6515_v34, %v6514_v49  ;;  %v6520_v51 = vmov %v6514_v49  ;;  %v2155_v2 = vsel %vm5112_vm7, %v2091_v37, 0.0  ;;  %v2186_v1 = vadd.f32 %v2090_v32, %v1725_v28  ;;  %v6521_v49 = vld [vmem:[#allocation50_spill] sm:$0xff] }
 0x1c9   : > { %v5186_v36 = vsel %vm1324_vm0, %v6520_v51, %v6519_v15  ;;  %v1368_v31 = vmul.f32 %v4200_v55, %v4924_v8  ;;  %v2187_v41 = vadd.f32 %v2155_v2, %v1726_v52  ;;  %v1467_v12 = vmul.f32 %v4206_v61, %v5090_v26 }
 0x1ca   : > { %v1468_v19 = vmul.f32 %v4206_v61, %v5099_v54  ;;  %v1599_v7 = vmul.f32 %v4209_v0, %v5176_v29  ;;  %v2225_v11 = vadd.f32 %v4965_v46, %v2186_v1  ;;  %v1266_v34 = vadd.f32 %v6521_v49, %v1198_v5 }
 0x1cb   : > { %v1267_v37 = vadd.f32 %v6522_v50, %v1199_v23  ;;  %v1600_v28 = vmul.f32 %v4209_v0, %v5186_v36  ;;  %v2226_v8 = vadd.f32 %v4965_v46, %v2187_v41  ;;  %v1499_v52 = vadd.f32 %v1467_v12, %v1367_v18  ;;  %v6525_v23 = vld [vmem:[#allocation41_spill] sm:$0xff] }
 0x1cc   : > { %v1500_v32 = vadd.f32 %v1468_v19, %v1368_v31  ;;  %v6523_v22 = vrot.slane %v6518_v38, 1  ;;  %v6524_v58 = vrot.slane %v6502_v47, 1  ;;  %v5215_v15 = vmul.f32 %v2350_v20, %v5079_v24 }
 0x1cd   : > { %v2289_v5 = vmul.f32 0.70710677, %v2225_v11  ;;  %v6526_v51 = vrot.slane %v6525_v23, 1  ;;  %v1828_v1 = vmul.f32 %v4221_v9, %v4993_v27  ;;  %v2290_v47 = vmul.f32 0.70710677, %v2226_v8 }
 0x1ce   : > { %v5212_v59 = vsel %vm1785_vm1, %v6524_v58, %v6523_v22  ;;  %v6527_v2 = vmov %v6523_v22  ;;  %v1631_v31 = vadd.f32 %v1599_v7, %v1499_v52  ;;  %v1632_v41 = vadd.f32 %v1600_v28, %v1500_v32 }
 0x1cf   : > { %v5223_v18 = vsel %vm1785_vm1, %v6527_v2, %v6526_v51  ;;  %v1829_v12 = vmul.f32 %v4221_v9, %v4985_v6  ;;  %3619 = verf.f32 %v2289_v5  ;;  %v1928_v24 = vmul.f32 %v4236_v17, %v5139_v33  ;;  %v3614_v6 = vpop.eup %3613  ;;  %v6528_v5 = vld [vmem:[#allocation24_spill] sm:$0xff] }
 0x1d0   : > { %v1929_v20 = vmul.f32 %v4236_v17, %v5130_v3  ;;  %v2060_v19 = vmul.f32 %v4888_v63, %v5212_v59  ;;  %v5235_v49 = vmul.f32 0.5, %v2225_v11  ;;  %3621 = verf.f32 %v2290_v47  ;;  %v3616_v22 = vpop.eup %3615  ;;  %v6533_v47 = vld [vmem:[#allocation48_spill] sm:$0xff] }
 0x1d1   : > { %v1695_v27 = vsel %vm5160_vm8, %v1631_v31, 0.0  ;;  %v2061_v7 = vmul.f32 %v4888_v63, %v5223_v18  ;;  %v1728_v28 = vadd.f32 %v1632_v41, %v1267_v37  ;;  %v1960_v52 = vadd.f32 %v1928_v24, %v1828_v1 }
 0x1d2   : > { %v1727_v50 = vadd.f32 %v1695_v27, %v1266_v34  ;;  %v1961_v32 = vadd.f32 %v1929_v20, %v1829_v12  ;;  %v2351_v58 = vadd.f32 1.0, %v3614_v6  ;;  %v6529_v51 = vand.u32 15, %v6528_v5  ;;  %v6534_v34 = vld [vmem:[#allocation49_spill] sm:$0xff]  ;;  %v6538_v6 = vld [vmem:[#allocation56_spill] sm:$0xff] }
 0x1d3   : > { %v935_v11 = vadd.s32 72, %v4171_v30  ;;  %v1200_v31 = vadd.f32 %v6533_v47, %v6532_v14  ;;  %v2352_v45 = vadd.f32 1.0, %v3616_v22  ;;  %v2092_v39 = vadd.f32 %v2060_v19, %v1960_v52  ;;  %v6537_v27 = vld [vmem:[#allocation37_spill] sm:$0xff]  ;;  %v6539_v52 = vld [vmem:[#allocation46_spill] sm:$0xff] }
 0x1d4   : > { %vm5243_vm9 = vcmp.lt.s32.totalorder %v6529_v51, 15  ;;  %v2093_v43 = vadd.f32 %v2061_v7, %v1961_v32  ;;  %v6535_v37 = vrot.slane %v6534_v34, 7  ;;  %v6536_v1 = vrot.slane %v6525_v23, 7  ;;  %v3618_v51 = vpop.eup %3617 }
 0x1d5   : > { %v2383_v12 = vmul.f32 %v2351_v58, %v5146_v44  ;;  %v2258_v24 = vmul.f32 0.5, %v2226_v8  ;;  %v967_v20 = vand.u32 15, %v935_v11  ;;  %v1201_v5 = vadd.f32 %v6538_v6, %v6537_v27 }
 0x1d6   : > { %v5256_v41 = vsel %vm1324_vm0, %v6536_v1, %v6535_v37  ;;  %v2157_v19 = vsel %vm5243_vm9, %v2093_v43, 0.0  ;;  %v2188_v7 = vadd.f32 %v2092_v39, %v1727_v50  ;;  %v1268_v32 = vadd.f32 %v6539_v52, %v1200_v31 }
 0x1d7   : > { %v6540_v22 = vmov %v6536_v1  ;;  %v6541_v14 = vrot.slane %v6518_v38, 7  ;;  %v2349_v44 = vadd.f32 1.0, %v3618_v51  ;;  %v2384_v8 = vmul.f32 %v2352_v45, %v5166_v57  ;;  %v6542_v45 = vld [vmem:[#allocation53_spill] sm:$0xff] }
 0x1d8   : > { %v2189_v58 = vadd.f32 %v2157_v19, %v1728_v28  ;;  %v1369_v11 = vmul.f32 %v4200_v55, %v5090_v26  ;;  %v2227_v43 = vadd.f32 %v4965_v46, %v2188_v7  ;;  %v1370_v39 = vmul.f32 %v4200_v55, %v5099_v54  ;;  %v6543_v19 = vld [vmem:[#allocation25_spill] sm:$0xff] }
 0x1d9   : > { %v5270_v47 = vsel %vm1324_vm0, %v6541_v14, %v6540_v22  ;;  %v1469_v50 = vmul.f32 %v4206_v61, %v5176_v29  ;;  %v1470_v38 = vmul.f32 %v4206_v61, %v5186_v36  ;;  %v2381_v2 = vmul.f32 %v2349_v44, %v5164_v40 }
 0x1da   : > { %v2228_v31 = vadd.f32 %v4965_v46, %v2189_v58  ;;  %v1269_v57 = vadd.f32 %v6542_v45, %v1201_v5  ;;  %v1601_v26 = vmul.f32 %v4209_v0, %v5270_v47  ;;  %v2291_v28 = vmul.f32 0.70710677, %v2227_v43 }
 0x1db   : > { %v1501_v37 = vadd.f32 %v1469_v50, %v1369_v11  ;;  %v1502_v1 = vadd.f32 %v1470_v38, %v1370_v39  ;;  %v1602_v54 = vmul.f32 %v4209_v0, %v5256_v41  ;;  %v2413_v27 = vpack.c.bf16 %v5215_v15, %v2381_v2 }
 0x1dc   : > { %v2414_v6 = vpack.c.bf16 %v2384_v8, %v2383_v12  ;;  %v2292_v51 = vmul.f32 0.70710677, %v2228_v31  ;;  %v6544_v7 = vand.u32 15, %v6543_v19  ;;  %3623 = verf.f32 %v2291_v28  ;;  %v3620_v15 = vpop.eup %3619  ;;  %v6553_v19 = vld [vmem:[#allocation47_spill] sm:$0xff] }
 0x1dd   : > { %v1633_v5 = vadd.f32 %v1601_v26, %v1501_v37  ;;  %v1634_v52 = vadd.f32 %v1602_v54, %v1502_v1  ;;  %v6547_v22 = vrot.slane %v4524_v16, 1  ;;  %v6548_v14 = vrot.slane %v6534_v34, 1  ;;  %3383 = vmatprep.mubr.bf16.mxu1 %v2413_v27  ;;  %v3622_v50 = vpop.eup %3621 }
 0x1de   : > { %vm5292_vm10 = vcmp.gt.s32.totalorder %v6544_v7, 0  ;;  %v5304_v12 = vmul.f32 0.5, %v2227_v43  ;;  %3625 = verf.f32 %v2292_v51  ;;  %v6550_v58 = vrot.slane %v6525_v23, 1  ;;  %3384 = vmatmul.mubr.bf16.vlgmr.msra.gmra.mxu1 %v2414_v6  ;;  %v6554_v7 = vld [vmem:[#allocation45_spill] sm:$0xff]  ;;  %v6562_v51 = vld [vmem:[#allocation58_spill] sm:$0xff] }
 0x1df   : > { %v5302_v44 = vsel %vm1785_vm1, %v6548_v14, %v6547_v22  ;;  %v6549_v8 = vmov %v6548_v14  ;;  %v1830_v39 = vmul.f32 %v4221_v9, %v5139_v33  ;;  %v2353_v38 = vadd.f32 1.0, %v3620_v15 }
 0x1e0   : > { %v5312_v11 = vsel %vm1785_vm1, %v6550_v58, %v6549_v8  ;;  %v1697_v2 = vsel %vm5292_vm10, %v1633_v5, 0.0  ;;  %v1730_v43 = vadd.f32 %v1634_v52, %v1269_v57  ;;  %v1930_v45 = vmul.f32 %v4236_v17, %v5212_v59  ;;  %v6556_v5 = vld [vmem:[#allocation52_spill] sm:$0xff] }
 0x1e1   : > { %v2354_v26 = vadd.f32 1.0, %v3622_v50  ;;  %v1729_v28 = vadd.f32 %v1697_v2, %v1268_v32  ;;  %v1831_v23 = vmul.f32 %v4221_v9, %v5130_v3  ;;  %v1931_v37 = vmul.f32 %v4236_v17, %v5223_v18  ;;  %v6559_v50 = vld [vmem:[#allocation64_spill] sm:$0xff] }
 0x1e2   : > { %v2385_v33 = vmul.f32 %v2353_v38, %v5235_v49  ;;  %v1962_v1 = vadd.f32 %v1930_v45, %v1830_v39  ;;  %v2062_v54 = vmul.f32 %v4888_v63, %v5312_v11  ;;  %v2063_v57 = vmul.f32 %v4888_v63, %v5302_v44  ;;  %v6555_v49 = vld [vmem:[#allocation55_spill] sm:$0xff] }
 0x1e3   : > { %v2386_v27 = vmul.f32 %v2354_v26, %v2258_v24  ;;  %v1963_v6 = vadd.f32 %v1931_v37, %v1831_v23  ;;  %vm5329_vm11 = vcmp.lt.s32.totalorder %v967_v20, 15  ;;  %v936_v3 = vadd.s32 80, %v4171_v30 }
 0x1e4   : > { %v2094_v32 = vadd.f32 %v2062_v54, %v1962_v1  ;;  %v1202_v40 = vadd.f32 %v6554_v7, %v6553_v19  ;;  %v1203_v52 = vadd.f32 %v6556_v5, %v6555_v49  ;;  %v6557_v22 = vrot.slane %v4566_v4, 7 }
 0x1e5   : > { %v6558_v14 = vrot.slane %v4524_v16, 7  ;;  %v2415_v20 = vpack.c.bf16 %v2386_v27, %v2385_v33  ;;  %v2095_v15 = vadd.f32 %v2063_v57, %v1963_v6  ;;  %v937_v8 = vadd.s32 88, %v4171_v30 }
 0x1e6   : > { %v968_v58 = vand.u32 15, %v936_v3  ;;  %v2190_v39 = vadd.f32 %v2094_v32, %v1729_v28  ;;  %v1270_v38 = vadd.f32 %v6559_v50, %v1202_v40  ;;  %v1271_v2 = vadd.f32 %v4603_v35, %v1203_v52 }
 0x1e7   : > { %v5344_v24 = vsel %vm1324_vm0, %v6558_v14, %v6557_v22  ;;  %v6560_v45 = vmov %v6558_v14  ;;  %v6561_v26 = vrot.slane %v6534_v34, 7  ;;  %3387 = vmatprep.mubr.bf16.mxu1 %v2415_v20  ;;  %v2159_v37 = vsel %vm5329_vm11, %v2095_v15, 0.0 }
 0x1e8   : > { %v1371_v33 = vmul.f32 %v4200_v55, %v5176_v29  ;;  %v1372_v28 = vmul.f32 %v4200_v55, %v5186_v36  ;;  %v1471_v35 = vmul.f32 %v4206_v61, %v5270_v47  ;;  %v2260_v1 = vmul.f32 0.5, %v2228_v31 }
 0x1e9   : > { %v5355_v23 = vsel %vm1324_vm0, %v6561_v26, %v6560_v45  ;;  %v2191_v54 = vadd.f32 %v2159_v37, %v1730_v43  ;;  %v2229_v34 = vadd.f32 %v4965_v46, %v2190_v39  ;;  %v1472_v27 = vmul.f32 %v4206_v61, %v5256_v41  ;;  %v3624_v40 = vpop.eup %3623 }
 0x1ea   : > { %v1603_v57 = vmul.f32 %v4209_v0, %v5355_v23  ;;  %v1503_v6 = vadd.f32 %v1471_v35, %v1371_v33  ;;  %v1604_v29 = vmul.f32 %v4209_v0, %v5344_v24  ;;  %v6563_v3 = vrot.slane %v6562_v51, 1 }
 0x1eb   : > { %v6564_v36 = vrot.slane %v4566_v4, 1  ;;  %v2230_v43 = vadd.f32 %v4965_v46, %v2191_v54  ;;  %v2293_v32 = vmul.f32 0.70710677, %v2229_v34  ;;  %v969_v19 = vand.u32 15, %v937_v8  ;;  %v3626_v15 = vpop.eup %3625 }
 0x1ec   : > { %vm5381_vm12 = vcmp.gt.s32.totalorder %v968_v58, 0  ;;  %v1504_v49 = vadd.f32 %v1472_v27, %v1372_v28  ;;  %v1635_v5 = vadd.f32 %v1603_v57, %v1503_v6  ;;  %v6568_v22 = vrot.slane %v4524_v16, 1 }
 0x1ed   : > { %v5378_v31 = vsel %vm1785_vm1, %v6564_v36, %v6563_v3  ;;  %v6567_v52 = vmov %v6564_v36  ;;  %v1832_v20 = vmul.f32 %v4221_v9, %v5212_v59  ;;  %v2355_v8 = vadd.f32 1.0, %v3624_v40  ;;  %v6570_v36 = vld [vmem:[#allocation63_spill] sm:$0xff] }
 0x1ee   : > { %v5391_v14 = vsel %vm1785_vm1, %v6568_v22, %v6567_v52  ;;  %v2294_v58 = vmul.f32 0.70710677, %v2230_v43  ;;  %3627 = verf.f32 %v2293_v32  ;;  %v1833_v39 = vmul.f32 %v4221_v9, %v5223_v18  ;;  %v6572_v40 = vld [vmem:[#allocation71_spill] sm:$0xff] }
 0x1ef   : > { %v2356_v50 = vadd.f32 1.0, %v3626_v15  ;;  %v1636_v45 = vadd.f32 %v1604_v29, %v1504_v49  ;;  %v1699_v26 = vsel %vm5381_vm12, %v1635_v5, 0.0  ;;  %v1932_v16 = vmul.f32 %v4236_v17, %v5312_v11  ;;  %v6573_v5 = vld [vmem:[#allocation65_spill] sm:$0xff] }
 0x1f0   : > { %v2387_v37 = vmul.f32 %v2355_v8, %v5304_v12  ;;  %3629 = verf.f32 %v2294_v58  ;;  %v1731_v33 = vadd.f32 %v1699_v26, %v1270_v38  ;;  %v1933_v59 = vmul.f32 %v4236_v17, %v5302_v44  ;;  %v6569_v38 = vld [vmem:[#allocation43_spill] sm:$0xff]  ;;  %v6576_v15 = vld [vmem:[#allocation61_spill] sm:$0xff] }
 0x1f1   : > { %v2388_v28 = vmul.f32 %v2356_v50, %v2260_v1  ;;  %v1732_v35 = vadd.f32 %v1636_v45, %v1271_v2  ;;  %v1964_v54 = vadd.f32 %v1932_v16, %v1832_v20  ;;  %v2064_v18 = vmul.f32 %v4888_v63, %v5391_v14  ;;  %v6571_v1 = vld [vmem:[#allocation51_spill] sm:$0xff]  ;;  %v6579_v16 = vld [vmem:[#allocation68_spill] sm:$0xff] }
 0x1f2   : > { %v2261_v57 = vmul.f32 0.5, %v2229_v34  ;;  %v1965_v27 = vadd.f32 %v1933_v59, %v1833_v39  ;;  %v2065_v6 = vmul.f32 %v4888_v63, %v5378_v31  ;;  %v938_v29 = vadd.s32 96, %v4171_v30 }
 0x1f3   : > { %v2416_v3 = vpack.c.bf16 %v2388_v28, %v2387_v37  ;;  %v2096_v12 = vadd.f32 %v2064_v18, %v1964_v54  ;;  %vm2129_vm13 = vcmp.lt.s32.totalorder %v969_v19, 15  ;;  %v1204_v32 = vadd.f32 %v6570_v36, %v6569_v38 }
 0x1f4   : > { %v2097_v7 = vadd.f32 %v2065_v6, %v1965_v27  ;;  %v939_v2 = vadd.s32 104, %v4171_v30  ;;  %v1205_v49 = vadd.f32 %v6572_v40, %v6571_v1  ;;  %v6574_v34 = vrot.slane %v6573_v5, 7 }
 0x1f5   : > { %v6575_v52 = vrot.slane %v6562_v51, 7  ;;  %3388 = vmatmul.mubr.bf16.gmra.mxu1 %v2416_v3  ;;  %v2262_v20 = vmul.f32 0.5, %v2230_v43  ;;  %v2192_v19 = vadd.f32 %v2096_v12, %v1731_v33  ;;  %v1272_v8 = vadd.f32 %v6576_v15, %v1204_v32 }
 0x1f6   : > { %v6578_v39 = vrot.slane %v4566_v4, 7  ;;  %v2161_v45 = vsel %vm2129_vm13, %v2097_v7, 0.0  ;;  %v970_v26 = vand.u32 15, %v938_v29  ;;  %v1273_v37 = vadd.f32 %v6579_v16, %v1205_v49 }
 0x1f7   : > { %v5420_v22 = vsel %vm1324_vm0, %v6575_v52, %v6574_v34  ;;  %v6577_v58 = vmov %v6575_v52  ;;  %v1373_v59 = vmul.f32 %v4200_v55, %v5270_v47  ;;  %v2193_v28 = vadd.f32 %v2161_v45, %v1732_v35 }
 0x1f8   : > { %v5429_v50 = vsel %vm1324_vm0, %v6578_v39, %v6577_v58  ;;  %v2231_v43 = vadd.f32 %v4965_v46, %v2192_v19  ;;  %v1473_v33 = vmul.f32 %v4206_v61, %v5355_v23  ;;  %v1474_v4 = vmul.f32 %v4206_v61, %v5344_v24 }
 0x1f9   : > { %v971_v54 = vand.u32 15, %v939_v2  ;;  %v1374_v18 = vmul.f32 %v4200_v55, %v5256_v41  ;;  %v1605_v27 = vmul.f32 %v4209_v0, %v5429_v50  ;;  %v6580_v6 = vrot.slane %v4595_v21, 1 }
 0x1fa   : > { %v6581_v47 = vrot.slane %v6573_v5, 1  ;;  %v2232_v29 = vadd.f32 %v4965_v46, %v2193_v28  ;;  %v2295_v3 = vmul.f32 0.70710677, %v2231_v43  ;;  %v1505_v12 = vadd.f32 %v1473_v33, %v1373_v59 }
 0x1fb   : > { %v1606_v38 = vmul.f32 %v4209_v0, %v5420_v22  ;;  %v5454_v36 = vmul.f32 0.5, %v2231_v43  ;;  %v1506_v41 = vadd.f32 %v1474_v4, %v1374_v18  ;;  %vm5456_vm14 = vcmp.gt.s32.totalorder %v970_v26, 0  ;;  %v3628_v40 = vpop.eup %3627 }
 0x1fc   : > { %v5449_v35 = vsel %vm1785_vm1, %v6581_v47, %v6580_v6  ;;  %v6584_v7 = vmov %v6581_v47  ;;  %v6585_v2 = vrot.slane %v6562_v51, 1  ;;  %v2296_v49 = vmul.f32 0.70710677, %v2232_v29 }
 0x1fd   : > { %3631 = verf.f32 %v2295_v3  ;;  %v1637_v34 = vadd.f32 %v1605_v27, %v1505_v12  ;;  %v1834_v52 = vmul.f32 %v4221_v9, %v5312_v11  ;;  %v2357_v19 = vadd.f32 1.0, %v3628_v40  ;;  %v3630_v51 = vpop.eup %3629  ;;  %v6589_v3 = vld [vmem:[#allocation60_spill] sm:$0xff] }
 0x1fe   : > { %v5466_v1 = vsel %vm1785_vm1, %v6585_v2, %v6584_v7  ;;  %v1638_v15 = vadd.f32 %v1606_v38, %v1506_v41  ;;  %v1934_v58 = vmul.f32 %v4236_v17, %v5391_v14  ;;  %v1935_v39 = vmul.f32 %v4236_v17, %v5378_v31  ;;  %v6590_v38 = vld [vmem:[#allocation69_spill] sm:$0xff]  ;;  %v6591_v41 = vld [vmem:[#allocation67_spill] sm:$0xff] }
 0x1ff   : > { %3633 = verf.f32 %v2296_v49  ;;  %v1701_v45 = vsel %vm5456_vm14, %v1637_v34, 0.0  ;;  %v1835_v26 = vmul.f32 %v4221_v9, %v5302_v44  ;;  %v2067_v16 = vmul.f32 %v4888_v63, %v5449_v35  ;;  %v6588_v44 = vld [vmem:[#allocation62_spill] sm:$0xff] }
 0x200   : > { %v2358_v11 = vadd.f32 1.0, %v3630_v51  ;;  %v1733_v59 = vadd.f32 %v1701_v45, %v1272_v8  ;;  %v1734_v28 = vadd.f32 %v1638_v15, %v1273_v37  ;;  %v2066_v43 = vmul.f32 %v4888_v63, %v5466_v1  ;;  %v6594_v34 = vld [vmem:[#allocation86_spill] sm:$0xff] }
 0x201   : > { %v2389_v33 = vmul.f32 %v2357_v19, %v2261_v57  ;;  %v1966_v4 = vadd.f32 %v1934_v58, %v1834_v52  ;;  %v1967_v18 = vadd.f32 %v1935_v39, %v1835_v26  ;;  %v940_v27 = vadd.s32 112, %v4171_v30 }
 0x202   : > { %v2390_v6 = vmul.f32 %v2358_v11, %v2262_v20  ;;  %vm5483_vm15 = vcmp.lt.s32.totalorder %v971_v54, 15  ;;  %v1206_v12 = vadd.f32 %v6589_v3, %v6588_v44  ;;  %v1207_v8 = vadd.f32 %v6591_v41, %v6590_v38 }
 0x203   : > { %v2098_v37 = vadd.f32 %v2066_v43, %v1966_v4  ;;  %v2099_v32 = vadd.f32 %v2067_v16, %v1967_v18  ;;  %v941_v7 = vadd.s32 120, %v4171_v30  ;;  %v6592_v57 = vrot.slane %v4631_v25, 7 }
 0x204   : > { %v6593_v2 = vrot.slane %v4595_v21, 7  ;;  %v2417_v54 = vpack.c.bf16 %v2390_v6, %v2389_v33  ;;  %v972_v40 = vand.u32 15, %v940_v27  ;;  %v1274_v49 = vadd.f32 %v4639_v13, %v1206_v12 }
 0x205   : > { %v1275_v52 = vadd.f32 %v6594_v34, %v1207_v8  ;;  %v2163_v19 = vsel %vm5483_vm15, %v2099_v32, 0.0  ;;  %v2194_v15 = vadd.f32 %v2098_v37, %v1733_v59  ;;  %v6596_v39 = vrot.slane %v6573_v5, 7 }
 0x206   : > { %v5498_v20 = vsel %vm1324_vm0, %v6593_v2, %v6592_v57  ;;  %v6595_v58 = vmov %v6593_v2  ;;  %v1375_v45 = vmul.f32 %v4200_v55, %v5355_v23  ;;  %3391 = vmatprep.mubr.bf16.mxu1 %v2417_v54  ;;  %v2195_v26 = vadd.f32 %v2163_v19, %v1734_v28 }
 0x207   : > { %v5510_v51 = vsel %vm1324_vm0, %v6596_v39, %v6595_v58  ;;  %v1376_v13 = vmul.f32 %v4200_v55, %v5344_v24  ;;  %v1475_v16 = vmul.f32 %v4206_v61, %v5429_v50  ;;  %v1476_v11 = vmul.f32 %v4206_v61, %v5420_v22  ;;  %v6597_v24 = vld [vmem:[#allocation70_spill] sm:$0xff] }
 0x208   : > { %v2264_v59 = vmul.f32 0.5, %v2232_v29  ;;  %v2233_v5 = vadd.f32 %v4965_v46, %v2194_v15  ;;  %v1607_v43 = vmul.f32 %v4209_v0, %v5510_v51  ;;  %v1608_v23 = vmul.f32 %v4209_v0, %v5498_v20 }
 0x209   : > { %v2234_v28 = vadd.f32 %v4965_v46, %v2195_v26  ;;  %v1507_v33 = vadd.f32 %v1475_v16, %v1375_v45  ;;  %v1508_v4 = vadd.f32 %v1476_v11, %v1376_v13  ;;  %v6598_v18 = vrot.slane %v6597_v24, 1 }
 0x20a   : > { %v6599_v27 = vrot.slane %v4631_v25, 1  ;;  %v2297_v29 = vmul.f32 0.70710677, %v2233_v5  ;;  %vm5534_vm2 = vcmp.gt.s32.totalorder %v972_v40, 0  ;;  %v6603_v3 = vrot.slane %v4595_v21, 1  ;;  %v3632_v41 = vpop.eup %3631 }
 0x20b   : > { %v1836_v38 = vmul.f32 %v4221_v9, %v5391_v14  ;;  %v2298_v8 = vmul.f32 0.70710677, %v2234_v28  ;;  %v973_v37 = vand.u32 15, %v941_v7  ;;  %v1639_v32 = vadd.f32 %v1607_v43, %v1507_v33  ;;  %v6606_v43 = vld [vmem:[#allocation59_spill] sm:$0xff] }
 0x20c   : > { %v5532_v6 = vsel %vm1785_vm1, %v6599_v27, %v6598_v18  ;;  %v6602_v44 = vmov %v6599_v27  ;;  %v1640_v57 = vadd.f32 %v1608_v23, %v1508_v4  ;;  %v2359_v2 = vadd.f32 1.0, %v3632_v41  ;;  %v3634_v40 = vpop.eup %3633  ;;  %v6609_v4 = vld [vmem:[#allocation84_spill] sm:$0xff]  ;;  %v6613_v41 = vld [vmem:[#allocation74_spill] sm:$0xff] }
 0x20d   : > { %v5544_v12 = vsel %vm1785_vm1, %v6603_v3, %v6602_v44  ;;  %3635 = verf.f32 %v2297_v29  ;;  %v1837_v54 = vmul.f32 %v4221_v9, %v5378_v31  ;;  %v1936_v21 = vmul.f32 %v4236_v17, %v5466_v1  ;;  %v6610_v27 = vld [vmem:[#allocation76_spill] sm:$0xff] }
 0x20e   : > { %3637 = verf.f32 %v2298_v8  ;;  %v1703_v34 = vsel %vm5534_vm2, %v1639_v32, 0.0  ;;  %v1736_v19 = vadd.f32 %v1640_v57, %v1275_v52  ;;  %v1937_v14 = vmul.f32 %v4236_v17, %v5449_v35  ;;  %v6614_v57 = vld [vmem:[#allocation80_spill] sm:$0xff] }
 0x20f   : > { %v2360_v7 = vadd.f32 1.0, %v3634_v40  ;;  %v2265_v15 = vmul.f32 0.5, %v2233_v5  ;;  %v1735_v58 = vadd.f32 %v1703_v34, %v1274_v49  ;;  %v1968_v39 = vadd.f32 %v1936_v21, %v1836_v38  ;;  %v6607_v5 = vld [vmem:[#allocation77_spill] sm:$0xff] }
 0x210   : > { %v2391_v45 = vmul.f32 %v2359_v2, %v5454_v36  ;;  %v1969_v26 = vadd.f32 %v1937_v14, %v1837_v54  ;;  %v2068_v31 = vmul.f32 %v4888_v63, %v5544_v12  ;;  %v2069_v13 = vmul.f32 %v4888_v63, %v5532_v6  ;;  %v6608_v36 = vld [vmem:[#allocation66_spill] sm:$0xff] }
 0x211   : > { %v2392_v16 = vmul.f32 %v2360_v7, %v2264_v59  ;;  %vm5561_vm3 = vcmp.lt.s32.totalorder %v973_v37, 15  ;;  %v942_v52 = vadd.s32 128, %v4171_v30  ;;  %v1208_v49 = vadd.f32 %v6607_v5, %v6606_v43 }
 0x212   : > { %v2100_v23 = vadd.f32 %v2068_v31, %v1968_v39  ;;  %v2101_v33 = vadd.f32 %v2069_v13, %v1969_v26  ;;  %v1209_v18 = vadd.f32 %v6609_v4, %v6608_v36  ;;  %v6611_v29 = vrot.slane %v6610_v27, 7  ;;  %v6617_v31 = vld [vmem:[#allocation83_spill] sm:$0xff] }
 0x213   : > { %v6612_v47 = vrot.slane %v6597_v24, 7  ;;  %v2418_v44 = vpack.c.bf16 %v2392_v16, %v2391_v45  ;;  %v2266_v3 = vmul.f32 0.5, %v2234_v28  ;;  %v974_v38 = vand.u32 15, %v942_v52 }
 0x214   : > { %v1276_v8 = vadd.f32 %v6613_v41, %v1208_v49  ;;  %v2165_v37 = vsel %vm5561_vm3, %v2101_v33, 0.0  ;;  %v2196_v32 = vadd.f32 %v2100_v23, %v1735_v58  ;;  %v1277_v2 = vadd.f32 %v6614_v57, %v1209_v18 }
 0x215   : > { %v5576_v59 = vsel %vm1324_vm0, %v6612_v47, %v6611_v29  ;;  %v6615_v54 = vmov %v6612_v47  ;;  %v6616_v21 = vrot.slane %v4631_v25, 7  ;;  %3392 = vmatmul.mubr.bf16.gmra.mxu1 %v2418_v44  ;;  %v2197_v34 = vadd.f32 %v2165_v37, %v1736_v19 }
 0x216   : > { %v943_v28 = vadd.s32 136, %v4171_v30  ;;  %v1377_v14 = vmul.f32 %v4200_v55, %v5429_v50  ;;  %v1477_v7 = vmul.f32 %v4206_v61, %v5510_v51  ;;  %v2235_v58 = vadd.f32 %v4965_v46, %v2196_v32 }
 0x217   : > { %v5588_v40 = vsel %vm1324_vm0, %v6616_v21, %v6615_v54  ;;  %v1378_v39 = vmul.f32 %v4200_v55, %v5420_v22  ;;  %v1478_v25 = vmul.f32 %v4206_v61, %v5498_v20  ;;  %v2236_v19 = vadd.f32 %v4965_v46, %v2197_v34 }
 0x218   : > { %v1609_v45 = vmul.f32 %v4209_v0, %v5588_v40  ;;  %v1509_v26 = vadd.f32 %v1477_v7, %v1377_v14  ;;  %v1610_v50 = vmul.f32 %v4209_v0, %v5576_v59  ;;  %v6618_v13 = vrot.slane %v6617_v31, 1 }
 0x219   : > { %v6619_v16 = vrot.slane %v6610_v27, 1  ;;  %v2299_v22 = vmul.f32 0.70710677, %v2235_v58  ;;  %v1510_v52 = vadd.f32 %v1478_v25, %v1378_v39  ;;  %vm5613_vm4 = vcmp.gt.s32.totalorder %v974_v38, 0 }
 0x21a   : > { %v6623_v49 = vrot.slane %v6597_v24, 1  ;;  %v2300_v33 = vmul.f32 0.70710677, %v2236_v19  ;;  %v975_v36 = vand.u32 15, %v943_v28  ;;  %v1641_v4 = vadd.f32 %v1609_v45, %v1509_v26  ;;  %v3636_v29 = vpop.eup %3635 }
 0x21b   : > { %v5611_v11 = vsel %vm1785_vm1, %v6619_v16, %v6618_v13  ;;  %v6622_v5 = vmov %v6619_v16  ;;  %v1838_v18 = vmul.f32 %v4221_v9, %v5466_v1  ;;  %3639 = verf.f32 %v2299_v22  ;;  %v3638_v24 = vpop.eup %3637  ;;  %v6625_v13 = vld [vmem:[#allocation73_spill] sm:$0xff]  ;;  %v6627_v16 = vld [vmem:[#allocation79_spill] sm:$0xff] }
 0x21c   : > { %v5623_v23 = vsel %vm1785_vm1, %v6623_v49, %v6622_v5  ;;  %v1642_v47 = vadd.f32 %v1610_v50, %v1510_v52  ;;  %v1839_v44 = vmul.f32 %v4221_v9, %v5449_v35  ;;  %v1938_v38 = vmul.f32 %v4236_v17, %v5544_v12  ;;  %v6624_v50 = vld [vmem:[#allocation75_spill] sm:$0xff]  ;;  %v6628_v5 = vld [vmem:[#allocation94_spill] sm:$0xff] }
 0x21d   : > { %v2361_v41 = vadd.f32 1.0, %v3636_v29  ;;  %3641 = verf.f32 %v2300_v33  ;;  %v1705_v37 = vsel %vm5613_vm4, %v1641_v4, 0.0  ;;  %v1939_v32 = vmul.f32 %v4236_v17, %v5532_v6 }
 0x21e   : > { %v2362_v57 = vadd.f32 1.0, %v3638_v24  ;;  %v1737_v1 = vadd.f32 %v1705_v37, %v1276_v8  ;;  %v1738_v54 = vadd.f32 %v1642_v47, %v1277_v2  ;;  %v1970_v21 = vadd.f32 %v1938_v38, %v1838_v18  ;;  %v6626_v2 = vld [vmem:[#allocation81_spill] sm:$0xff]  ;;  %v6632_v18 = vld [vmem:[#allocation100_spill] sm:$0xff] }
 0x21f   : > { %v2267_v34 = vmul.f32 0.5, %v2235_v58  ;;  %v1971_v28 = vadd.f32 %v1939_v32, %v1839_v44  ;;  %v2070_v35 = vmul.f32 %v4888_v63, %v5623_v23  ;;  %v2071_v14 = vmul.f32 %v4888_v63, %v5611_v11 }
 0x220   : > { %v2393_v7 = vmul.f32 %v2361_v41, %v2265_v15  ;;  %v2394_v39 = vmul.f32 %v2362_v57, %v2266_v3  ;;  %vm2135_vm5 = vcmp.lt.s32.totalorder %v975_v36, 15  ;;  %v944_v25 = vadd.s32 144, %v4171_v30  ;;  %v6631_v36 = vld [vmem:[#allocation92_spill] sm:$0xff] }
 0x221   : > { %v2102_v45 = vadd.f32 %v2070_v35, %v1970_v21  ;;  %v2103_v26 = vadd.f32 %v2071_v14, %v1971_v28  ;;  %v1210_v8 = vadd.f32 %v6625_v13, %v6624_v50  ;;  %v1211_v58 = vadd.f32 %v6627_v16, %v6626_v2  ;;  %v6635_v28 = vld [vmem:[#allocation82_spill] sm:$0xff] }
 0x222   : > { %v2419_v22 = vpack.c.bf16 %v2394_v39, %v2393_v7  ;;  %v945_v52 = vadd.s32 152, %v4171_v30  ;;  %v976_v43 = vand.u32 15, %v944_v25  ;;  %v6629_v49 = vrot.slane %v6628_v5, 7 }
 0x223   : > { %v6630_v63 = vrot.slane %v6617_v31, 7  ;;  %v2167_v3 = vsel %vm2135_vm5, %v2103_v26, 0.0  ;;  %v2198_v33 = vadd.f32 %v2102_v45, %v1737_v1  ;;  %v1278_v4 = vadd.f32 %v6631_v36, %v1210_v8  ;;  %v5707_v36 = vld [vmem:[#allocation7 + $0x8] ss:$0 sm:$0xff] }
 0x224   : > { %v1279_v29 = vadd.f32 %v6632_v18, %v1211_v58  ;;  %3395 = vmatprep.mubr.bf16.mxu1 %v2419_v22  ;;  %v2199_v47 = vadd.f32 %v2167_v3, %v1738_v54  ;;  %v6634_v38 = vrot.slane %v6610_v27, 7  ;;  %v1379_v41 = vmul.f32 %v4200_v55, %v5510_v51 }
 0x225   : > { %v5651_v15 = vsel %vm1324_vm0, %v6630_v63, %v6629_v49  ;;  %v6633_v44 = vmov %v6630_v63  ;;  %v1380_v37 = vmul.f32 %v4200_v55, %v5498_v20  ;;  %v2237_v32 = vadd.f32 %v4965_v46, %v2198_v33 }
 0x226   : > { %v5661_v24 = vsel %vm1324_vm0, %v6634_v38, %v6633_v44  ;;  %v1479_v57 = vmul.f32 %v4206_v61, %v5588_v40  ;;  %v1480_v1 = vmul.f32 %v4206_v61, %v5576_v59  ;;  %v2268_v54 = vmul.f32 0.5, %v2236_v19 }
 0x227   : > { %v1611_v27 = vmul.f32 %v4209_v0, %v5661_v24  ;;  %v2238_v21 = vadd.f32 %v4965_v46, %v2199_v47  ;;  %v1612_v51 = vmul.f32 %v4209_v0, %v5651_v15  ;;  %v6636_v35 = vrot.slane %v6635_v28, 1 }
 0x228   : > { %v6637_v20 = vrot.slane %v6628_v5, 1  ;;  %v2301_v7 = vmul.f32 0.70710677, %v2237_v32  ;;  %v977_v39 = vand.u32 15, %v945_v52  ;;  %v1511_v25 = vadd.f32 %v1479_v57, %v1379_v41  ;;  %v3640_v16 = vpop.eup %3639 }
 0x229   : > { %v1512_v45 = vadd.f32 %v1480_v1, %v1380_v37  ;;  %v2302_v26 = vmul.f32 0.70710677, %v2238_v21  ;;  %vm5685_vm6 = vcmp.gt.s32.totalorder %v976_v43, 0  ;;  %v6641_v13 = vrot.slane %v6617_v31, 1 }
 0x22a   : > { %v5683_v14 = vsel %vm1785_vm1, %v6637_v20, %v6636_v35  ;;  %v6640_v50 = vmov %v6637_v20  ;;  %v1840_v2 = vmul.f32 %v4221_v9, %v5544_v12  ;;  %3643 = verf.f32 %v2301_v7  ;;  %v3642_v43 = vpop.eup %3641  ;;  %v6645_v35 = vld [vmem:[#allocation91_spill] sm:$0xff]  ;;  %v6646_v7 = vld [vmem:[#allocation78_spill] sm:$0xff] }
 0x22b   : > { %v5695_v8 = vsel %vm1785_vm1, %v6641_v13, %v6640_v50  ;;  %v1643_v58 = vadd.f32 %v1611_v27, %v1511_v25  ;;  %v1644_v22 = vadd.f32 %v1612_v51, %v1512_v45  ;;  %v1841_v52 = vmul.f32 %v4221_v9, %v5532_v6 }
 0x22c   : > { %v2363_v49 = vadd.f32 1.0, %v3640_v16  ;;  %3645 = verf.f32 %v2302_v26  ;;  %v1940_v31 = vmul.f32 %v4236_v17, %v5623_v23  ;;  %v1941_v63 = vmul.f32 %v4236_v17, %v5611_v11 }
 0x22d   : > { %v2364_v3 = vadd.f32 1.0, %v3642_v43  ;;  %v1707_v12 = vsel %vm5685_vm6, %v1643_v58, 0.0  ;;  %v1740_v33 = vadd.f32 %v1644_v22, %v1279_v29  ;;  %v2072_v18 = vmul.f32 %v5707_v36, %v5695_v8  ;;  %v6644_v29 = vld [vmem:[#allocation72_spill] sm:$0xff]  ;;  %v6652_v58 = vld [vmem:[#allocation97_spill] sm:$0xff] }
 0x22e   : > { %v2269_v6 = vmul.f32 0.5, %v2237_v32  ;;  %v1739_v47 = vadd.f32 %v1707_v12, %v1278_v4  ;;  %v1972_v44 = vadd.f32 %v1940_v31, %v1840_v2  ;;  %v1973_v38 = vadd.f32 %v1941_v63, %v1841_v52  ;;  %v6647_v32 = vld [vmem:[#allocation99_spill] sm:$0xff]  ;;  %v6651_v2 = vld [vmem:[#allocation89_spill] sm:$0xff] }
 0x22f   : > { %v2395_v41 = vmul.f32 %v2363_v49, %v2267_v34  ;;  %v2396_v37 = vmul.f32 %v2364_v3, %v2268_v54  ;;  %v2073_v57 = vmul.f32 %v5707_v36, %v5683_v14  ;;  %v946_v1 = vadd.s32 160, %v4171_v30  ;;  %v6648_v54 = vld [vmem:[#allocation85_spill] sm:$0xff] }
 0x230   : > { %v2104_v27 = vadd.f32 %v2072_v18, %v1972_v44  ;;  %vm5714_vm7 = vcmp.lt.s32.totalorder %v977_v39, 15  ;;  %v1212_v20 = vadd.f32 %v6645_v35, %v6644_v29  ;;  %v1213_v4 = vadd.f32 %v6647_v32, %v6646_v7 }
 0x231   : > { %v2420_v25 = vpack.c.bf16 %v2396_v37, %v2395_v41  ;;  %v2105_v45 = vadd.f32 %v2073_v57, %v1973_v38  ;;  %v947_v34 = vadd.s32 168, %v4171_v30  ;;  %v6649_v26 = vrot.slane %v6648_v54, 7  ;;  %v6655_v41 = vld [vmem:[#allocation102_spill] sm:$0xff] }
 0x232   : > { %v6650_v19 = vrot.slane %v6635_v28, 7  ;;  %v2270_v50 = vmul.f32 0.5, %v2238_v21  ;;  %v2200_v13 = vadd.f32 %v2104_v27, %v1739_v47  ;;  %v1280_v16 = vadd.f32 %v6651_v2, %v1212_v20 }
 0x233   : > { %v1281_v22 = vadd.f32 %v6652_v58, %v1213_v4  ;;  %3396 = vmatmul.mubr.bf16.gmra.mxu1 %v2420_v25  ;;  %v2169_v52 = vsel %vm5714_vm7, %v2105_v45, 0.0  ;;  %v978_v43 = vand.u32 15, %v946_v1  ;;  %v6654_v31 = vrot.slane %v6628_v5, 7 }
 0x234   : > { %v5729_v39 = vsel %vm1324_vm0, %v6650_v19, %v6649_v26  ;;  %v6653_v49 = vmov %v6650_v19  ;;  %v1381_v21 = vmul.f32 %v4200_v55, %v5588_v40  ;;  %v2201_v3 = vadd.f32 %v2169_v52, %v1740_v33 }
 0x235   : > { %v5741_v63 = vsel %vm1324_vm0, %v6654_v31, %v6653_v49  ;;  %v2239_v12 = vadd.f32 %v4965_v46, %v2200_v13  ;;  %v1481_v18 = vmul.f32 %v4206_v61, %v5661_v24  ;;  %v1482_v47 = vmul.f32 %v4206_v61, %v5651_v15 }
 0x236   : > { %v979_v44 = vand.u32 15, %v947_v34  ;;  %v1382_v5 = vmul.f32 %v4200_v55, %v5576_v59  ;;  %v1613_v38 = vmul.f32 %v4209_v0, %v5741_v63  ;;  %v6656_v37 = vrot.slane %v6655_v41, 1 }
 0x237   : > { %v6657_v40 = vrot.slane %v6648_v54, 1  ;;  %v2240_v57 = vadd.f32 %v4965_v46, %v2201_v3  ;;  %v2303_v1 = vmul.f32 0.70710677, %v2239_v12  ;;  %v1513_v27 = vadd.f32 %v1481_v18, %v1381_v21  ;;  %v3644_v46 = vpop.eup %3643 }
 0x238   : > { %v1614_v51 = vmul.f32 %v4209_v0, %v5729_v39  ;;  %v5765_v29 = vmul.f32 0.5, %v2239_v12  ;;  %v1514_v59 = vadd.f32 %v1482_v47, %v1382_v5  ;;  %vm5767_vm8 = vcmp.gt.s32.totalorder %v978_v43, 0 }
 0x239   : > { %v5760_v33 = vsel %vm1785_vm1, %v6657_v40, %v6656_v37  ;;  %v6660_v20 = vmov %v6657_v40  ;;  %v6661_v7 = vrot.slane %v6635_v28, 1  ;;  %v2304_v4 = vmul.f32 0.70710677, %v2240_v57  ;;  %v3646_v34 = vpop.eup %3645 }
 0x23a   : > { %3647 = verf.f32 %v2303_v1  ;;  %v1645_v25 = vadd.f32 %v1613_v38, %v1513_v27  ;;  %v1842_v45 = vmul.f32 %v4221_v9, %v5623_v23  ;;  %v2365_v26 = vadd.f32 1.0, %v3644_v46  ;;  %v6666_v1 = vld [vmem:[#allocation98_spill] sm:$0xff]  ;;  %v6667_v27 = vld [vmem:[#allocation96_spill] sm:$0xff] }
 0x23b   : > { %v5777_v32 = vsel %vm1785_vm1, %v6661_v7, %v6660_v20  ;;  %v1646_v19 = vadd.f32 %v1614_v51, %v1514_v59  ;;  %v1942_v13 = vmul.f32 %v4236_v17, %v5695_v8  ;;  %v1943_v28 = vmul.f32 %v4236_v17, %v5683_v14  ;;  %v6671_v46 = vld [vmem:[#allocation108_spill] sm:$0xff] }
 0x23c   : > { %v2366_v2 = vadd.f32 1.0, %v3646_v34  ;;  %3649 = verf.f32 %v2304_v4  ;;  %v1709_v58 = vsel %vm5767_vm8, %v1645_v25, 0.0  ;;  %v1843_v52 = vmul.f32 %v4221_v9, %v5611_v11  ;;  %v6664_v11 = vld [vmem:[#allocation90_spill] sm:$0xff] }
 0x23d   : > { %v1741_v43 = vadd.f32 %v1709_v58, %v1280_v16  ;;  %v1742_v49 = vadd.f32 %v1646_v19, %v1281_v22  ;;  %v1974_v23 = vadd.f32 %v1942_v13, %v1842_v45  ;;  %v2074_v31 = vmul.f32 %v5707_v36, %v5777_v32  ;;  %v6665_v16 = vld [vmem:[#allocation88_spill] sm:$0xff]  ;;  %v6672_v45 = vld [vmem:[#allocation115_spill] sm:$0xff]  ;;  %v5828_v58 = vld [vmem:[%s6263_s4] ss:$0 sm:$0xff] }
 0x23e   : > { %v2397_v21 = vmul.f32 %v2365_v26, %v2269_v6  ;;  %v2398_v3 = vmul.f32 %v2366_v2, %v2270_v50  ;;  %v1975_v12 = vadd.f32 %v1943_v28, %v1843_v52  ;;  %v2075_v18 = vmul.f32 %v5707_v36, %v5760_v33  ;;  %v6668_v50 = vld [vmem:[#allocation112_spill] sm:$0xff] }
 0x23f   : > { %v2106_v47 = vadd.f32 %v2074_v31, %v1974_v23  ;;  %vm5793_vm9 = vcmp.lt.s32.totalorder %v979_v44, 15  ;;  %v948_v38 = vadd.s32 176, %v4171_v30  ;;  %v1214_v22 = vadd.f32 %v6665_v16, %v6664_v11 }
 0x240   : > { %v2421_v37 = vpack.c.bf16 %v2398_v3, %v2397_v21  ;;  %v2107_v40 = vadd.f32 %v2075_v18, %v1975_v12  ;;  %v1215_v6 = vadd.f32 %v6667_v27, %v6666_v1  ;;  %v6669_v51 = vrot.slane %v6668_v50, 7 }
 0x241   : > { %v6670_v59 = vrot.slane %v6655_v41, 7  ;;  %v2202_v35 = vadd.f32 %v2106_v47, %v1741_v43  ;;  %v949_v20 = vadd.s32 184, %v4171_v30  ;;  %v980_v7 = vand.u32 15, %v948_v38 }
 0x242   : > { %v1282_v4 = vadd.f32 %v6671_v46, %v1214_v22  ;;  %3399 = vmatprep.mubr.bf16.mxu1 %v2421_v37  ;;  %v2171_v25 = vsel %vm5793_vm9, %v2107_v40, 0.0  ;;  %v1283_v34 = vadd.f32 %v6672_v45, %v1215_v6  ;;  %v6674_v19 = vrot.slane %v6648_v54, 7 }
 0x243   : > { %v5808_v44 = vsel %vm1324_vm0, %v6670_v59, %v6669_v51  ;;  %v6673_v26 = vmov %v6670_v59  ;;  %v1383_v28 = vmul.f32 %v4200_v55, %v5661_v24  ;;  %v2203_v2 = vadd.f32 %v2171_v25, %v1742_v49 }
 0x244   : > { %v5821_v13 = vsel %vm1324_vm0, %v6674_v19, %v6673_v26  ;;  %v2241_v52 = vadd.f32 %v5828_v58, %v2202_v35  ;;  %v1384_v43 = vmul.f32 %v4200_v55, %v5651_v15  ;;  %v1483_v54 = vmul.f32 %v4206_v61, %v5741_v63  ;;  %v6688_v15 = vld [vmem:[#allocation106_spill] sm:$0xff] }
 0x245   : > { %v2272_v23 = vmul.f32 0.5, %v2240_v57  ;;  %v1484_v31 = vmul.f32 %v4206_v61, %v5729_v39  ;;  %v1615_v24 = vmul.f32 %v4209_v0, %v5821_v13  ;;  %v1616_v49 = vmul.f32 %v4209_v0, %v5808_v44  ;;  %v6677_v57 = vld [vmem:[#allocation95_spill] sm:$0xff] }
 0x246   : > { %v2242_v21 = vadd.f32 %v5828_v58, %v2203_v2  ;;  %v2305_v3 = vmul.f32 0.70710677, %v2241_v52  ;;  %v981_v12 = vand.u32 15, %v949_v20  ;;  %v1515_v18 = vadd.f32 %v1483_v54, %v1383_v28 }
 0x247   : > { %v1516_v47 = vadd.f32 %v1484_v31, %v1384_v43  ;;  %vm5842_vm10 = vcmp.gt.s32.totalorder %v980_v7, 0  ;;  %v6678_v5 = vrot.slane %v6677_v57, 1  ;;  %v6679_v38 = vrot.slane %v6668_v50, 1  ;;  %v3648_v40 = vpop.eup %3647 }
 0x248   : > { %v6681_v22 = vrot.slane %v6655_v41, 1  ;;  %v2306_v1 = vmul.f32 0.70710677, %v2242_v21  ;;  %3651 = verf.f32 %v2305_v3  ;;  %v1647_v27 = vadd.f32 %v1615_v24, %v1515_v18  ;;  %v6685_v3 = vld [vmem:[#allocation107_spill] sm:$0xff] }
 0x249   : > { %v5852_v11 = vsel %vm1785_vm1, %v6679_v38, %v6678_v5  ;;  %v6680_v16 = vmov %v6679_v38  ;;  %v1844_v6 = vmul.f32 %v4221_v9, %v5695_v8  ;;  %v2367_v51 = vadd.f32 1.0, %v3648_v40  ;;  %v3650_v41 = vpop.eup %3649  ;;  %v6691_v40 = vld [vmem:[#allocation104_spill] sm:$0xff] }
 0x24a   : > { %v5860_v37 = vsel %vm1785_vm1, %v6681_v22, %v6680_v16  ;;  %v1648_v59 = vadd.f32 %v1616_v49, %v1516_v47  ;;  %v1845_v35 = vmul.f32 %v4221_v9, %v5683_v14  ;;  %v1944_v20 = vmul.f32 %v4236_v17, %v5777_v32  ;;  %v6684_v49 = vld [vmem:[#allocation87_spill] sm:$0xff]  ;;  %v6687_v47 = vld [vmem:[#allocation114_spill] sm:$0xff] }
 0x24b   : > { %3653 = verf.f32 %v2306_v1  ;;  %v1711_v7 = vsel %vm5842_vm10, %v1647_v27, 0.0  ;;  %v1945_v46 = vmul.f32 %v4236_v17, %v5760_v33  ;;  %v2076_v25 = vmul.f32 %v5707_v36, %v5860_v37 }
 0x24c   : > { %v2368_v8 = vadd.f32 1.0, %v3650_v41  ;;  %v2273_v45 = vmul.f32 0.5, %v2241_v52  ;;  %v1743_v26 = vadd.f32 %v1711_v7, %v1282_v4  ;;  %v1744_v19 = vadd.f32 %v1648_v59, %v1283_v34  ;;  %v6686_v34 = vld [vmem:[#allocation93_spill] sm:$0xff] }
 0x24d   : > { %v2399_v14 = vmul.f32 %v2367_v51, %v5765_v29  ;;  %v1976_v28 = vadd.f32 %v1944_v20, %v1844_v6  ;;  %v1977_v2 = vadd.f32 %v1945_v46, %v1845_v35  ;;  %v2077_v43 = vmul.f32 %v5707_v36, %v5852_v11  ;;  %v6692_v51 = vld [vmem:[#allocation111_spill] sm:$0xff] }
 0x24e   : > { %v2400_v54 = vmul.f32 %v2368_v8, %v2272_v23  ;;  %vm5877_vm11 = vcmp.lt.s32.totalorder %v981_v12, 15  ;;  %v950_v24 = vadd.s32 192, %v4171_v30  ;;  %v1216_v18 = vadd.f32 %v6685_v3, %v6684_v49 }
 0x24f   : > { %v2108_v52 = vadd.f32 %v2076_v25, %v1976_v28  ;;  %v2109_v4 = vadd.f32 %v2077_v43, %v1977_v2  ;;  %v1217_v29 = vadd.f32 %v6687_v47, %v6686_v34  ;;  %v6689_v5 = vrot.slane %v6688_v15, 7 }
 0x250   : > { %v6690_v38 = vrot.slane %v6677_v57, 7  ;;  %v2422_v12 = vpack.c.bf16 %v2400_v54, %v2399_v14  ;;  %v2274_v16 = vmul.f32 0.5, %v2242_v21  ;;  %v982_v22 = vand.u32 15, %v950_v24 }
 0x251   : > { %v1284_v1 = vadd.f32 %v6691_v40, %v1216_v18  ;;  %v2173_v27 = vsel %vm5877_vm11, %v2109_v4, 0.0  ;;  %v2204_v6 = vadd.f32 %v2108_v52, %v1743_v26  ;;  %v1285_v59 = vadd.f32 %v6692_v51, %v1217_v29 }
 0x252   : > { %v5892_v23 = vsel %vm1324_vm0, %v6690_v38, %v6689_v5  ;;  %v6693_v35 = vmov %v6690_v38  ;;  %v6694_v20 = vrot.slane %v6668_v50, 7  ;;  %3400 = vmatmul.mubr.bf16.gmra.mxu1 %v2422_v12  ;;  %v2205_v7 = vadd.f32 %v2173_v27, %v1744_v19 }
 0x253   : > { %v951_v21 = vadd.s32 200, %v4171_v30  ;;  %v1385_v46 = vmul.f32 %v4200_v55, %v5741_v63  ;;  %v1485_v25 = vmul.f32 %v4206_v61, %v5821_v13  ;;  %v2243_v8 = vadd.f32 %v5828_v58, %v2204_v6 }
 0x254   : > { %v5904_v41 = vsel %vm1324_vm0, %v6694_v20, %v6693_v35  ;;  %v1386_v26 = vmul.f32 %v4200_v55, %v5729_v39  ;;  %v1486_v50 = vmul.f32 %v4206_v61, %v5808_v44  ;;  %v2244_v19 = vadd.f32 %v5828_v58, %v2205_v7 }
 0x255   : > { %v1617_v14 = vmul.f32 %v4209_v0, %v5904_v41  ;;  %v1517_v28 = vadd.f32 %v1485_v25, %v1385_v46  ;;  %v1618_v63 = vmul.f32 %v4209_v0, %v5892_v23  ;;  %v6695_v2 = vrot.slane %v4910_v60, 1  ;;  %v3652_v52 = vpop.eup %3651 }
 0x256   : > { %v6696_v43 = vrot.slane %v6688_v15, 1  ;;  %v2307_v39 = vmul.f32 0.70710677, %v2243_v8  ;;  %v1518_v31 = vadd.f32 %v1486_v50, %v1386_v26  ;;  %vm5929_vm12 = vcmp.gt.s32.totalorder %v982_v22, 0 }
 0x257   : > { %v6700_v3 = vrot.slane %v6677_v57, 1  ;;  %v2308_v4 = vmul.f32 0.70710677, %v2244_v19  ;;  %v983_v34 = vand.u32 15, %v951_v21  ;;  %v1649_v47 = vadd.f32 %v1617_v14, %v1517_v28  ;;  %v6701_v28 = vld [vmem:[#allocation105_spill] sm:$0xff] }
 0x258   : > { %v5927_v54 = vsel %vm1785_vm1, %v6696_v43, %v6695_v2  ;;  %v6699_v49 = vmov %v6696_v43  ;;  %v1846_v29 = vmul.f32 %v4221_v9, %v5777_v32  ;;  %v2369_v5 = vadd.f32 1.0, %v3652_v52  ;;  %v3654_v22 = vpop.eup %3653 }
 0x259   : > { %v5939_v18 = vsel %vm1785_vm1, %v6700_v3, %v6699_v49  ;;  %3655 = verf.f32 %v2307_v39  ;;  %v1650_v38 = vadd.f32 %v1618_v63, %v1518_v31  ;;  %v1847_v12 = vmul.f32 %v4221_v9, %v5760_v33  ;;  %v6702_v63 = vld [vmem:[#allocation103_spill] sm:$0xff] }
 0x25a   : > { %3657 = verf.f32 %v2308_v4  ;;  %v1713_v57 = vsel %vm5929_vm12, %v1649_v47, 0.0  ;;  %v1946_v40 = vmul.f32 %v4236_v17, %v5860_v37  ;;  %v1947_v27 = vmul.f32 %v4236_v17, %v5852_v11 }
 0x25b   : > { %v2370_v6 = vadd.f32 1.0, %v3654_v22  ;;  %v2275_v51 = vmul.f32 0.5, %v2243_v8  ;;  %v1745_v32 = vadd.f32 %v1713_v57, %v1284_v1  ;;  %v1746_v35 = vadd.f32 %v1650_v38, %v1285_v59  ;;  %v6703_v1 = vld [vmem:[#allocation113_spill] sm:$0xff]  ;;  %v6704_v59 = vld [vmem:[#allocation110_spill] sm:$0xff] }
 0x25c   : > { %v1978_v20 = vadd.f32 %v1946_v40, %v1846_v29  ;;  %v1979_v7 = vadd.f32 %v1947_v27, %v1847_v12  ;;  %v2078_v33 = vmul.f32 %v5707_v36, %v5939_v18  ;;  %v2079_v21 = vmul.f32 %v5707_v36, %v5927_v54 }
 0x25d   : > { %v2401_v46 = vmul.f32 %v2369_v5, %v2273_v45  ;;  %v2402_v25 = vmul.f32 %v2370_v6, %v2274_v16  ;;  %vm2143_vm13 = vcmp.lt.s32.totalorder %v983_v34, 15  ;;  %v952_v26 = vadd.s32 208, %v4171_v30 }
 0x25e   : > { %v2110_v50 = vadd.f32 %v2078_v33, %v1978_v20  ;;  %v2111_v14 = vadd.f32 %v2079_v21, %v1979_v7  ;;  %v1218_v8 = vadd.f32 %v6702_v63, %v6701_v28  ;;  %v1219_v2 = vadd.f32 %v6704_v59, %v6703_v1 }
 0x25f   : > { %v2423_v43 = vpack.c.bf16 %v2402_v25, %v2401_v46  ;;  %v953_v39 = vadd.s32 216, %v4171_v30  ;;  %v984_v31 = vand.u32 15, %v952_v26  ;;  %v6705_v24 = vrot.slane %v4910_v60, 7 }
 0x260   : > { %v2175_v16 = vsel %vm2143_vm13, %v2111_v14, 0.0  ;;  %v2206_v49 = vadd.f32 %v2110_v50, %v1745_v32  ;;  %v1286_v3 = vadd.f32 %v4973_v48, %v1218_v8  ;;  %v1287_v52 = vadd.f32 %v5045_v56, %v1219_v2 }
 0x261   : > { %v5966_v45 = vsel %vm1324_vm0, %v6705_v24, %v5013_v62  ;;  %3403 = vmatprep.mubr.bf16.mxu1 %v2423_v43  ;;  %v2207_v4 = vadd.f32 %v2175_v16, %v1746_v35  ;;  %v6706_v34 = vmov %v6705_v24  ;;  %v6707_v47 = vrot.slane %v6688_v15, 7 }
 0x262   : > { %v1387_v5 = vmul.f32 %v4200_v55, %v5821_v13  ;;  %v1388_v38 = vmul.f32 %v4200_v55, %v5808_v44  ;;  %v2245_v48 = vadd.f32 %v5828_v58, %v2206_v49  ;;  %v1487_v56 = vmul.f32 %v4206_v61, %v5904_v41 }
 0x263   : > { %v5976_v29 = vsel %vm1324_vm0, %v6707_v47, %v6706_v34  ;;  %v1488_v12 = vmul.f32 %v4206_v61, %v5892_v23  ;;  %v2276_v22 = vmul.f32 0.5, %v2244_v19  ;;  %v2246_v57 = vadd.f32 %v5828_v58, %v2207_v4  ;;  %v6714_v47 = vld [vmem:[#allocation101_spill] sm:$0xff] }
 0x264   : > { %v1619_v15 = vmul.f32 %v4209_v0, %v5976_v29  ;;  %v1620_v13 = vmul.f32 %v4209_v0, %v5966_v45  ;;  %v6708_v44 = vrot.slane %v4910_v60, 1  ;;  %v2309_v27 = vmul.f32 0.70710677, %v2245_v48 }
 0x265   : > { %v985_v6 = vand.u32 15, %v953_v39  ;;  %v1519_v32 = vadd.f32 %v1487_v56, %v1387_v5  ;;  %v1520_v35 = vadd.f32 %v1488_v12, %v1388_v38  ;;  %v2310_v20 = vmul.f32 0.70710677, %v2246_v57  ;;  %v6715_v5 = vld [vmem:[#allocation109_spill] sm:$0xff]  ;;  %v6716_v38 = vld [vmem:[#allocation123_spill] sm:$0xff] }
 0x266   : > { %v5997_v40 = vsel %vm1785_vm1, %v6708_v44, %v5057_v10  ;;  %vm5999_vm14 = vcmp.gt.s32.totalorder %v984_v31, 0  ;;  %v1848_v19 = vmul.f32 %v4221_v9, %v5860_v37  ;;  %v1849_v33 = vmul.f32 %v4221_v9, %v5852_v11  ;;  %v3656_v60 = vpop.eup %3655  ;;  %v6718_v44 = vld [vmem:[#allocation118_spill] sm:$0xff] }
 0x267   : > { %3659 = verf.f32 %v2309_v27  ;;  %v1651_v21 = vadd.f32 %v1619_v15, %v1519_v32  ;;  %v1652_v46 = vadd.f32 %v1620_v13, %v1520_v35  ;;  %v6711_v25 = vrot.slane %v4904_v42, 1  ;;  %v3658_v50 = vpop.eup %3657 }
 0x268   : > { %v2371_v14 = vadd.f32 1.0, %v3656_v60  ;;  %3661 = verf.f32 %v2310_v20  ;;  %v1948_v28 = vmul.f32 %v4236_v17, %v5939_v18  ;;  %v1949_v37 = vmul.f32 %v4236_v17, %v5927_v54 }
 0x269   : > { %v1887_v26 = vsel %vm1785_vm1, %v5057_v10, %v6711_v25  ;;  %v2372_v11 = vadd.f32 1.0, %v3658_v50  ;;  %v1715_v63 = vsel %vm5999_vm14, %v1651_v21, 0.0  ;;  %v1748_v8 = vadd.f32 %v1652_v46, %v1287_v52  ;;  %v6720_v25 = vld [vmem:[#allocation119_spill] sm:$0xff] }
 0x26a   : > { %v2080_v1 = vmul.f32 %v5707_v36, %v5997_v40  ;;  %v2277_v59 = vmul.f32 0.5, %v2245_v48  ;;  %v1747_v2 = vadd.f32 %v1715_v63, %v1286_v3  ;;  %v1980_v43 = vadd.f32 %v1948_v28, %v1848_v19 }
 0x26b   : > { %v1981_v39 = vadd.f32 %v1949_v37, %v1849_v33  ;;  %v2403_v31 = vmul.f32 %v2371_v14, %v2275_v51  ;;  %v2404_v24 = vmul.f32 %v2372_v11, %v2276_v22  ;;  %v2081_v16 = vmul.f32 %v5707_v36, %v1887_v26  ;;  %v6717_v22 = vld [vmem:[#allocation116_spill] sm:$0xff] }
 0x26c   : > { %v954_v49 = vadd.s32 224, %v4171_v30  ;;  %v2112_v4 = vadd.f32 %v2080_v1, %v1980_v43  ;;  %vm6022_vm15 = vcmp.lt.s32.totalorder %v985_v6, 15  ;;  %v1220_v52 = vadd.f32 %v4960_v53, %v6714_v47 }
 0x26d   : > { %v1221_v48 = vadd.f32 %v6716_v38, %v6715_v5  ;;  %v2424_v3 = vpack.c.bf16 %v2404_v24, %v2403_v31  ;;  %v2113_v56 = vadd.f32 %v2081_v16, %v1981_v39  ;;  %v955_v51 = vadd.s32 232, %v4171_v30 }
 0x26e   : > { %v986_v12 = vand.u32 15, %v954_v49  ;;  %v2208_v15 = vadd.f32 %v2112_v4, %v1747_v2  ;;  %v1288_v13 = vadd.f32 %v6717_v22, %v1220_v52  ;;  %v1389_v6 = vmul.f32 %v4200_v55, %v5904_v41 }
 0x26f   : > { %v1289_v27 = vadd.f32 %v6718_v44, %v1221_v48  ;;  %3404 = vmatmul.mubr.bf16.gmra.mxu1 %v2424_v3  ;;  %v2177_v53 = vsel %vm6022_vm15, %v2113_v56, 0.0  ;;  %v1390_v32 = vmul.f32 %v4200_v55, %v5892_v23  ;;  %v6719_v35 = vrot.slane %v4904_v42, 7  ;;  %v6725_v3 = vld [vmem:[#allocation125_spill] sm:$0xff]  ;;  %v6729_v44 = vld [vmem:[#allocation19_spill] sm:$0xff] }
 0x270   : > { %v1489_v7 = vmul.f32 %v4206_v61, %v5976_v29  ;;  %v2209_v19 = vadd.f32 %v2177_v53, %v1748_v8  ;;  %v6047_v33 = vadd.f32 %v5828_v58, %v2208_v15  ;;  %v1490_v41 = vmul.f32 %v4206_v61, %v5966_v45 }
 0x271   : > { %v1426_v20 = vsel %vm1324_vm0, %v5013_v62, %v6719_v35  ;;  %v2278_v21 = vmul.f32 0.5, %v2246_v57  ;;  %v987_v23 = vand.u32 15, %v955_v51  ;;  %v1622_v50 = vmul.f32 %v4209_v0, %v6720_v25  ;;  %v6723_v57 = vld [vmem:[#allocation28_spill] sm:$0xff] }
 0x272   : > { %v1621_v60 = vmul.f32 %v4209_v0, %v1426_v20  ;;  %v1521_v46 = vadd.f32 %v1489_v7, %v1389_v6  ;;  %v6055_v62 = vadd.f32 %v5828_v58, %v2209_v19  ;;  %v2311_v14 = vmul.f32 0.70710677, %v6047_v33  ;;  %v6731_v6 = vld [vmem:[#allocation20_spill] sm:$0xff] }
 0x273   : > { %v1522_v28 = vadd.f32 %v1490_v41, %v1390_v32  ;;  %vm6058_vm0 = vcmp.gt.s32.totalorder %v986_v12, 0  ;;  %v1850_v63 = vmul.f32 %v4221_v9, %v5939_v18  ;;  %v6724_v8 = vrot.slane %v4904_v42, 1  ;;  %v6732_v32 = vld [vmem:[#allocation121_spill] sm:$0xff]  ;;  %v6733_v7 = vld [vmem:[#allocation120_spill] sm:$0xff] }
 0x274   : > { %v1653_v11 = vadd.f32 %v1621_v60, %v1521_v46  ;;  %v1950_v2 = vmul.f32 %v4236_v17, %v5997_v40  ;;  %v3660_v43 = vpop.eup %3659  ;;  %v2312_v39 = vmul.f32 0.70710677, %v6055_v62  ;;  %3663 = verf.f32 %v2311_v14  ;;  %v6734_v46 = vld [vmem:[#allocation17_spill] sm:$0xff] }
 0x275   : > { %v1886_v1 = vsel %vm1785_vm1, %v6724_v8, %v6723_v57  ;;  %v1654_v31 = vadd.f32 %v1622_v50, %v1522_v28  ;;  %v1851_v24 = vmul.f32 %v4221_v9, %v5927_v54  ;;  %v3662_v16 = vpop.eup %3661  ;;  %v2373_v49 = vadd.f32 1.0, %v3660_v43  ;;  %v6735_v8 = vld [vmem:[#allocation124_spill] sm:$0xff] }
 0x276   : > { %v1717_v18 = vsel %vm6058_vm0, %v1653_v11, 0.0  ;;  %v1951_v42 = vmul.f32 %v4236_v17, %v1887_v26  ;;  %v1982_v4 = vadd.f32 %v1950_v2, %v1850_v63  ;;  %v2374_v34 = vadd.f32 1.0, %v3662_v16  ;;  %v6736_v43 = vld [vmem:[#allocation16_spill] sm:$0xff] }
 0x277   : > { %3665 = verf.f32 %v2312_v39  ;;  %v1749_v47 = vadd.f32 %v1717_v18, %v1288_v13  ;;  %v1750_v52 = vadd.f32 %v1654_v31, %v1289_v27  ;;  %v2405_v5 = vmul.f32 %v2373_v49, %v2277_v59  ;;  %v6728_v13 = vld [vmem:[#allocation117_spill] sm:$0xff]  ;;  %v6730_v27 = vld [vmem:[#allocation122_spill] sm:$0xff] }
 0x278   : > { %v1983_v38 = vadd.f32 %v1951_v42, %v1851_v24  ;;  %v2082_v48 = vmul.f32 %v5707_v36, %v1886_v1  ;;  %v2083_v56 = vmul.f32 %v5707_v36, %v6725_v3  ;;  %v2406_v54 = vmul.f32 %v2374_v34, %v2278_v21 }
 0x279   : > { %vm6080_vm2 = vcmp.lt.s32.totalorder %v987_v23, 15  ;;  %v956_v12 = vadd.s32 240, %v4171_v30  ;;  %v957_v26 = vadd.s32 248, %v4171_v30  ;;  %v1222_v59 = vadd.f32 %v6729_v44, %v6728_v13 }
 0x27a   : > { %v2114_v15 = vadd.f32 %v2082_v48, %v1982_v4  ;;  %v2115_v22 = vadd.f32 %v2083_v56, %v1983_v38  ;;  %v1223_v53 = vadd.f32 %v6731_v6, %v6730_v27  ;;  %v1623_v35 = vmul.f32 %v4209_v0, %v6732_v32 }
 0x27b   : > { %v1953_v19 = vmul.f32 %v4236_v17, %v6733_v7  ;;  %v2425_v41 = vpack.c.bf16 %v2406_v54, %v2405_v5  ;;  %v988_v60 = vand.u32 15, %v956_v12  ;;  %v1258_v25 = vmul.f32 0.0, %v6734_v46 }
 0x27c   : > { %v2179_v21 = vsel %vm6080_vm2, %v2115_v22, 0.0  ;;  %v2210_v23 = vadd.f32 %v2114_v15, %v1749_v47  ;;  %v1392_v50 = vmul.f32 %v4200_v55, %v5966_v45  ;;  %v989_v28 = vand.u32 15, %v957_v26  ;;  %v6737_v45 = vld [vmem:[#allocation18_spill] sm:$0xff] }
 0x27d   : > { %3407 = vmatprep.mubr.bf16.mxu1 %v2425_v41  ;;  %v2211_v14 = vadd.f32 %v2179_v21, %v1750_v52  ;;  %v1391_v37 = vmul.f32 %v4200_v55, %v5976_v29  ;;  %v1491_v11 = vmul.f32 %v4206_v61, %v1426_v20  ;;  %v1291_v57 = vadd.f32 %v1258_v25, %v1223_v53  ;;  %v6740_v52 = vld [vmem:[#allocation27_spill] sm:$0xff] }
 0x27e   : > { %v2249_v63 = vadd.f32 %v5828_v58, %v2210_v23  ;;  %v1524_v2 = vadd.f32 %v6735_v8, %v1392_v50  ;;  %v1624_v39 = vmul.f32 %v4209_v0, %v6736_v43  ;;  %v1817_v16 = vsel %vm1785_vm1, %v5057_v10, %v6737_v45 }
 0x27f   : > { %v2250_v31 = vadd.f32 %v5828_v58, %v2211_v14  ;;  %v1523_v24 = vadd.f32 %v1491_v11, %v1391_v37  ;;  %v1852_v55 = vmul.f32 %v4221_v9, %v5997_v40  ;;  %vm6113_vm3 = vcmp.gt.s32.totalorder %v988_v60, 0 }
 0x280   : > { %v2313_v61 = vmul.f32 0.70710677, %v2249_v63  ;;  %v1656_v29 = vadd.f32 %v1624_v39, %v1524_v2  ;;  %v1853_v49 = vmul.f32 %v4221_v9, %v1817_v16  ;;  %v1290_v18 = vadd.f32 %v1258_v25, %v1222_v59 }
 0x281   : > { %v2314_v0 = vmul.f32 0.70710677, %v2250_v31  ;;  %v1655_v42 = vadd.f32 %v1623_v35, %v1523_v24  ;;  %v1952_v4 = vmul.f32 %v4236_v17, %v1886_v1  ;;  %v3664_v34 = vpop.eup %3663  ;;  %v2049_v40 = vsel %vm1785_vm1, %v6737_v45, %v6740_v52 }
 0x282   : > { %3667 = verf.f32 %v2313_v61  ;;  %v1752_v47 = vadd.f32 %v1656_v29, %v1291_v57  ;;  %v1985_v10 = vadd.f32 %v1953_v19, %v1853_v49  ;;  %v2375_v5 = vadd.f32 1.0, %v3664_v34 }
 0x283   : > { %3669 = verf.f32 %v2314_v0  ;;  %v1719_v38 = vsel %vm6113_vm3, %v1655_v42, 0.0  ;;  %v1984_v9 = vadd.f32 %v1952_v4, %v1852_v55  ;;  %v2084_v17 = vmul.f32 %v5707_v36, %v6737_v45 }
 0x284   : > { %v3666_v48 = vpop.eup %3665  ;;  %v1751_v3 = vadd.f32 %v1719_v38, %v1290_v18  ;;  %v2085_v1 = vmul.f32 %v5707_v36, %v2049_v40  ;;  %v2279_v56 = vmul.f32 0.5, %v6047_v33  ;;  %v2280_v54 = vmul.f32 0.5, %v6055_v62 }
 0x285   : > { %v2376_v51 = vadd.f32 1.0, %v3666_v48  ;;  %vm2149_vm4 = vcmp.lt.s32.totalorder %v989_v28, 15  ;;  %v2116_v30 = vadd.f32 %v2084_v17, %v1984_v9  ;;  %v2281_v32 = vmul.f32 0.5, %v2249_v63  ;;  %v6135_v63 = vld [vmem:[%s6265_s6] ss:$0 sm:$0xff] }
 0x286   : > { %v2117_v12 = vadd.f32 %v2085_v1, %v1985_v10  ;;  %v2407_v26 = vmul.f32 %v2375_v5, %v2279_v56  ;;  %v2282_v7 = vmul.f32 0.5, %v2250_v31 }
 0x287   : > { %v2408_v15 = vmul.f32 %v2376_v51, %v2280_v54  ;;  %v2212_v13 = vadd.f32 %v2116_v30, %v1751_v3 }
 0x288   : > { %v2181_v22 = vsel %vm2149_vm4, %v2117_v12, 0.0 }
 0x289   : > { %v2426_v44 = vpack.c.bf16 %v2408_v15, %v2407_v26  ;;  %v2213_v59 = vadd.f32 %v2181_v22, %v1752_v47  ;;  %v2251_v27 = vadd.f32 %v5828_v58, %v2212_v13 }
 0x28b   : > { %3408 = vmatmul.mubr.bf16.gmra.mxu1 %v2426_v44  ;;  %v2252_v6 = vadd.f32 %v5828_v58, %v2213_v59  ;;  %v2315_v36 = vmul.f32 0.70710677, %v2251_v27  ;;  %v2283_v25 = vmul.f32 0.5, %v2251_v27 }
 0x28d   : > { %v2316_v53 = vmul.f32 0.70710677, %v2252_v6  ;;  %3671 = verf.f32 %v2315_v36  ;;  %v2284_v14 = vmul.f32 0.5, %v2252_v6 }
 0x28f   : > { %v3668_v33 = vpop.eup %3667  ;;  %3673 = verf.f32 %v2316_v53 }
 0x290   : > { %v3670_v62 = vpop.eup %3669  ;;  %v2377_v35 = vadd.f32 1.0, %v3668_v33 }
 0x291   : > { %v2378_v19 = vadd.f32 1.0, %v3670_v62 }
 0x292   : > { %v2409_v41 = vmul.f32 %v2377_v35, %v2281_v32 }
 0x293   : > { %v2410_v60 = vmul.f32 %v2378_v19, %v2282_v7 }
 0x295   : > { %v2427_v21 = vpack.c.bf16 %v2410_v60, %v2409_v41 }
 0x297   : > { %3411 = vmatprep.mubr.bf16.mxu1 %v2427_v21 }
 0x29a   : > { %v3672_v23 = vpop.eup %3671 }
 0x29b   : > { %v2379_v50 = vadd.f32 1.0, %v3672_v23 }
 0x29c   : > { %v3674_v46 = vpop.eup %3673 }
 0x29d   : > { %v2380_v58 = vadd.f32 1.0, %v3674_v46  ;;  %v2411_v28 = vmul.f32 %v2379_v50, %v2283_v25 }
 0x29e   : > { %v3385_v57 = vpop.f32.mrf.mxu1 }
 0x29f   : > { %v2412_v37 = vmul.f32 %v2380_v58, %v2284_v14  ;;  %v2834_v8 = vadd.f32 %v3385_v57, %v6135_v63 }
 0x2a0   : > { %v2527_v2 = vpop.f32.mrf.mxu1 }
 0x2a1   : > { %v2428_v11 = vpack.c.bf16 %v2412_v37, %v2411_v28  ;;  %v2898_v43 = vmul.f32 0.70710677, %v2834_v8  ;;  %v2832_v39 = vadd.f32 %v6135_v63, %v2527_v2  ;;  %v2866_v49 = vmul.f32 0.5, %v2834_v8 }
 0x2a2   : > { %v3386_v31 = vpop.f32.mrf.mxu1 }
 0x2a3   : > { %3412 = vmatmul.mubr.bf16.gmra.mxu1 %v2428_v11  ;;  %3675 = verf.f32 %v2898_v43  ;;  %v2896_v24 = vmul.f32 0.70710677, %v2832_v39  ;;  %v2835_v45 = vadd.f32 %v3386_v31, %v6135_v63  ;;  %v2864_v47 = vmul.f32 0.5, %v2832_v39 }
 0x2a4   : > { %v2530_v16 = vpop.f32.mrf.mxu1 }
 0x2a5   : > { %3677 = verf.f32 %v2896_v24  ;;  %v2899_v55 = vmul.f32 0.70710677, %v2835_v45  ;;  %v2833_v61 = vadd.f32 %v6135_v63, %v2530_v16  ;;  %v2867_v48 = vmul.f32 0.5, %v2835_v45 }
 0x2a7   : > { %3679 = verf.f32 %v2899_v55  ;;  %v2897_v29 = vmul.f32 0.70710677, %v2833_v61  ;;  %v2865_v30 = vmul.f32 0.5, %v2833_v61 }
 0x2a9   : > { %3681 = verf.f32 %v2897_v29 }
 0x2b0   : > { %v3676_v20 = vpop.eup %3675 }
 0x2b1   : > { %v2962_v0 = vadd.f32 1.0, %v3676_v20 }
 0x2b2   : > { %v3678_v42 = vpop.eup %3677 }
 0x2b3   : > { %v2994_v34 = vmul.f32 %v2962_v0, %v2866_v49  ;;  %v2960_v10 = vadd.f32 1.0, %v3678_v42 }
 0x2b4   : > { %v3680_v40 = vpop.eup %3679 }
 0x2b5   : > { %v3389_v18 = vpop.f32.mrf.mxu1  ;;  %3026 = vst [vmem:[%s6144_s16 + $0x10] sm:$0xff] %v2994_v34  ;;  %v2992_v9 = vmul.f32 %v2960_v10, %v2864_v47  ;;  %v2963_v3 = vadd.f32 1.0, %v3680_v40 }
 0x2b6   : > { %v2838_v4 = vadd.f32 %v3389_v18, %v6135_v63  ;;  %v3682_v1 = vpop.eup %3681 }
 0x2b7   : > { %v2543_v52 = vpop.f32.mrf.mxu1  ;;  %3024 = vst [vmem:[%s6144_s16] sm:$0xff] %v2992_v9  ;;  %v2995_v51 = vmul.f32 %v2963_v3, %v2867_v48  ;;  %v2961_v12 = vadd.f32 1.0, %v3682_v1 }
 0x2b8   : > { %v2902_v5 = vmul.f32 0.70710677, %v2838_v4  ;;  %v2836_v38 = vadd.f32 %v6135_v63, %v2543_v52  ;;  %v2870_v27 = vmul.f32 0.5, %v2838_v4 }
 0x2b9   : > { %v3390_v17 = vpop.f32.mrf.mxu1  ;;  %3027 = vst [vmem:[%s6144_s16 + $0x18] sm:$0xff] %v2995_v51  ;;  %v2993_v13 = vmul.f32 %v2961_v12, %v2865_v30 }
 0x2ba   : > { %3683 = verf.f32 %v2902_v5  ;;  %v2900_v56 = vmul.f32 0.70710677, %v2836_v38  ;;  %v2839_v54 = vadd.f32 %v3390_v17, %v6135_v63  ;;  %v2868_v33 = vmul.f32 0.5, %v2836_v38 }
 0x2bb   : > { %v2546_v26 = vpop.f32.mrf.mxu1  ;;  %3025 = vst [vmem:[%s6144_s16 + $0x8] sm:$0xff] %v2993_v13 }
 0x2bc   : > { %3685 = verf.f32 %v2900_v56  ;;  %v2903_v15 = vmul.f32 0.70710677, %v2839_v54  ;;  %v2837_v22 = vadd.f32 %v6135_v63, %v2546_v26  ;;  %v2871_v7 = vmul.f32 0.5, %v2839_v54 }
 0x2be   : > { %3687 = verf.f32 %v2903_v15  ;;  %v2901_v44 = vmul.f32 0.70710677, %v2837_v22  ;;  %v2869_v21 = vmul.f32 0.5, %v2837_v22 }
 0x2c0   : > { %3689 = verf.f32 %v2901_v44 }
 0x2c7   : > { %v3684_v59 = vpop.eup %3683 }
 0x2c8   : > { %v2966_v6 = vadd.f32 1.0, %v3684_v59 }
 0x2c9   : > { %v3686_v36 = vpop.eup %3685 }
 0x2ca   : > { %v2998_v53 = vmul.f32 %v2966_v6, %v2870_v27  ;;  %v2964_v62 = vadd.f32 1.0, %v3686_v36 }
 0x2cb   : > { %v3688_v32 = vpop.eup %3687 }
 0x2cc   : > { %3030 = vst [vmem:[%s6144_s16 + $0x30] sm:$0xff] %v2998_v53  ;;  %v2996_v35 = vmul.f32 %v2964_v62, %v2868_v33  ;;  %v2967_v19 = vadd.f32 1.0, %v3688_v32 }
 0x2cd   : > { %v3690_v41 = vpop.eup %3689 }
 0x2ce   : > { %3028 = vst [vmem:[%s6144_s16 + $0x20] sm:$0xff] %v2996_v35  ;;  %v2999_v60 = vmul.f32 %v2967_v19, %v2871_v7  ;;  %v2965_v23 = vadd.f32 1.0, %v3690_v41 }
 0x2d0   : > { %3031 = vst [vmem:[%s6144_s16 + $0x38] sm:$0xff] %v2999_v60  ;;  %v2997_v46 = vmul.f32 %v2965_v23, %v2869_v21 }
 0x2d2   : > { %3029 = vst [vmem:[%s6144_s16 + $0x28] sm:$0xff] %v2997_v46 }
 0x2d5   : > { %v3393_v25 = vpop.f32.mrf.mxu1 }
 0x2d6   : > { %v2842_v50 = vadd.f32 %v3393_v25, %v6135_v63 }
 0x2d7   : > { %v2559_v14 = vpop.f32.mrf.mxu1 }
 0x2d8   : > { %v2906_v58 = vmul.f32 0.70710677, %v2842_v50  ;;  %v2840_v28 = vadd.f32 %v6135_v63, %v2559_v14  ;;  %v2874_v24 = vmul.f32 0.5, %v2842_v50 }
 0x2d9   : > { %v3394_v37 = vpop.f32.mrf.mxu1 }
 0x2da   : > { %3691 = verf.f32 %v2906_v58  ;;  %v2904_v11 = vmul.f32 0.70710677, %v2840_v28  ;;  %v2843_v57 = vadd.f32 %v3394_v37, %v6135_v63  ;;  %v2872_v61 = vmul.f32 0.5, %v2840_v28 }
 0x2db   : > { %v2562_v8 = vpop.f32.mrf.mxu1 }
 0x2dc   : > { %3693 = verf.f32 %v2904_v11  ;;  %v2907_v2 = vmul.f32 0.70710677, %v2843_v57  ;;  %v2841_v43 = vadd.f32 %v6135_v63, %v2562_v8  ;;  %v2875_v0 = vmul.f32 0.5, %v2843_v57 }
 0x2de   : > { %3695 = verf.f32 %v2907_v2  ;;  %v2905_v39 = vmul.f32 0.70710677, %v2841_v43  ;;  %v2873_v34 = vmul.f32 0.5, %v2841_v43 }
 0x2e0   : > { %3697 = verf.f32 %v2905_v39 }
 0x2e7   : > { %v3692_v31 = vpop.eup %3691 }
 0x2e8   : > { %v2970_v45 = vadd.f32 1.0, %v3692_v31 }
 0x2e9   : > { %v3694_v16 = vpop.eup %3693 }
 0x2ea   : > { %v3002_v55 = vmul.f32 %v2970_v45, %v2874_v24  ;;  %v2968_v29 = vadd.f32 1.0, %v3694_v16 }
 0x2eb   : > { %v3696_v20 = vpop.eup %3695 }
 0x2ec   : > { %3034 = vst [vmem:[%s6144_s16 + $0x50] sm:$0xff] %v3002_v55  ;;  %v3000_v49 = vmul.f32 %v2968_v29, %v2872_v61  ;;  %v2971_v18 = vadd.f32 1.0, %v3696_v20 }
 0x2ed   : > { %v3698_v42 = vpop.eup %3697 }
 0x2ee   : > { %3032 = vst [vmem:[%s6144_s16 + $0x40] sm:$0xff] %v3000_v49  ;;  %v3003_v4 = vmul.f32 %v2971_v18, %v2875_v0  ;;  %v2969_v47 = vadd.f32 1.0, %v3698_v42 }
 0x2f0   : > { %3035 = vst [vmem:[%s6144_s16 + $0x58] sm:$0xff] %v3003_v4  ;;  %v3001_v52 = vmul.f32 %v2969_v47, %v2873_v34 }
 0x2f2   : > { %3033 = vst [vmem:[%s6144_s16 + $0x48] sm:$0xff] %v3001_v52 }
 0x2f3   : > { %v3397_v10 = vpop.f32.mrf.mxu1 }
 0x2f4   : > { %v2846_v40 = vadd.f32 %v3397_v10, %v6135_v63 }
 0x2f5   : > { %v2575_v5 = vpop.f32.mrf.mxu1 }
 0x2f6   : > { %v2910_v38 = vmul.f32 0.70710677, %v2846_v40  ;;  %v2844_v9 = vadd.f32 %v6135_v63, %v2575_v5  ;;  %v2878_v12 = vmul.f32 0.5, %v2846_v40 }
 0x2f7   : > { %v3398_v48 = vpop.f32.mrf.mxu1 }
 0x2f8   : > { %3699 = verf.f32 %v2910_v38  ;;  %v2908_v3 = vmul.f32 0.70710677, %v2844_v9  ;;  %v2847_v17 = vadd.f32 %v3398_v48, %v6135_v63  ;;  %v2876_v13 = vmul.f32 0.5, %v2844_v9 }
 0x2f9   : > { %v2578_v1 = vpop.f32.mrf.mxu1 }
 0x2fa   : > { %3701 = verf.f32 %v2908_v3  ;;  %v2911_v56 = vmul.f32 0.70710677, %v2847_v17  ;;  %v2845_v54 = vadd.f32 %v6135_v63, %v2578_v1  ;;  %v2879_v6 = vmul.f32 0.5, %v2847_v17 }
 0x2fc   : > { %3703 = verf.f32 %v2911_v56  ;;  %v2909_v51 = vmul.f32 0.70710677, %v2845_v54  ;;  %v2877_v62 = vmul.f32 0.5, %v2845_v54 }
 0x2fe   : > { %3705 = verf.f32 %v2909_v51 }
 0x305   : > { %v3700_v30 = vpop.eup %3699 }
 0x306   : > { %v2974_v26 = vadd.f32 1.0, %v3700_v30 }
 0x307   : > { %v3702_v15 = vpop.eup %3701 }
 0x308   : > { %v3006_v22 = vmul.f32 %v2974_v26, %v2878_v12  ;;  %v2972_v44 = vadd.f32 1.0, %v3702_v15 }
 0x309   : > { %v3704_v59 = vpop.eup %3703 }
 0x30a   : > { %3038 = vst [vmem:[%s6144_s16 + $0x70] sm:$0xff] %v3006_v22  ;;  %v3004_v27 = vmul.f32 %v2972_v44, %v2876_v13  ;;  %v2975_v36 = vadd.f32 1.0, %v3704_v59 }
 0x30b   : > { %v3706_v53 = vpop.eup %3705 }
 0x30c   : > { %3036 = vst [vmem:[%s6144_s16 + $0x60] sm:$0xff] %v3004_v27  ;;  %v3007_v33 = vmul.f32 %v2975_v36, %v2879_v6  ;;  %v2973_v32 = vadd.f32 1.0, %v3706_v53 }
 0x30e   : > { %3039 = vst [vmem:[%s6144_s16 + $0x78] sm:$0xff] %v3007_v33  ;;  %v3005_v35 = vmul.f32 %v2973_v32, %v2877_v62 }
 0x310   : > { %3037 = vst [vmem:[%s6144_s16 + $0x68] sm:$0xff] %v3005_v35 }
 0x312   : > { %v3401_v7 = vpop.f32.mrf.mxu1 }
 0x313   : > { %v2850_v19 = vadd.f32 %v3401_v7, %v6135_v63 }
 0x314   : > { %v2591_v41 = vpop.f32.mrf.mxu1 }
 0x315   : > { %v2914_v60 = vmul.f32 0.70710677, %v2850_v19  ;;  %v2848_v21 = vadd.f32 %v6135_v63, %v2591_v41  ;;  %v2882_v11 = vmul.f32 0.5, %v2850_v19 }
 0x316   : > { %v3402_v23 = vpop.f32.mrf.mxu1 }
 0x317   : > { %3707 = verf.f32 %v2914_v60  ;;  %v2912_v46 = vmul.f32 0.70710677, %v2848_v21  ;;  %v2851_v25 = vadd.f32 %v3402_v23, %v6135_v63  ;;  %v2880_v43 = vmul.f32 0.5, %v2848_v21 }
 0x318   : > { %v2594_v50 = vpop.f32.mrf.mxu1 }
 0x319   : > { %3709 = verf.f32 %v2912_v46  ;;  %v2915_v14 = vmul.f32 0.70710677, %v2851_v25  ;;  %v2849_v58 = vadd.f32 %v6135_v63, %v2594_v50  ;;  %v2883_v45 = vmul.f32 0.5, %v2851_v25 }
 0x31b   : > { %3711 = verf.f32 %v2915_v14  ;;  %v2913_v28 = vmul.f32 0.70710677, %v2849_v58  ;;  %v2881_v29 = vmul.f32 0.5, %v2849_v58 }
 0x31d   : > { %3713 = verf.f32 %v2913_v28 }
 0x324   : > { %v3708_v37 = vpop.eup %3707 }
 0x325   : > { %v2978_v57 = vadd.f32 1.0, %v3708_v37 }
 0x326   : > { %v3710_v8 = vpop.eup %3709 }
 0x327   : > { %v3010_v2 = vmul.f32 %v2978_v57, %v2882_v11  ;;  %v2976_v39 = vadd.f32 1.0, %v3710_v8 }
 0x328   : > { %v3712_v31 = vpop.eup %3711 }
 0x329   : > { %3042 = vst [vmem:[%s6144_s16 + $0x90] sm:$0xff] %v3010_v2  ;;  %v3008_v24 = vmul.f32 %v2976_v39, %v2880_v43  ;;  %v2979_v16 = vadd.f32 1.0, %v3712_v31 }
 0x32a   : > { %v3714_v55 = vpop.eup %3713 }
 0x32b   : > { %3040 = vst [vmem:[%s6144_s16 + $0x80] sm:$0xff] %v3008_v24  ;;  %v3011_v61 = vmul.f32 %v2979_v16, %v2883_v45  ;;  %v2977_v20 = vadd.f32 1.0, %v3714_v55 }
 0x32d   : > { %3043 = vst [vmem:[%s6144_s16 + $0x98] sm:$0xff] %v3011_v61  ;;  %v3009_v0 = vmul.f32 %v2977_v20, %v2881_v29 }
 0x32f   : > { %v3405_v49 = vpop.f32.mrf.mxu1  ;;  %3041 = vst [vmem:[%s6144_s16 + $0x88] sm:$0xff] %v3009_v0 }
 0x330   : > { %v2854_v18 = vadd.f32 %v3405_v49, %v6135_v63 }
 0x331   : > { %v2607_v42 = vpop.f32.mrf.mxu1 }
 0x332   : > { %v2918_v4 = vmul.f32 0.70710677, %v2854_v18  ;;  %v2852_v34 = vadd.f32 %v6135_v63, %v2607_v42  ;;  %v2886_v3 = vmul.f32 0.5, %v2854_v18 }
 0x333   : > { %v3406_v47 = vpop.f32.mrf.mxu1 }
 0x334   : > { %3715 = verf.f32 %v2918_v4  ;;  %v2916_v10 = vmul.f32 0.70710677, %v2852_v34  ;;  %v2855_v52 = vadd.f32 %v3406_v47, %v6135_v63  ;;  %v2884_v54 = vmul.f32 0.5, %v2852_v34 }
 0x335   : > { %v2610_v40 = vpop.f32.mrf.mxu1 }
 0x336   : > { %3717 = verf.f32 %v2916_v10  ;;  %v2919_v5 = vmul.f32 0.70710677, %v2855_v52  ;;  %v2853_v38 = vadd.f32 %v6135_v63, %v2610_v40  ;;  %v2887_v26 = vmul.f32 0.5, %v2855_v52 }
 0x338   : > { %3719 = verf.f32 %v2919_v5  ;;  %v2917_v9 = vmul.f32 0.70710677, %v2853_v38  ;;  %v2885_v44 = vmul.f32 0.5, %v2853_v38 }
 0x33a   : > { %3721 = verf.f32 %v2917_v9 }
 0x341   : > { %v3716_v48 = vpop.eup %3715 }
 0x342   : > { %v2982_v17 = vadd.f32 1.0, %v3716_v48 }
 0x343   : > { %v3718_v1 = vpop.eup %3717 }
 0x344   : > { %v3014_v56 = vmul.f32 %v2982_v17, %v2886_v3  ;;  %v2980_v51 = vadd.f32 1.0, %v3718_v1 }
 0x345   : > { %v3720_v30 = vpop.eup %3719 }
 0x346   : > { %3046 = vst [vmem:[%s6144_s16 + $0xb0] sm:$0xff] %v3014_v56  ;;  %v3012_v12 = vmul.f32 %v2980_v51, %v2884_v54  ;;  %v2983_v15 = vadd.f32 1.0, %v3720_v30 }
 0x347   : > { %v3722_v22 = vpop.eup %3721 }
 0x348   : > { %3044 = vst [vmem:[%s6144_s16 + $0xa0] sm:$0xff] %v3012_v12  ;;  %v3015_v13 = vmul.f32 %v2983_v15, %v2887_v26  ;;  %v2981_v59 = vadd.f32 1.0, %v3722_v22 }
 0x34a   : > { %3047 = vst [vmem:[%s6144_s16 + $0xb8] sm:$0xff] %v3015_v13  ;;  %v3013_v27 = vmul.f32 %v2981_v59, %v2885_v44 }
 0x34b   : > { %v3409_v6 = vpop.f32.mrf.mxu1 }
 0x34c   : > { %v2858_v36 = vadd.f32 %v3409_v6, %v6135_v63  ;;  %3045 = vst [vmem:[%s6144_s16 + $0xa8] sm:$0xff] %v3013_v27 }
 0x34d   : > { %v2623_v53 = vpop.f32.mrf.mxu1 }
 0x34e   : > { %v2922_v33 = vmul.f32 0.70710677, %v2858_v36  ;;  %v2856_v62 = vadd.f32 %v6135_v63, %v2623_v53  ;;  %v2890_v46 = vmul.f32 0.5, %v2858_v36 }
 0x34f   : > { %v3410_v32 = vpop.f32.mrf.mxu1 }
 0x350   : > { %3723 = verf.f32 %v2922_v33  ;;  %v2920_v35 = vmul.f32 0.70710677, %v2856_v62  ;;  %v2859_v7 = vadd.f32 %v3410_v32, %v6135_v63  ;;  %v2888_v58 = vmul.f32 0.5, %v2856_v62 }
 0x351   : > { %v2626_v19 = vpop.f32.mrf.mxu1 }
 0x352   : > { %3725 = verf.f32 %v2920_v35  ;;  %v2923_v41 = vmul.f32 0.70710677, %v2859_v7  ;;  %v2857_v60 = vadd.f32 %v6135_v63, %v2626_v19  ;;  %v2891_v57 = vmul.f32 0.5, %v2859_v7 }
 0x354   : > { %3727 = verf.f32 %v2923_v41  ;;  %v2921_v21 = vmul.f32 0.70710677, %v2857_v60  ;;  %v2889_v31 = vmul.f32 0.5, %v2857_v60 }
 0x356   : > { %3729 = verf.f32 %v2921_v21 }
 0x35d   : > { %v3724_v23 = vpop.eup %3723 }
 0x35e   : > { %v2986_v25 = vadd.f32 1.0, %v3724_v23 }
 0x35f   : > { %v3726_v50 = vpop.eup %3725 }
 0x360   : > { %v3018_v14 = vmul.f32 %v2986_v25, %v2890_v46  ;;  %v2984_v28 = vadd.f32 1.0, %v3726_v50 }
 0x361   : > { %v3728_v37 = vpop.eup %3727 }
 0x362   : > { %3050 = vst [vmem:[%s6144_s16 + $0xd0] sm:$0xff] %v3018_v14  ;;  %v3016_v11 = vmul.f32 %v2984_v28, %v2888_v58  ;;  %v2987_v8 = vadd.f32 1.0, %v3728_v37 }
 0x363   : > { %v3730_v2 = vpop.eup %3729  ;;  %v3413_v43 = vpop.f32.mrf.mxu1 }
 0x364   : > { %3048 = vst [vmem:[%s6144_s16 + $0xc0] sm:$0xff] %v3016_v11  ;;  %v3019_v39 = vmul.f32 %v2987_v8, %v2891_v57  ;;  %v2985_v24 = vadd.f32 1.0, %v3730_v2  ;;  %v2862_v45 = vadd.f32 %v3413_v43, %v6135_v63 }
 0x365   : > { %v2639_v16 = vpop.f32.mrf.mxu1 }
 0x366   : > { %3051 = vst [vmem:[%s6144_s16 + $0xd8] sm:$0xff] %v3019_v39  ;;  %v3017_v55 = vmul.f32 %v2985_v24, %v2889_v31  ;;  %v2926_v61 = vmul.f32 0.70710677, %v2862_v45  ;;  %v2860_v29 = vadd.f32 %v6135_v63, %v2639_v16  ;;  %v2894_v10 = vmul.f32 0.5, %v2862_v45 }
 0x367   : > { %v3414_v20 = vpop.f32.mrf.mxu1 }
 0x368   : > { %3049 = vst [vmem:[%s6144_s16 + $0xc8] sm:$0xff] %v3017_v55  ;;  %3731 = verf.f32 %v2926_v61  ;;  %v2924_v49 = vmul.f32 0.70710677, %v2860_v29  ;;  %v2863_v0 = vadd.f32 %v3414_v20, %v6135_v63  ;;  %v2892_v38 = vmul.f32 0.5, %v2860_v29 }
 0x369   : > { %v2642_v18 = vpop.f32.mrf.mxu1 }
 0x36a   : > { %3733 = verf.f32 %v2924_v49  ;;  %v2927_v42 = vmul.f32 0.70710677, %v2863_v0  ;;  %v2861_v4 = vadd.f32 %v6135_v63, %v2642_v18  ;;  %v2895_v63 = vmul.f32 0.5, %v2863_v0 }
 0x36c   : > { %3735 = verf.f32 %v2927_v42  ;;  %v2925_v34 = vmul.f32 0.70710677, %v2861_v4  ;;  %v2893_v54 = vmul.f32 0.5, %v2861_v4 }
 0x36e   : > { %3737 = verf.f32 %v2925_v34 }
 0x375   : > { %v3732_v47 = vpop.eup %3731 }
 0x376   : > { %v2990_v52 = vadd.f32 1.0, %v3732_v47 }
 0x377   : > { %v3734_v40 = vpop.eup %3733 }
 0x378   : > { %v3022_v5 = vmul.f32 %v2990_v52, %v2894_v10  ;;  %v2988_v9 = vadd.f32 1.0, %v3734_v40 }
 0x379   : > { %v3736_v48 = vpop.eup %3735 }
 0x37a   : > { %3054 = vst [vmem:[%s6144_s16 + $0xf0] sm:$0xff] %v3022_v5  ;;  %v3020_v3 = vmul.f32 %v2988_v9, %v2892_v38  ;;  %v2991_v17 = vadd.f32 1.0, %v3736_v48 }
 0x37b   : > { %v3738_v1 = vpop.eup %3737 }
 0x37c   : > { %3052 = vst [vmem:[%s6144_s16 + $0xe0] sm:$0xff] %v3020_v3  ;;  %v3023_v56 = vmul.f32 %v2991_v17, %v2895_v63  ;;  %v2989_v51 = vadd.f32 1.0, %v3738_v1 }
 0x37e   : > { %3055 = vst [vmem:[%s6144_s16 + $0xf8] sm:$0xff] %v3023_v56  ;;  %v3021_v30 = vmul.f32 %v2989_v51, %v2893_v54 }
 0x380   : > { %3053 = vst [vmem:[%s6144_s16 + $0xe8] sm:$0xff] %v3021_v30 }
 0x381   : > { %3860 = shalt.err (!%p3857_p2)
}
 0x382   : > { %s3861_s11 = scalar_lea.hbm %s6207_s22, 4096  ;;  %s3865_s30 = scalar_lea.hbm %s6266_s7, 8192 }
 0x383   : > { %p3862_p7 = scmp.ne.s32.totalorder %s6207_s22, %s3861_s11  ;;  %p3866_p13 = scmp.lt.s32.totalorder %s6207_s22, %s6266_s7 }
 0x384   : > { %p3867_p0 = scmp.lt.s32.totalorder %s3865_s30, %s3861_s11 }
 0x385   : > { %p3863_p9 = pnand %p3862_p7, %p6741_p4 }
 0x386   : > { %p3868_p3 = por %p3867_p0, %p3866_p13 }
 0x387   : > { %p3864_p12 = pneg %p3863_p9 }
 0x389   : > { %p3869_p1 = pnand %p3868_p3, %p3864_p12 }
 0x38b   : > { %3872 = shalt.err (!%p3869_p1)
}
 0x38c   : > { %s3947_s16 = smov 128   ;;  %s3948_s20 = smov 8  }
 0x38d   : > { %3429 = dma.vmem_to_hbm [thread:$0]  (%p6741_p4), %s6209_s1, 4096, %s6207_s22, %s3057_s27, %s3947_s16, %s3947_s16, %s3948_s20  }
 0x38e PF: > { %s3085_s14 = sand.u32 1, %s3915_s24   ;;  %p6742_p6 = scmp.ne.s32.totalorder %s6328_s12, 0 }
 0x38f   : > { %p6743_p8 = scmp.ge.s32.totalorder %s3935_s29, 2  ;;  %s3086_s8 = scalar_lea.sflag [#allocation4], %s3085_s14 }
 0x391   : > { %p3446_p10 = pnand %p6743_p8, %p6742_p6 }
 0x393   : > { %p3447_p5 = pneg %p3446_p10 }
 0x395   : > { %3910 = dma.done.wait (%p3447_p5), %s3086_s8, 4096  }
 0x396   : > { %3912 = vsyncadd (%p3447_p5), %s3086_s8, 4294963200  ;;  %s25_s29 = sadd.s32 1, %s3935_s29   ;;  %s6744_s17 = sld [smem:[#allocation15_spill]] }
 0x397   : > { %p22_p11 = scmp.ge.s32.totalorder %s25_s29, 4   ;;  %s6745_s24 = smov %s3919_s25 }
 0x398   : > { %s6746_s25 = smov %s3923_s26  ;;  %s6747_s26 = smov %s4110_s23 }
 0x399   : > { %s6748_s27 = smov %s3931_s28  ;;  %24 = sbr.rel (!%p22_p11) target bundleno = 12 (0xc), region = 126 }
 0x39c   : > { %s6749_s28 = smov %s6744_s17 }
 0x39e   :  { %3091 = vsyncpa [#allocation3], 1 }
 0x39f   :  { %3093 = vsyncpa [#allocation3 + $0x1], 1 }
 0x3a0   :  { %3094 = vsyncpa [#allocation6], 1 }
 0x3a1   :  { %3095 = vsyncpa [#allocation9], 1 }
 0x3a2   :  { %3096 = vsyncpa [#allocation4], 1 }
 0x3a3   :  { %3098 = vsyncpa [#allocation4 + $0x1], 1 }

</bundles_post_ra>
